<compile_context>
chip_gen: v7x
topology: tpu7x:2x2x1
jax: 0.10.0
libtpu: 0.0.40
codegen_flags: <defaults>
</compile_context>

<pallas_src>
import jax
import jax.numpy as jnp
import numpy as np
from jax.experimental import pallas as pl
from jax.experimental.pallas import tpu as pltpu


def _round_up(x, m):
    return ((x + m - 1) // m) * m


# ---------------------------------------------------------------------------
# Parameter preparation (one-time repack; no runtime cost inside the forward)
# ---------------------------------------------------------------------------

def _block_diag_conv_weight(w, w_out):
    """(3,3,Cin,Cout) HWIO -> (9, w_out*Cin, w_out*Cout) block-diagonal weights
    so that a 3x3 VALID conv becomes 9 plain 2-D matmuls on (H, W*C) slabs."""
    _, _, c_in, c_out = w.shape
    w9 = w.reshape(9, c_in, c_out)
    eye = jnp.eye(w_out, dtype=w.dtype)
    wbd = jnp.einsum('ekn,wv->ewkvn', w9, eye)          # (9, Wout, Cin, Wout, Cout)
    return wbd.reshape(9, w_out * c_in, w_out * c_out)


def _pool_row_select(h_out, pad):
    """0/1 matrices (2, ph, h_out) selecting the top/bottom row of each 2x2
    window (PyTorch floor mode; padded rows stay all-zero, valid post-ReLU)."""
    ph = (h_out + 2 * pad - 2) // 2 + 1
    sel = np.zeros((2, ph, h_out), np.float32)
    for p in range(ph):
        for j in range(2):
            r = 2 * p - pad + j
            if 0 <= r < h_out:
                sel[j, p, r] = 1.0
    return sel


def _pool_col_select(w_out, c_out, pad):
    """0/1 matrices (2, w_out*c_out, pw*c_out) selecting the left/right column
    group (channel-interleaved lanes) of each 2x2 window."""
    pw = (w_out + 2 * pad - 2) // 2 + 1
    sel = np.zeros((2, w_out * c_out, pw * c_out), np.float32)
    for p in range(pw):
        for j in range(2):
            c = 2 * p - pad + j
            if 0 <= c < w_out:
                for ch in range(c_out):
                    sel[j, c * c_out + ch, p * c_out + ch] = 1.0
    return sel


def prepare_params(params):
    """One-time repack of the module parameters into kernel-ready form."""
    bf16 = jnp.bfloat16
    kp = {}
    stages = [("1", params["w1"], params["b1"], 32, 0),
              ("2", params["w2"], params["b2"], 15, 1),
              ("3", params["w3"], params["b3"], 7, 1)]
    for name, w, b, h_in, pool_pad in stages:
        h_out = h_in - 2                                  # square VALID 3x3 conv
        c_out = w.shape[-1]
        kp["wbd" + name] = _block_diag_conv_weight(w, h_out).astype(bf16)
        kp["brow" + name] = jnp.tile(b.astype(jnp.float32), h_out)[None, :]
        kp["prow" + name] = jnp.asarray(_pool_row_select(h_out, pool_pad), bf16)
        kp["scol" + name] = jnp.asarray(_pool_col_select(h_out, c_out, pool_pad), bf16)
    # fc1: permute rows from PyTorch (c,h,w) flatten order to the kernel's (h,w,c).
    wf1 = params["wf1"].reshape(32, 3, 3, 1024).transpose(1, 2, 0, 3).reshape(288, 1024)
    kp["wf1p"] = wf1.astype(bf16)
    kp["bf1r"] = params["bf1"].astype(jnp.float32)[None, :]
    # fc2: pad N from 10 to 128 so the output store is lane-dense.
    kp["wf2p"] = jnp.pad(params["wf2"], ((0, 0), (0, 128 - 10))).astype(bf16)
    kp["bf2r"] = jnp.pad(params["bf2"], (0, 128 - 10)).astype(jnp.float32)[None, :]
    return kp


# ---------------------------------------------------------------------------
# Pallas kernels
# ---------------------------------------------------------------------------

def _conv_stack_kernel(x_ref,
                       w1_ref, b1_ref, p1_ref, s1_ref,
                       w2_ref, b2_ref, p2_ref, s2_ref,
                       w3_ref, b3_ref, p3_ref, s3_ref,
                       o_ref):
    """Per-image fused conv1..3 + ReLU + 2x2 max-pool (all activations on-chip)."""

    def conv_pool(a, w_ref, b_ref, p_ref, s_ref, h_out, c_in):
        k_cols = w_ref.shape[1]                           # W_out * C_in
        acc = jnp.zeros((h_out, w_ref.shape[2]), jnp.float32)
        # In-kernel im2col: 9 static slices of the (H, W*C) slab, 9 MXU matmuls.
        for dy in range(3):
            for dx in range(3):
                patch = a[dy:dy + h_out, dx * c_in:dx * c_in + k_cols]
                acc = acc + jnp.dot(patch, w_ref[dy * 3 + dx],
                                    preferred_element_type=jnp.float32)
        y = jnp.maximum(acc + b_ref[...], 0.0).astype(jnp.bfloat16)
        # Fused 2x2 max-pool: row-select then column-select with 0/1 matrices.
        rows = jnp.maximum(
            jnp.dot(p_ref[0], y, preferred_element_type=jnp.float32),
            jnp.dot(p_ref[1], y, preferred_element_type=jnp.float32),
        ).astype(jnp.bfloat16)
        return jnp.maximum(
            jnp.dot(rows, s_ref[0], preferred_element_type=jnp.float32),
            jnp.dot(rows, s_ref[1], preferred_element_type=jnp.float32),
        ).astype(jnp.bfloat16)

    a = x_ref[0]                                                   # (32, 96)
    a = conv_pool(a, w1_ref, b1_ref, p1_ref, s1_ref, 30, 3)        # (15, 120)
    a = conv_pool(a, w2_ref, b2_ref, p2_ref, s2_ref, 13, 8)        # (7, 112)
    a = conv_pool(a, w3_ref, b3_ref, p3_ref, s3_ref, 5, 16)        # (3, 96)
    o_ref[0] = a


def _fc_kernel(x_ref, w1_ref, b1_ref, w2_ref, b2_ref, o_ref):
    """Fused fc1 (ReLU) + fc2 on an M-tile of the batch; weights VMEM-resident."""
    h = jnp.dot(x_ref[...], w1_ref[...], preferred_element_type=jnp.float32)
    h = jnp.maximum(h + b1_ref[...], 0.0).astype(jnp.bfloat16)
    y = jnp.dot(h, w2_ref[...], preferred_element_type=jnp.float32)
    o_ref[...] = y + b2_ref[...]


# ---------------------------------------------------------------------------
# pallas_call wrappers
# ---------------------------------------------------------------------------

def _full_spec(arr):
    ndim = arr.ndim

    def idx(i):
        return (0,) * ndim

    return pl.BlockSpec(arr.shape, idx)


def conv_stack_pallas(a, kp):
    """a: (B, 32, 96) bf16 -> (B, 3, 96) bf16 pooled conv3 features."""
    B = a.shape[0]
    consts = [kp["wbd1"], kp["brow1"], kp["prow1"], kp["scol1"],
              kp["wbd2"], kp["brow2"], kp["prow2"], kp["scol2"],
              kp["wbd3"], kp["brow3"], kp["prow3"], kp["scol3"]]
    return pl.pallas_call(
        _conv_stack_kernel,
        grid=(B,),
        in_specs=[pl.BlockSpec((1, 32, 96), lambda i: (i, 0, 0))]
                 + [_full_spec(c) for c in consts],
        out_specs=pl.BlockSpec((1, 3, 96), lambda i: (i, 0, 0)),
        out_shape=jax.ShapeDtypeStruct((B, 3, 96), jnp.bfloat16),
        compiler_params=pltpu.CompilerParams(dimension_semantics=("parallel",)),
    )(a, *consts)


def fc_pallas(feats, kp):
    """feats: (B, 288) bf16 -> logits (B, 10) f32.  fc1+fc2 fused, tiled over M."""
    B = feats.shape[0]
    tm = min(512, _round_up(B, 16))
    bp = _round_up(B, tm)
    if bp != B:
        feats = jnp.pad(feats, ((0, bp - B), (0, 0)))
    out = pl.pallas_call(
        _fc_kernel,
        grid=(bp // tm,),
        in_specs=[pl.BlockSpec((tm, 288), lambda i: (i, 0)),
                  _full_spec(kp["wf1p"]), _full_spec(kp["bf1r"]),
                  _full_spec(kp["wf2p"]), _full_spec(kp["bf2r"])],
        out_specs=pl.BlockSpec((tm, 128), lambda i: (i, 0)),
        out_shape=jax.ShapeDtypeStruct((bp, 128), jnp.float32),
        compiler_params=pltpu.CompilerParams(dimension_semantics=("parallel",)),
    )(feats, kp["wf1p"], kp["bf1r"], kp["wf2p"], kp["bf2r"])
    return out[:B, :10]


# ---------------------------------------------------------------------------
# Full forward pass (mirrors CNN.forward)
# ---------------------------------------------------------------------------

def cnn_forward(x, kp):
    x = x.reshape(-1, 3, 32, 32)                           # mirrors X.view(-1,3,32,32)
    B = x.shape[0]
    # NCHW -> (B, H, W*C) slabs; cast matmul operands to bf16 (f32 accumulate).
    a = jnp.transpose(x, (0, 2, 3, 1)).reshape(B, 32, 32 * 3).astype(jnp.bfloat16)
    feats = conv_stack_pallas(a, kp)                       # (B, 3, 96)
    return fc_pallas(feats.reshape(B, 288), kp)            # (B, 10)


# ---------------------------------------------------------------------------
# Pure-JAX reference (PyTorch semantics; bf16 operands / f32 accumulation to
# mirror the kernel's TPU matmul numerics)
# ---------------------------------------------------------------------------

def cnn_reference(x, params):
    x = x.reshape(-1, 3, 32, 32)

    def conv_relu(x, w, b):
        w_oihw = jnp.transpose(w, (3, 2, 0, 1))
        y = jax.lax.conv_general_dilated(
            x.astype(jnp.bfloat16), w_oihw.astype(jnp.bfloat16),
            window_strides=(1, 1), padding="VALID",
            dimension_numbers=("NCHW", "OIHW", "NCHW"),
            preferred_element_type=jnp.float32)
        return jax.nn.relu(y + b[None, :, None, None])

    def pool(x, pad):
        if pad:
            x = jnp.pad(x, ((0, 0), (0, 0), (1, 1), (1, 1)),
                        constant_values=-jnp.inf)
        Bn, C, H, W = x.shape
        ph, pw = H // 2, W // 2
        x = x[:, :, :2 * ph, :2 * pw].reshape(Bn, C, ph, 2, pw, 2)
        return jnp.max(x, axis=(3, 5))

    x = pool(conv_relu(x, params["w1"], params["b1"]), 0)
    x = pool(conv_relu(x, params["w2"], params["b2"]), 1)
    x = pool(conv_relu(x, params["w3"], params["b3"]), 1)
    B = x.shape[0]
    x = x.reshape(B, 288)                                  # PyTorch (C,H,W) flatten
    h = jax.nn.relu(jnp.dot(x.astype(jnp.bfloat16), params["wf1"].astype(jnp.bfloat16),
                            preferred_element_type=jnp.float32) + params["bf1"])
    return jnp.dot(h.astype(jnp.bfloat16), params["wf2"].astype(jnp.bfloat16),
                   preferred_element_type=jnp.float32) + params["bf2"]


# ---------------------------------------------------------------------------

if __name__ == "__main__":
    key = jax.random.PRNGKey(0)
    ks = jax.random.split(key, 11)

    def init(k, shape, fan_in):
        return jax.random.normal(k, shape, jnp.float32) * (2.0 / fan_in) ** 0.5

    params = dict(
        w1=init(ks[0], (3, 3, 3, 8), 27),
        b1=jax.random.normal(ks[1], (8,), jnp.float32) * 0.01,
        w2=init(ks[2], (3, 3, 8, 16), 72),
        b2=jax.random.normal(ks[3], (16,), jnp.float32) * 0.01,
        w3=init(ks[4], (3, 3, 16, 32), 144),
        b3=jax.random.normal(ks[5], (32,), jnp.float32) * 0.01,
        wf1=init(ks[6], (288, 1024), 288),
        bf1=jax.random.normal(ks[7], (1024,), jnp.float32) * 0.01,
        wf2=init(ks[8], (1024, 10), 1024),
        bf2=jax.random.normal(ks[9], (10,), jnp.float32) * 0.01,
    )

    x = jax.random.normal(ks[10], (2, 3, 32, 32), jnp.float32)  # NCHW, like PyTorch

    kp = prepare_params(params)                 # one-time weight repack
    out = jax.block_until_ready(jax.jit(cnn_forward)(x, kp))

    ref = cnn_reference(x, params)
    assert out.shape == (2, 10), out.shape
    max_diff = float(jnp.max(jnp.abs(out - ref)))
    assert max_diff < 2e-2, "max abs diff = %f" % max_diff
    print("KERNEL_OK")
</pallas_src>

<mosaic_0001>
module attributes {stable_mosaic.version = 11 : i64} {
  func.func @_fc_kernel(%arg0: i32, %arg1: memref<16x288xbf16, #tpu.memory_space<vmem>>, %arg2: memref<288x1024xbf16, #tpu.memory_space<vmem>>, %arg3: memref<1x1024xf32, #tpu.memory_space<vmem>>, %arg4: memref<1024x128xbf16, #tpu.memory_space<vmem>>, %arg5: memref<1x128xf32, #tpu.memory_space<vmem>>, %arg6: memref<16x128xf32, #tpu.memory_space<vmem>>) attributes {dimension_semantics = [#tpu.dimension_semantics<parallel>], iteration_bounds = array<i64: 1>, scalar_prefetch = 0 : i64, scratch_operands = 0 : i64, tpu.core_type = #tpu.core_type<tc>, window_params = [{transform_indices = @transform_0, window_bounds = array<i64: 16, 288>}, {pipeline_mode = #tpu.pipeline_mode<synchronous>, transform_indices = @transform_1, window_bounds = array<i64: 288, 1024>}, {pipeline_mode = #tpu.pipeline_mode<synchronous>, transform_indices = @transform_2, window_bounds = array<i64: 1, 1024>}, {pipeline_mode = #tpu.pipeline_mode<synchronous>, transform_indices = @transform_3, window_bounds = array<i64: 1024, 128>}, {pipeline_mode = #tpu.pipeline_mode<synchronous>, transform_indices = @transform_4, window_bounds = array<i64: 1, 128>}, {transform_indices = @transform_5, window_bounds = array<i64: 16, 128>}]} {
    %c0 = arith.constant 0 : index
    %c0_0 = arith.constant 0 : index
    %0 = vector.load %arg1[%c0, %c0_0] : memref<16x288xbf16, #tpu.memory_space<vmem>>, vector<16x288xbf16>
    %c0_1 = arith.constant 0 : index
    %c0_2 = arith.constant 0 : index
    %1 = vector.load %arg2[%c0_1, %c0_2] : memref<288x1024xbf16, #tpu.memory_space<vmem>>, vector<288x1024xbf16>
    %cst = arith.constant dense<0.000000e+00> : vector<16x1024xf32>
    %2 = tpu.matmul %0, %1, %cst {dimension_numbers = #tpu.dot_dimension_numbers<[1], [0], [0], [1], [0, 0, 1, 1], [], []>} : vector<16x288xbf16>, vector<288x1024xbf16>, vector<16x1024xf32> -> vector<16x1024xf32>
    %c0_3 = arith.constant 0 : index
    %c0_4 = arith.constant 0 : index
    %3 = vector.load %arg3[%c0_3, %c0_4] : memref<1x1024xf32, #tpu.memory_space<vmem>>, vector<1x1024xf32>
    %4 = vector.broadcast %3 : vector<1x1024xf32> to vector<16x1024xf32>
    %5 = arith.addf %2, %4 : vector<16x1024xf32>
    %cst_5 = arith.constant 0.000000e+00 : f32
    %6 = vector.broadcast %cst_5 : f32 to vector<16x1024xf32>
    %7 = arith.maximumf %5, %6 : vector<16x1024xf32>
    %8 = arith.truncf %7 : vector<16x1024xf32> to vector<16x1024xbf16>
    %c0_6 = arith.constant 0 : index
    %c0_7 = arith.constant 0 : index
    %9 = vector.load %arg4[%c0_6, %c0_7] : memref<1024x128xbf16, #tpu.memory_space<vmem>>, vector<1024x128xbf16>
    %cst_8 = arith.constant dense<0.000000e+00> : vector<16x128xf32>
    %10 = tpu.matmul %8, %9, %cst_8 {dimension_numbers = #tpu.dot_dimension_numbers<[1], [0], [0], [1], [0, 0, 1, 1], [], []>} : vector<16x1024xbf16>, vector<1024x128xbf16>, vector<16x128xf32> -> vector<16x128xf32>
    %c0_9 = arith.constant 0 : index
    %c0_10 = arith.constant 0 : index
    %11 = vector.load %arg5[%c0_9, %c0_10] : memref<1x128xf32, #tpu.memory_space<vmem>>, vector<1x128xf32>
    %12 = vector.broadcast %11 : vector<1x128xf32> to vector<16x128xf32>
    %13 = arith.addf %10, %12 : vector<16x128xf32>
    %c0_11 = arith.constant 0 : index
    %c0_12 = arith.constant 0 : index
    %14 = vector.load %arg6[%c0_11, %c0_12] : memref<16x128xf32, #tpu.memory_space<vmem>>, vector<16x128xf32>
    tpu.vector_store %arg6[%c0_11, %c0_12], %13 {strides = array<i32>} : memref<16x128xf32, #tpu.memory_space<vmem>>, vector<16x128xf32>,
    return
  }
  func.func @transform_0(%arg0: i32) -> (i32, i32) {
    %c0_i32 = arith.constant 0 : i32
    %c0_i32_0 = arith.constant 0 : i32
    return %arg0, %c0_i32 : i32, i32
  }
  func.func @transform_1(%arg0: i32) -> (i32, i32) {
    %c0_i32 = arith.constant 0 : i32
    %c0_i32_0 = arith.constant 0 : i32
    %c0_i32_1 = arith.constant 0 : i32
    return %c0_i32, %c0_i32_0 : i32, i32
  }
  func.func @transform_2(%arg0: i32) -> (i32, i32) {
    %c0_i32 = arith.constant 0 : i32
    %c0_i32_0 = arith.constant 0 : i32
    %c0_i32_1 = arith.constant 0 : i32
    return %c0_i32, %c0_i32_0 : i32, i32
  }
  func.func @transform_3(%arg0: i32) -> (i32, i32) {
    %c0_i32 = arith.constant 0 : i32
    %c0_i32_0 = arith.constant 0 : i32
    %c0_i32_1 = arith.constant 0 : i32
    return %c0_i32, %c0_i32_0 : i32, i32
  }
  func.func @transform_4(%arg0: i32) -> (i32, i32) {
    %c0_i32 = arith.constant 0 : i32
    %c0_i32_0 = arith.constant 0 : i32
    %c0_i32_1 = arith.constant 0 : i32
    return %c0_i32, %c0_i32_0 : i32, i32
  }
  func.func @transform_5(%arg0: i32) -> (i32, i32) {
    %c0_i32 = arith.constant 0 : i32
    %c0_i32_0 = arith.constant 0 : i32
    return %arg0, %c0_i32 : i32, i32
  }
}

module attributes {stable_mosaic.version = 11 : i64} {
  func.func @_conv_stack_kernel(%arg0: i32, %arg1: memref<1x32x96xbf16, #tpu.memory_space<vmem>>, %arg2: memref<9x90x240xbf16, #tpu.memory_space<vmem>>, %arg3: memref<1x240xf32, #tpu.memory_space<vmem>>, %arg4: memref<2x15x30xbf16, #tpu.memory_space<vmem>>, %arg5: memref<2x240x120xbf16, #tpu.memory_space<vmem>>, %arg6: memref<9x104x208xbf16, #tpu.memory_space<vmem>>, %arg7: memref<1x208xf32, #tpu.memory_space<vmem>>, %arg8: memref<2x7x13xbf16, #tpu.memory_space<vmem>>, %arg9: memref<2x208x112xbf16, #tpu.memory_space<vmem>>, %arg10: memref<9x80x160xbf16, #tpu.memory_space<vmem>>, %arg11: memref<1x160xf32, #tpu.memory_space<vmem>>, %arg12: memref<2x3x5xbf16, #tpu.memory_space<vmem>>, %arg13: memref<2x160x96xbf16, #tpu.memory_space<vmem>>, %arg14: memref<1x3x96xbf16, #tpu.memory_space<vmem>>) attributes {dimension_semantics = [#tpu.dimension_semantics<parallel>], iteration_bounds = array<i64: 2>, scalar_prefetch = 0 : i64, scratch_operands = 0 : i64, tpu.core_type = #tpu.core_type<tc>, window_params = [{transform_indices = @transform_0, window_bounds = array<i64: 1, 32, 96>}, {pipeline_mode = #tpu.pipeline_mode<synchronous>, transform_indices = @transform_1, window_bounds = array<i64: 9, 90, 240>}, {pipeline_mode = #tpu.pipeline_mode<synchronous>, transform_indices = @transform_2, window_bounds = array<i64: 1, 240>}, {pipeline_mode = #tpu.pipeline_mode<synchronous>, transform_indices = @transform_3, window_bounds = array<i64: 2, 15, 30>}, {pipeline_mode = #tpu.pipeline_mode<synchronous>, transform_indices = @transform_4, window_bounds = array<i64: 2, 240, 120>}, {pipeline_mode = #tpu.pipeline_mode<synchronous>, transform_indices = @transform_5, window_bounds = array<i64: 9, 104, 208>}, {pipeline_mode = #tpu.pipeline_mode<synchronous>, transform_indices = @transform_6, window_bounds = array<i64: 1, 208>}, {pipeline_mode = #tpu.pipeline_mode<synchronous>, transform_indices = @transform_7, window_bounds = array<i64: 2, 7, 13>}, {pipeline_mode = #tpu.pipeline_mode<synchronous>, transform_indices = @transform_8, window_bounds = array<i64: 2, 208, 112>}, {pipeline_mode = #tpu.pipeline_mode<synchronous>, transform_indices = @transform_9, window_bounds = array<i64: 9, 80, 160>}, {pipeline_mode = #tpu.pipeline_mode<synchronous>, transform_indices = @transform_10, window_bounds = array<i64: 1, 160>}, {pipeline_mode = #tpu.pipeline_mode<synchronous>, transform_indices = @transform_11, window_bounds = array<i64: 2, 3, 5>}, {pipeline_mode = #tpu.pipeline_mode<synchronous>, transform_indices = @transform_12, window_bounds = array<i64: 2, 160, 96>}, {transform_indices = @transform_13, window_bounds = array<i64: 1, 3, 96>}]} {
    %c0 = arith.constant 0 : index
    %c0_0 = arith.constant 0 : index
    %c0_1 = arith.constant 0 : index
    %0 = vector.load %arg1[%c0, %c0_0, %c0_1] : memref<1x32x96xbf16, #tpu.memory_space<vmem>>, vector<1x32x96xbf16>
    %1 = vector.shape_cast %0 : vector<1x32x96xbf16> to vector<32x96xbf16>
    %cst = arith.constant 0.000000e+00 : f32
    %2 = vector.broadcast %cst : f32 to vector<30x240xf32>
    %3 = vector.extract_strided_slice %1 {offsets = [0, 0], sizes = [30, 90], strides = [1, 1]} : vector<32x96xbf16> to vector<30x90xbf16>
    %c0_2 = arith.constant 0 : index
    %c0_3 = arith.constant 0 : index
    %c0_4 = arith.constant 0 : index
    %4 = vector.load %arg2[%c0_2, %c0_3, %c0_4] : memref<9x90x240xbf16, #tpu.memory_space<vmem>>, vector<1x90x240xbf16>
    %5 = vector.shape_cast %4 : vector<1x90x240xbf16> to vector<90x240xbf16>
    %cst_5 = arith.constant dense<0.000000e+00> : vector<30x240xf32>
    %6 = tpu.matmul %3, %5, %cst_5 {dimension_numbers = #tpu.dot_dimension_numbers<[1], [0], [0], [1], [0, 0, 1, 1], [], []>} : vector<30x90xbf16>, vector<90x240xbf16>, vector<30x240xf32> -> vector<30x240xf32>
    %7 = arith.addf %2, %6 : vector<30x240xf32>
    %8 = vector.extract_strided_slice %1 {offsets = [0, 3], sizes = [30, 90], strides = [1, 1]} : vector<32x96xbf16> to vector<30x90xbf16>
    %c1 = arith.constant 1 : index
    %c0_6 = arith.constant 0 : index
    %c0_7 = arith.constant 0 : index
    %9 = vector.load %arg2[%c1, %c0_6, %c0_7] : memref<9x90x240xbf16, #tpu.memory_space<vmem>>, vector<1x90x240xbf16>
    %10 = vector.shape_cast %9 : vector<1x90x240xbf16> to vector<90x240xbf16>
    %cst_8 = arith.constant dense<0.000000e+00> : vector<30x240xf32>
    %11 = tpu.matmul %8, %10, %cst_8 {dimension_numbers = #tpu.dot_dimension_numbers<[1], [0], [0], [1], [0, 0, 1, 1], [], []>} : vector<30x90xbf16>, vector<90x240xbf16>, vector<30x240xf32> -> vector<30x240xf32>
    %12 = arith.addf %7, %11 : vector<30x240xf32>
    %13 = vector.extract_strided_slice %1 {offsets = [0, 6], sizes = [30, 90], strides = [1, 1]} : vector<32x96xbf16> to vector<30x90xbf16>
    %c2 = arith.constant 2 : index
    %c0_9 = arith.constant 0 : index
    %c0_10 = arith.constant 0 : index
    %14 = vector.load %arg2[%c2, %c0_9, %c0_10] : memref<9x90x240xbf16, #tpu.memory_space<vmem>>, vector<1x90x240xbf16>
    %15 = vector.shape_cast %14 : vector<1x90x240xbf16> to vector<90x240xbf16>
    %cst_11 = arith.constant dense<0.000000e+00> : vector<30x240xf32>
    %16 = tpu.matmul %13, %15, %cst_11 {dimension_numbers = #tpu.dot_dimension_numbers<[1], [0], [0], [1], [0, 0, 1, 1], [], []>} : vector<30x90xbf16>, vector<90x240xbf16>, vector<30x240xf32> -> vector<30x240xf32>
    %17 = arith.addf %12, %16 : vector<30x240xf32>
    %18 = vector.extract_strided_slice %1 {offsets = [1, 0], sizes = [30, 90], strides = [1, 1]} : vector<32x96xbf16> to vector<30x90xbf16>
    %c3 = arith.constant 3 : index
    %c0_12 = arith.constant 0 : index
    %c0_13 = arith.constant 0 : index
    %19 = vector.load %arg2[%c3, %c0_12, %c0_13] : memref<9x90x240xbf16, #tpu.memory_space<vmem>>, vector<1x90x240xbf16>
    %20 = vector.shape_cast %19 : vector<1x90x240xbf16> to vector<90x240xbf16>
    %cst_14 = arith.constant dense<0.000000e+00> : vector<30x240xf32>
    %21 = tpu.matmul %18, %20, %cst_14 {dimension_numbers = #tpu.dot_dimension_numbers<[1], [0], [0], [1], [0, 0, 1, 1], [], []>} : vector<30x90xbf16>, vector<90x240xbf16>, vector<30x240xf32> -> vector<30x240xf32>
    %22 = arith.addf %17, %21 : vector<30x240xf32>
    %23 = vector.extract_strided_slice %1 {offsets = [1, 3], sizes = [30, 90], strides = [1, 1]} : vector<32x96xbf16> to vector<30x90xbf16>
    %c4 = arith.constant 4 : index
    %c0_15 = arith.constant 0 : index
    %c0_16 = arith.constant 0 : index
    %24 = vector.load %arg2[%c4, %c0_15, %c0_16] : memref<9x90x240xbf16, #tpu.memory_space<vmem>>, vector<1x90x240xbf16>
    %25 = vector.shape_cast %24 : vector<1x90x240xbf16> to vector<90x240xbf16>
    %cst_17 = arith.constant dense<0.000000e+00> : vector<30x240xf32>
    %26 = tpu.matmul %23, %25, %cst_17 {dimension_numbers = #tpu.dot_dimension_numbers<[1], [0], [0], [1], [0, 0, 1, 1], [], []>} : vector<30x90xbf16>, vector<90x240xbf16>, vector<30x240xf32> -> vector<30x240xf32>
    %27 = arith.addf %22, %26 : vector<30x240xf32>
    %28 = vector.extract_strided_slice %1 {offsets = [1, 6], sizes = [30, 90], strides = [1, 1]} : vector<32x96xbf16> to vector<30x90xbf16>
    %c5 = arith.constant 5 : index
    %c0_18 = arith.constant 0 : index
    %c0_19 = arith.constant 0 : index
    %29 = vector.load %arg2[%c5, %c0_18, %c0_19] : memref<9x90x240xbf16, #tpu.memory_space<vmem>>, vector<1x90x240xbf16>
    %30 = vector.shape_cast %29 : vector<1x90x240xbf16> to vector<90x240xbf16>
    %cst_20 = arith.constant dense<0.000000e+00> : vector<30x240xf32>
    %31 = tpu.matmul %28, %30, %cst_20 {dimension_numbers = #tpu.dot_dimension_numbers<[1], [0], [0], [1], [0, 0, 1, 1], [], []>} : vector<30x90xbf16>, vector<90x240xbf16>, vector<30x240xf32> -> vector<30x240xf32>
    %32 = arith.addf %27, %31 : vector<30x240xf32>
    %33 = vector.extract_strided_slice %1 {offsets = [2, 0], sizes = [30, 90], strides = [1, 1]} : vector<32x96xbf16> to vector<30x90xbf16>
    %c6 = arith.constant 6 : index
    %c0_21 = arith.constant 0 : index
    %c0_22 = arith.constant 0 : index
    %34 = vector.load %arg2[%c6, %c0_21, %c0_22] : memref<9x90x240xbf16, #tpu.memory_space<vmem>>, vector<1x90x240xbf16>
    %35 = vector.shape_cast %34 : vector<1x90x240xbf16> to vector<90x240xbf16>
    %cst_23 = arith.constant dense<0.000000e+00> : vector<30x240xf32>
    %36 = tpu.matmul %33, %35, %cst_23 {dimension_numbers = #tpu.dot_dimension_numbers<[1], [0], [0], [1], [0, 0, 1, 1], [], []>} : vector<30x90xbf16>, vector<90x240xbf16>, vector<30x240xf32> -> vector<30x240xf32>
    %37 = arith.addf %32, %36 : vector<30x240xf32>
    %38 = vector.extract_strided_slice %1 {offsets = [2, 3], sizes = [30, 90], strides = [1, 1]} : vector<32x96xbf16> to vector<30x90xbf16>
    %c7 = arith.constant 7 : index
    %c0_24 = arith.constant 0 : index
    %c0_25 = arith.constant 0 : index
    %39 = vector.load %arg2[%c7, %c0_24, %c0_25] : memref<9x90x240xbf16, #tpu.memory_space<vmem>>, vector<1x90x240xbf16>
    %40 = vector.shape_cast %39 : vector<1x90x240xbf16> to vector<90x240xbf16>
    %cst_26 = arith.constant dense<0.000000e+00> : vector<30x240xf32>
    %41 = tpu.matmul %38, %40, %cst_26 {dimension_numbers = #tpu.dot_dimension_numbers<[1], [0], [0], [1], [0, 0, 1, 1], [], []>} : vector<30x90xbf16>, vector<90x240xbf16>, vector<30x240xf32> -> vector<30x240xf32>
    %42 = arith.addf %37, %41 : vector<30x240xf32>
    %43 = vector.extract_strided_slice %1 {offsets = [2, 6], sizes = [30, 90], strides = [1, 1]} : vector<32x96xbf16> to vector<30x90xbf16>
    %c8 = arith.constant 8 : index
    %c0_27 = arith.constant 0 : index
    %c0_28 = arith.constant 0 : index
    %44 = vector.load %arg2[%c8, %c0_27, %c0_28] : memref<9x90x240xbf16, #tpu.memory_space<vmem>>, vector<1x90x240xbf16>
    %45 = vector.shape_cast %44 : vector<1x90x240xbf16> to vector<90x240xbf16>
    %cst_29 = arith.constant dense<0.000000e+00> : vector<30x240xf32>
    %46 = tpu.matmul %43, %45, %cst_29 {dimension_numbers = #tpu.dot_dimension_numbers<[1], [0], [0], [1], [0, 0, 1, 1], [], []>} : vector<30x90xbf16>, vector<90x240xbf16>, vector<30x240xf32> -> vector<30x240xf32>
    %47 = arith.addf %42, %46 : vector<30x240xf32>
    %c0_30 = arith.constant 0 : index
    %c0_31 = arith.constant 0 : index
    %48 = vector.load %arg3[%c0_30, %c0_31] : memref<1x240xf32, #tpu.memory_space<vmem>>, vector<1x240xf32>
    %49 = vector.broadcast %48 : vector<1x240xf32> to vector<30x240xf32>
    %50 = arith.addf %47, %49 : vector<30x240xf32>
    %cst_32 = arith.constant 0.000000e+00 : f32
    %51 = vector.broadcast %cst_32 : f32 to vector<30x240xf32>
    %52 = arith.maximumf %50, %51 : vector<30x240xf32>
    %53 = arith.truncf %52 : vector<30x240xf32> to vector<30x240xbf16>
    %c0_33 = arith.constant 0 : index
    %c0_34 = arith.constant 0 : index
    %c0_35 = arith.constant 0 : index
    %54 = vector.load %arg4[%c0_33, %c0_34, %c0_35] : memref<2x15x30xbf16, #tpu.memory_space<vmem>>, vector<1x15x30xbf16>
    %55 = vector.shape_cast %54 : vector<1x15x30xbf16> to vector<15x30xbf16>
    %cst_36 = arith.constant dense<0.000000e+00> : vector<15x240xf32>
    %56 = tpu.matmul %55, %53, %cst_36 {dimension_numbers = #tpu.dot_dimension_numbers<[1], [0], [0], [1], [0, 0, 1, 1], [], []>} : vector<15x30xbf16>, vector<30x240xbf16>, vector<15x240xf32> -> vector<15x240xf32>
    %c1_37 = arith.constant 1 : index
    %c0_38 = arith.constant 0 : index
    %c0_39 = arith.constant 0 : index
    %57 = vector.load %arg4[%c1_37, %c0_38, %c0_39] : memref<2x15x30xbf16, #tpu.memory_space<vmem>>, vector<1x15x30xbf16>
    %58 = vector.shape_cast %57 : vector<1x15x30xbf16> to vector<15x30xbf16>
    %cst_40 = arith.constant dense<0.000000e+00> : vector<15x240xf32>
    %59 = tpu.matmul %58, %53, %cst_40 {dimension_numbers = #tpu.dot_dimension_numbers<[1], [0], [0], [1], [0, 0, 1, 1], [], []>} : vector<15x30xbf16>, vector<30x240xbf16>, vector<15x240xf32> -> vector<15x240xf32>
    %60 = arith.maximumf %56, %59 : vector<15x240xf32>
    %61 = arith.truncf %60 : vector<15x240xf32> to vector<15x240xbf16>
    %c0_41 = arith.constant 0 : index
    %c0_42 = arith.constant 0 : index
    %c0_43 = arith.constant 0 : index
    %62 = vector.load %arg5[%c0_41, %c0_42, %c0_43] : memref<2x240x120xbf16, #tpu.memory_space<vmem>>, vector<1x240x120xbf16>
    %63 = vector.shape_cast %62 : vector<1x240x120xbf16> to vector<240x120xbf16>
    %cst_44 = arith.constant dense<0.000000e+00> : vector<15x120xf32>
    %64 = tpu.matmul %61, %63, %cst_44 {dimension_numbers = #tpu.dot_dimension_numbers<[1], [0], [0], [1], [0, 0, 1, 1], [], []>} : vector<15x240xbf16>, vector<240x120xbf16>, vector<15x120xf32> -> vector<15x120xf32>
    %c1_45 = arith.constant 1 : index
    %c0_46 = arith.constant 0 : index
    %c0_47 = arith.constant 0 : index
    %65 = vector.load %arg5[%c1_45, %c0_46, %c0_47] : memref<2x240x120xbf16, #tpu.memory_space<vmem>>, vector<1x240x120xbf16>
    %66 = vector.shape_cast %65 : vector<1x240x120xbf16> to vector<240x120xbf16>
    %cst_48 = arith.constant dense<0.000000e+00> : vector<15x120xf32>
    %67 = tpu.matmul %61, %66, %cst_48 {dimension_numbers = #tpu.dot_dimension_numbers<[1], [0], [0], [1], [0, 0, 1, 1], [], []>} : vector<15x240xbf16>, vector<240x120xbf16>, vector<15x120xf32> -> vector<15x120xf32>
    %68 = arith.maximumf %64, %67 : vector<15x120xf32>
    %69 = arith.truncf %68 : vector<15x120xf32> to vector<15x120xbf16>
    %cst_49 = arith.constant 0.000000e+00 : f32
    %70 = vector.broadcast %cst_49 : f32 to vector<13x208xf32>
    %71 = vector.extract_strided_slice %69 {offsets = [0, 0], sizes = [13, 104], strides = [1, 1]} : vector<15x120xbf16> to vector<13x104xbf16>
    %c0_50 = arith.constant 0 : index
    %c0_51 = arith.constant 0 : index
    %c0_52 = arith.constant 0 : index
    %72 = vector.load %arg6[%c0_50, %c0_51, %c0_52] : memref<9x104x208xbf16, #tpu.memory_space<vmem>>, vector<1x104x208xbf16>
    %73 = vector.shape_cast %72 : vector<1x104x208xbf16> to vector<104x208xbf16>
    %cst_53 = arith.constant dense<0.000000e+00> : vector<13x208xf32>
    %74 = tpu.matmul %71, %73, %cst_53 {dimension_numbers = #tpu.dot_dimension_numbers<[1], [0], [0], [1], [0, 0, 1, 1], [], []>} : vector<13x104xbf16>, vector<104x208xbf16>, vector<13x208xf32> -> vector<13x208xf32>
    %75 = arith.addf %70, %74 : vector<13x208xf32>
    %76 = vector.extract_strided_slice %69 {offsets = [0, 8], sizes = [13, 104], strides = [1, 1]} : vector<15x120xbf16> to vector<13x104xbf16>
    %c1_54 = arith.constant 1 : index
    %c0_55 = arith.constant 0 : index
    %c0_56 = arith.constant 0 : index
    %77 = vector.load %arg6[%c1_54, %c0_55, %c0_56] : memref<9x104x208xbf16, #tpu.memory_space<vmem>>, vector<1x104x208xbf16>
    %78 = vector.shape_cast %77 : vector<1x104x208xbf16> to vector<104x208xbf16>
    %cst_57 = arith.constant dense<0.000000e+00> : vector<13x208xf32>
    %79 = tpu.matmul %76, %78, %cst_57 {dimension_numbers = #tpu.dot_dimension_numbers<[1], [0], [0], [1], [0, 0, 1, 1], [], []>} : vector<13x104xbf16>, vector<104x208xbf16>, vector<13x208xf32> -> vector<13x208xf32>
    %80 = arith.addf %75, %79 : vector<13x208xf32>
    %81 = vector.extract_strided_slice %69 {offsets = [0, 16], sizes = [13, 104], strides = [1, 1]} : vector<15x120xbf16> to vector<13x104xbf16>
    %c2_58 = arith.constant 2 : index
    %c0_59 = arith.constant 0 : index
    %c0_60 = arith.constant 0 : index
    %82 = vector.load %arg6[%c2_58, %c0_59, %c0_60] : memref<9x104x208xbf16, #tpu.memory_space<vmem>>, vector<1x104x208xbf16>
    %83 = vector.shape_cast %82 : vector<1x104x208xbf16> to vector<104x208xbf16>
    %cst_61 = arith.constant dense<0.000000e+00> : vector<13x208xf32>
    %84 = tpu.matmul %81, %83, %cst_61 {dimension_numbers = #tpu.dot_dimension_numbers<[1], [0], [0], [1], [0, 0, 1, 1], [], []>} : vector<13x104xbf16>, vector<104x208xbf16>, vector<13x208xf32> -> vector<13x208xf32>
    %85 = arith.addf %80, %84 : vector<13x208xf32>
    %86 = vector.extract_strided_slice %69 {offsets = [1, 0], sizes = [13, 104], strides = [1, 1]} : vector<15x120xbf16> to vector<13x104xbf16>
    %c3_62 = arith.constant 3 : index
    %c0_63 = arith.constant 0 : index
    %c0_64 = arith.constant 0 : index
    %87 = vector.load %arg6[%c3_62, %c0_63, %c0_64] : memref<9x104x208xbf16, #tpu.memory_space<vmem>>, vector<1x104x208xbf16>
    %88 = vector.shape_cast %87 : vector<1x104x208xbf16> to vector<104x208xbf16>
    %cst_65 = arith.constant dense<0.000000e+00> : vector<13x208xf32>
    %89 = tpu.matmul %86, %88, %cst_65 {dimension_numbers = #tpu.dot_dimension_numbers<[1], [0], [0], [1], [0, 0, 1, 1], [], []>} : vector<13x104xbf16>, vector<104x208xbf16>, vector<13x208xf32> -> vector<13x208xf32>
    %90 = arith.addf %85, %89 : vector<13x208xf32>
    %91 = vector.extract_strided_slice %69 {offsets = [1, 8], sizes = [13, 104], strides = [1, 1]} : vector<15x120xbf16> to vector<13x104xbf16>
    %c4_66 = arith.constant 4 : index
    %c0_67 = arith.constant 0 : index
    %c0_68 = arith.constant 0 : index
    %92 = vector.load %arg6[%c4_66, %c0_67, %c0_68] : memref<9x104x208xbf16, #tpu.memory_space<vmem>>, vector<1x104x208xbf16>
    %93 = vector.shape_cast %92 : vector<1x104x208xbf16> to vector<104x208xbf16>
    %cst_69 = arith.constant dense<0.000000e+00> : vector<13x208xf32>
    %94 = tpu.matmul %91, %93, %cst_69 {dimension_numbers = #tpu.dot_dimension_numbers<[1], [0], [0], [1], [0, 0, 1, 1], [], []>} : vector<13x104xbf16>, vector<104x208xbf16>, vector<13x208xf32> -> vector<13x208xf32>
    %95 = arith.addf %90, %94 : vector<13x208xf32>
    %96 = vector.extract_strided_slice %69 {offsets = [1, 16], sizes = [13, 104], strides = [1, 1]} : vector<15x120xbf16> to vector<13x104xbf16>
    %c5_70 = arith.constant 5 : index
    %c0_71 = arith.constant 0 : index
    %c0_72 = arith.constant 0 : index
    %97 = vector.load %arg6[%c5_70, %c0_71, %c0_72] : memref<9x104x208xbf16, #tpu.memory_space<vmem>>, vector<1x104x208xbf16>
    %98 = vector.shape_cast %97 : vector<1x104x208xbf16> to vector<104x208xbf16>
    %cst_73 = arith.constant dense<0.000000e+00> : vector<13x208xf32>
    %99 = tpu.matmul %96, %98, %cst_73 {dimension_numbers = #tpu.dot_dimension_numbers<[1], [0], [0], [1], [0, 0, 1, 1], [], []>} : vector<13x104xbf16>, vector<104x208xbf16>, vector<13x208xf32> -> vector<13x208xf32>
    %100 = arith.addf %95, %99 : vector<13x208xf32>
    %101 = vector.extract_strided_slice %69 {offsets = [2, 0], sizes = [13, 104], strides = [1, 1]} : vector<15x120xbf16> to vector<13x104xbf16>
    %c6_74 = arith.constant 6 : index
    %c0_75 = arith.constant 0 : index
    %c0_76 = arith.constant 0 : index
    %102 = vector.load %arg6[%c6_74, %c0_75, %c0_76] : memref<9x104x208xbf16, #tpu.memory_space<vmem>>, vector<1x104x208xbf16>
    %103 = vector.shape_cast %102 : vector<1x104x208xbf16> to vector<104x208xbf16>
    %cst_77 = arith.constant dense<0.000000e+00> : vector<13x208xf32>
    %104 = tpu.matmul %101, %103, %cst_77 {dimension_numbers = #tpu.dot_dimension_numbers<[1], [0], [0], [1], [0, 0, 1, 1], [], []>} : vector<13x104xbf16>, vector<104x208xbf16>, vector<13x208xf32> -> vector<13x208xf32>
    %105 = arith.addf %100, %104 : vector<13x208xf32>
    %106 = vector.extract_strided_slice %69 {offsets = [2, 8], sizes = [13, 104], strides = [1, 1]} : vector<15x120xbf16> to vector<13x104xbf16>
    %c7_78 = arith.constant 7 : index
    %c0_79 = arith.constant 0 : index
    %c0_80 = arith.constant 0 : index
    %107 = vector.load %arg6[%c7_78, %c0_79, %c0_80] : memref<9x104x208xbf16, #tpu.memory_space<vmem>>, vector<1x104x208xbf16>
    %108 = vector.shape_cast %107 : vector<1x104x208xbf16> to vector<104x208xbf16>
    %cst_81 = arith.constant dense<0.000000e+00> : vector<13x208xf32>
    %109 = tpu.matmul %106, %108, %cst_81 {dimension_numbers = #tpu.dot_dimension_numbers<[1], [0], [0], [1], [0, 0, 1, 1], [], []>} : vector<13x104xbf16>, vector<104x208xbf16>, vector<13x208xf32> -> vector<13x208xf32>
    %110 = arith.addf %105, %109 : vector<13x208xf32>
    %111 = vector.extract_strided_slice %69 {offsets = [2, 16], sizes = [13, 104], strides = [1, 1]} : vector<15x120xbf16> to vector<13x104xbf16>
    %c8_82 = arith.constant 8 : index
    %c0_83 = arith.constant 0 : index
    %c0_84 = arith.constant 0 : index
    %112 = vector.load %arg6[%c8_82, %c0_83, %c0_84] : memref<9x104x208xbf16, #tpu.memory_space<vmem>>, vector<1x104x208xbf16>
    %113 = vector.shape_cast %112 : vector<1x104x208xbf16> to vector<104x208xbf16>
    %cst_85 = arith.constant dense<0.000000e+00> : vector<13x208xf32>
    %114 = tpu.matmul %111, %113, %cst_85 {dimension_numbers = #tpu.dot_dimension_numbers<[1], [0], [0], [1], [0, 0, 1, 1], [], []>} : vector<13x104xbf16>, vector<104x208xbf16>, vector<13x208xf32> -> vector<13x208xf32>
    %115 = arith.addf %110, %114 : vector<13x208xf32>
    %c0_86 = arith.constant 0 : index
    %c0_87 = arith.constant 0 : index
    %116 = vector.load %arg7[%c0_86, %c0_87] : memref<1x208xf32, #tpu.memory_space<vmem>>, vector<1x208xf32>
    %117 = vector.broadcast %116 : vector<1x208xf32> to vector<13x208xf32>
    %118 = arith.addf %115, %117 : vector<13x208xf32>
    %cst_88 = arith.constant 0.000000e+00 : f32
    %119 = vector.broadcast %cst_88 : f32 to vector<13x208xf32>
    %120 = arith.maximumf %118, %119 : vector<13x208xf32>
    %121 = arith.truncf %120 : vector<13x208xf32> to vector<13x208xbf16>
    %c0_89 = arith.constant 0 : index
    %c0_90 = arith.constant 0 : index
    %c0_91 = arith.constant 0 : index
    %122 = vector.load %arg8[%c0_89, %c0_90, %c0_91] : memref<2x7x13xbf16, #tpu.memory_space<vmem>>, vector<1x7x13xbf16>
    %123 = vector.shape_cast %122 : vector<1x7x13xbf16> to vector<7x13xbf16>
    %cst_92 = arith.constant dense<0.000000e+00> : vector<7x208xf32>
    %124 = tpu.matmul %123, %121, %cst_92 {dimension_numbers = #tpu.dot_dimension_numbers<[1], [0], [0], [1], [0, 0, 1, 1], [], []>} : vector<7x13xbf16>, vector<13x208xbf16>, vector<7x208xf32> -> vector<7x208xf32>
    %c1_93 = arith.constant 1 : index
    %c0_94 = arith.constant 0 : index
    %c0_95 = arith.constant 0 : index
    %125 = vector.load %arg8[%c1_93, %c0_94, %c0_95] : memref<2x7x13xbf16, #tpu.memory_space<vmem>>, vector<1x7x13xbf16>
    %126 = vector.shape_cast %125 : vector<1x7x13xbf16> to vector<7x13xbf16>
    %cst_96 = arith.constant dense<0.000000e+00> : vector<7x208xf32>
    %127 = tpu.matmul %126, %121, %cst_96 {dimension_numbers = #tpu.dot_dimension_numbers<[1], [0], [0], [1], [0, 0, 1, 1], [], []>} : vector<7x13xbf16>, vector<13x208xbf16>, vector<7x208xf32> -> vector<7x208xf32>
    %128 = arith.maximumf %124, %127 : vector<7x208xf32>
    %129 = arith.truncf %128 : vector<7x208xf32> to vector<7x208xbf16>
    %c0_97 = arith.constant 0 : index
    %c0_98 = arith.constant 0 : index
    %c0_99 = arith.constant 0 : index
    %130 = vector.load %arg9[%c0_97, %c0_98, %c0_99] : memref<2x208x112xbf16, #tpu.memory_space<vmem>>, vector<1x208x112xbf16>
    %131 = vector.shape_cast %130 : vector<1x208x112xbf16> to vector<208x112xbf16>
    %cst_100 = arith.constant dense<0.000000e+00> : vector<7x112xf32>
    %132 = tpu.matmul %129, %131, %cst_100 {dimension_numbers = #tpu.dot_dimension_numbers<[1], [0], [0], [1], [0, 0, 1, 1], [], []>} : vector<7x208xbf16>, vector<208x112xbf16>, vector<7x112xf32> -> vector<7x112xf32>
    %c1_101 = arith.constant 1 : index
    %c0_102 = arith.constant 0 : index
    %c0_103 = arith.constant 0 : index
    %133 = vector.load %arg9[%c1_101, %c0_102, %c0_103] : memref<2x208x112xbf16, #tpu.memory_space<vmem>>, vector<1x208x112xbf16>
    %134 = vector.shape_cast %133 : vector<1x208x112xbf16> to vector<208x112xbf16>
    %cst_104 = arith.constant dense<0.000000e+00> : vector<7x112xf32>
    %135 = tpu.matmul %129, %134, %cst_104 {dimension_numbers = #tpu.dot_dimension_numbers<[1], [0], [0], [1], [0, 0, 1, 1], [], []>} : vector<7x208xbf16>, vector<208x112xbf16>, vector<7x112xf32> -> vector<7x112xf32>
    %136 = arith.maximumf %132, %135 : vector<7x112xf32>
    %137 = arith.truncf %136 : vector<7x112xf32> to vector<7x112xbf16>
    %cst_105 = arith.constant 0.000000e+00 : f32
    %138 = vector.broadcast %cst_105 : f32 to vector<5x160xf32>
    %139 = vector.extract_strided_slice %137 {offsets = [0, 0], sizes = [5, 80], strides = [1, 1]} : vector<7x112xbf16> to vector<5x80xbf16>
    %c0_106 = arith.constant 0 : index
    %c0_107 = arith.constant 0 : index
    %c0_108 = arith.constant 0 : index
    %140 = vector.load %arg10[%c0_106, %c0_107, %c0_108] : memref<9x80x160xbf16, #tpu.memory_space<vmem>>, vector<1x80x160xbf16>
    %141 = vector.shape_cast %140 : vector<1x80x160xbf16> to vector<80x160xbf16>
    %cst_109 = arith.constant dense<0.000000e+00> : vector<5x160xf32>
    %142 = tpu.matmul %139, %141, %cst_109 {dimension_numbers = #tpu.dot_dimension_numbers<[1], [0], [0], [1], [0, 0, 1, 1], [], []>} : vector<5x80xbf16>, vector<80x160xbf16>, vector<5x160xf32> -> vector<5x160xf32>
    %143 = arith.addf %138, %142 : vector<5x160xf32>
    %144 = vector.extract_strided_slice %137 {offsets = [0, 16], sizes = [5, 80], strides = [1, 1]} : vector<7x112xbf16> to vector<5x80xbf16>
    %c1_110 = arith.constant 1 : index
    %c0_111 = arith.constant 0 : index
    %c0_112 = arith.constant 0 : index
    %145 = vector.load %arg10[%c1_110, %c0_111, %c0_112] : memref<9x80x160xbf16, #tpu.memory_space<vmem>>, vector<1x80x160xbf16>
    %146 = vector.shape_cast %145 : vector<1x80x160xbf16> to vector<80x160xbf16>
    %cst_113 = arith.constant dense<0.000000e+00> : vector<5x160xf32>
    %147 = tpu.matmul %144, %146, %cst_113 {dimension_numbers = #tpu.dot_dimension_numbers<[1], [0], [0], [1], [0, 0, 1, 1], [], []>} : vector<5x80xbf16>, vector<80x160xbf16>, vector<5x160xf32> -> vector<5x160xf32>
    %148 = arith.addf %143, %147 : vector<5x160xf32>
    %149 = vector.extract_strided_slice %137 {offsets = [0, 32], sizes = [5, 80], strides = [1, 1]} : vector<7x112xbf16> to vector<5x80xbf16>
    %c2_114 = arith.constant 2 : index
    %c0_115 = arith.constant 0 : index
    %c0_116 = arith.constant 0 : index
    %150 = vector.load %arg10[%c2_114, %c0_115, %c0_116] : memref<9x80x160xbf16, #tpu.memory_space<vmem>>, vector<1x80x160xbf16>
    %151 = vector.shape_cast %150 : vector<1x80x160xbf16> to vector<80x160xbf16>
    %cst_117 = arith.constant dense<0.000000e+00> : vector<5x160xf32>
    %152 = tpu.matmul %149, %151, %cst_117 {dimension_numbers = #tpu.dot_dimension_numbers<[1], [0], [0], [1], [0, 0, 1, 1], [], []>} : vector<5x80xbf16>, vector<80x160xbf16>, vector<5x160xf32> -> vector<5x160xf32>
    %153 = arith.addf %148, %152 : vector<5x160xf32>
    %154 = vector.extract_strided_slice %137 {offsets = [1, 0], sizes = [5, 80], strides = [1, 1]} : vector<7x112xbf16> to vector<5x80xbf16>
    %c3_118 = arith.constant 3 : index
    %c0_119 = arith.constant 0 : index
    %c0_120 = arith.constant 0 : index
    %155 = vector.load %arg10[%c3_118, %c0_119, %c0_120] : memref<9x80x160xbf16, #tpu.memory_space<vmem>>, vector<1x80x160xbf16>
    %156 = vector.shape_cast %155 : vector<1x80x160xbf16> to vector<80x160xbf16>
    %cst_121 = arith.constant dense<0.000000e+00> : vector<5x160xf32>
    %157 = tpu.matmul %154, %156, %cst_121 {dimension_numbers = #tpu.dot_dimension_numbers<[1], [0], [0], [1], [0, 0, 1, 1], [], []>} : vector<5x80xbf16>, vector<80x160xbf16>, vector<5x160xf32> -> vector<5x160xf32>
    %158 = arith.addf %153, %157 : vector<5x160xf32>
    %159 = vector.extract_strided_slice %137 {offsets = [1, 16], sizes = [5, 80], strides = [1, 1]} : vector<7x112xbf16> to vector<5x80xbf16>
    %c4_122 = arith.constant 4 : index
    %c0_123 = arith.constant 0 : index
    %c0_124 = arith.constant 0 : index
    %160 = vector.load %arg10[%c4_122, %c0_123, %c0_124] : memref<9x80x160xbf16, #tpu.memory_space<vmem>>, vector<1x80x160xbf16>
    %161 = vector.shape_cast %160 : vector<1x80x160xbf16> to vector<80x160xbf16>
    %cst_125 = arith.constant dense<0.000000e+00> : vector<5x160xf32>
    %162 = tpu.matmul %159, %161, %cst_125 {dimension_numbers = #tpu.dot_dimension_numbers<[1], [0], [0], [1], [0, 0, 1, 1], [], []>} : vector<5x80xbf16>, vector<80x160xbf16>, vector<5x160xf32> -> vector<5x160xf32>
    %163 = arith.addf %158, %162 : vector<5x160xf32>
    %164 = vector.extract_strided_slice %137 {offsets = [1, 32], sizes = [5, 80], strides = [1, 1]} : vector<7x112xbf16> to vector<5x80xbf16>
    %c5_126 = arith.constant 5 : index
    %c0_127 = arith.constant 0 : index
    %c0_128 = arith.constant 0 : index
    %165 = vector.load %arg10[%c5_126, %c0_127, %c0_128] : memref<9x80x160xbf16, #tpu.memory_space<vmem>>, vector<1x80x160xbf16>
    %166 = vector.shape_cast %165 : vector<1x80x160xbf16> to vector<80x160xbf16>
    %cst_129 = arith.constant dense<0.000000e+00> : vector<5x160xf32>
    %167 = tpu.matmul %164, %166, %cst_129 {dimension_numbers = #tpu.dot_dimension_numbers<[1], [0], [0], [1], [0, 0, 1, 1], [], []>} : vector<5x80xbf16>, vector<80x160xbf16>, vector<5x160xf32> -> vector<5x160xf32>
    %168 = arith.addf %163, %167 : vector<5x160xf32>
    %169 = vector.extract_strided_slice %137 {offsets = [2, 0], sizes = [5, 80], strides = [1, 1]} : vector<7x112xbf16> to vector<5x80xbf16>
    %c6_130 = arith.constant 6 : index
    %c0_131 = arith.constant 0 : index
    %c0_132 = arith.constant 0 : index
    %170 = vector.load %arg10[%c6_130, %c0_131, %c0_132] : memref<9x80x160xbf16, #tpu.memory_space<vmem>>, vector<1x80x160xbf16>
    %171 = vector.shape_cast %170 : vector<1x80x160xbf16> to vector<80x160xbf16>
    %cst_133 = arith.constant dense<0.000000e+00> : vector<5x160xf32>
    %172 = tpu.matmul %169, %171, %cst_133 {dimension_numbers = #tpu.dot_dimension_numbers<[1], [0], [0], [1], [0, 0, 1, 1], [], []>} : vector<5x80xbf16>, vector<80x160xbf16>, vector<5x160xf32> -> vector<5x160xf32>
    %173 = arith.addf %168, %172 : vector<5x160xf32>
    %174 = vector.extract_strided_slice %137 {offsets = [2, 16], sizes = [5, 80], strides = [1, 1]} : vector<7x112xbf16> to vector<5x80xbf16>
    %c7_134 = arith.constant 7 : index
    %c0_135 = arith.constant 0 : index
    %c0_136 = arith.constant 0 : index
    %175 = vector.load %arg10[%c7_134, %c0_135, %c0_136] : memref<9x80x160xbf16, #tpu.memory_space<vmem>>, vector<1x80x160xbf16>
    %176 = vector.shape_cast %175 : vector<1x80x160xbf16> to vector<80x160xbf16>
    %cst_137 = arith.constant dense<0.000000e+00> : vector<5x160xf32>
    %177 = tpu.matmul %174, %176, %cst_137 {dimension_numbers = #tpu.dot_dimension_numbers<[1], [0], [0], [1], [0, 0, 1, 1], [], []>} : vector<5x80xbf16>, vector<80x160xbf16>, vector<5x160xf32> -> vector<5x160xf32>
    %178 = arith.addf %173, %177 : vector<5x160xf32>
    %179 = vector.extract_strided_slice %137 {offsets = [2, 32], sizes = [5, 80], strides = [1, 1]} : vector<7x112xbf16> to vector<5x80xbf16>
    %c8_138 = arith.constant 8 : index
    %c0_139 = arith.constant 0 : index
    %c0_140 = arith.constant 0 : index
    %180 = vector.load %arg10[%c8_138, %c0_139, %c0_140] : memref<9x80x160xbf16, #tpu.memory_space<vmem>>, vector<1x80x160xbf16>
    %181 = vector.shape_cast %180 : vector<1x80x160xbf16> to vector<80x160xbf16>
    %cst_141 = arith.constant dense<0.000000e+00> : vector<5x160xf32>
    %182 = tpu.matmul %179, %181, %cst_141 {dimension_numbers = #tpu.dot_dimension_numbers<[1], [0], [0], [1], [0, 0, 1, 1], [], []>} : vector<5x80xbf16>, vector<80x160xbf16>, vector<5x160xf32> -> vector<5x160xf32>
    %183 = arith.addf %178, %182 : vector<5x160xf32>
    %c0_142 = arith.constant 0 : index
    %c0_143 = arith.constant 0 : index
    %184 = vector.load %arg11[%c0_142, %c0_143] : memref<1x160xf32, #tpu.memory_space<vmem>>, vector<1x160xf32>
    %185 = vector.broadcast %184 : vector<1x160xf32> to vector<5x160xf32>
    %186 = arith.addf %183, %185 : vector<5x160xf32>
    %cst_144 = arith.constant 0.000000e+00 : f32
    %187 = vector.broadcast %cst_144 : f32 to vector<5x160xf32>
    %188 = arith.maximumf %186, %187 : vector<5x160xf32>
    %189 = arith.truncf %188 : vector<5x160xf32> to vector<5x160xbf16>
    %c0_145 = arith.constant 0 : index
    %c0_146 = arith.constant 0 : index
    %c0_147 = arith.constant 0 : index
    %190 = vector.load %arg12[%c0_145, %c0_146, %c0_147] : memref<2x3x5xbf16, #tpu.memory_space<vmem>>, vector<1x3x5xbf16>
    %191 = vector.shape_cast %190 : vector<1x3x5xbf16> to vector<3x5xbf16>
    %cst_148 = arith.constant dense<0.000000e+00> : vector<3x160xf32>
    %192 = tpu.matmul %191, %189, %cst_148 {dimension_numbers = #tpu.dot_dimension_numbers<[1], [0], [0], [1], [0, 0, 1, 1], [], []>} : vector<3x5xbf16>, vector<5x160xbf16>, vector<3x160xf32> -> vector<3x160xf32>
    %c1_149 = arith.constant 1 : index
    %c0_150 = arith.constant 0 : index
    %c0_151 = arith.constant 0 : index
    %193 = vector.load %arg12[%c1_149, %c0_150, %c0_151] : memref<2x3x5xbf16, #tpu.memory_space<vmem>>, vector<1x3x5xbf16>
    %194 = vector.shape_cast %193 : vector<1x3x5xbf16> to vector<3x5xbf16>
    %cst_152 = arith.constant dense<0.000000e+00> : vector<3x160xf32>
    %195 = tpu.matmul %194, %189, %cst_152 {dimension_numbers = #tpu.dot_dimension_numbers<[1], [0], [0], [1], [0, 0, 1, 1], [], []>} : vector<3x5xbf16>, vector<5x160xbf16>, vector<3x160xf32> -> vector<3x160xf32>
    %196 = arith.maximumf %192, %195 : vector<3x160xf32>
    %197 = arith.truncf %196 : vector<3x160xf32> to vector<3x160xbf16>
    %c0_153 = arith.constant 0 : index
    %c0_154 = arith.constant 0 : index
    %c0_155 = arith.constant 0 : index
    %198 = vector.load %arg13[%c0_153, %c0_154, %c0_155] : memref<2x160x96xbf16, #tpu.memory_space<vmem>>, vector<1x160x96xbf16>
    %199 = vector.shape_cast %198 : vector<1x160x96xbf16> to vector<160x96xbf16>
    %cst_156 = arith.constant dense<0.000000e+00> : vector<3x96xf32>
    %200 = tpu.matmul %197, %199, %cst_156 {dimension_numbers = #tpu.dot_dimension_numbers<[1], [0], [0], [1], [0, 0, 1, 1], [], []>} : vector<3x160xbf16>, vector<160x96xbf16>, vector<3x96xf32> -> vector<3x96xf32>
    %c1_157 = arith.constant 1 : index
    %c0_158 = arith.constant 0 : index
    %c0_159 = arith.constant 0 : index
    %201 = vector.load %arg13[%c1_157, %c0_158, %c0_159] : memref<2x160x96xbf16, #tpu.memory_space<vmem>>, vector<1x160x96xbf16>
    %202 = vector.shape_cast %201 : vector<1x160x96xbf16> to vector<160x96xbf16>
    %cst_160 = arith.constant dense<0.000000e+00> : vector<3x96xf32>
    %203 = tpu.matmul %197, %202, %cst_160 {dimension_numbers = #tpu.dot_dimension_numbers<[1], [0], [0], [1], [0, 0, 1, 1], [], []>} : vector<3x160xbf16>, vector<160x96xbf16>, vector<3x96xf32> -> vector<3x96xf32>
    %204 = arith.maximumf %200, %203 : vector<3x96xf32>
    %205 = arith.truncf %204 : vector<3x96xf32> to vector<3x96xbf16>
    %c0_161 = arith.constant 0 : index
    %c0_162 = arith.constant 0 : index
    %c0_163 = arith.constant 0 : index
    %206 = vector.load %arg14[%c0_161, %c0_162, %c0_163] : memref<1x3x96xbf16, #tpu.memory_space<vmem>>, vector<1x3x96xbf16>
    %207 = vector.shape_cast %206 : vector<1x3x96xbf16> to vector<3x96xbf16>
    %208 = vector.shape_cast %205 : vector<3x96xbf16> to vector<1x3x96xbf16>
    tpu.vector_store %arg14[%c0_161, %c0_162, %c0_163], %208 {strides = array<i32>} : memref<1x3x96xbf16, #tpu.memory_space<vmem>>, vector<1x3x96xbf16>,
    return
  }
  func.func @transform_0(%arg0: i32) -> (i32, i32, i32) {
    %c0_i32 = arith.constant 0 : i32
    %c0_i32_0 = arith.constant 0 : i32
    %c0_i32_1 = arith.constant 0 : i32
    return %arg0, %c0_i32, %c0_i32_0 : i32, i32, i32
  }
  func.func @transform_1(%arg0: i32) -> (i32, i32, i32) {
    %c0_i32 = arith.constant 0 : i32
    %c0_i32_0 = arith.constant 0 : i32
    %c0_i32_1 = arith.constant 0 : i32
    %c0_i32_2 = arith.constant 0 : i32
    return %c0_i32, %c0_i32_0, %c0_i32_1 : i32, i32, i32
  }
  func.func @transform_2(%arg0: i32) -> (i32, i32) {
    %c0_i32 = arith.constant 0 : i32
    %c0_i32_0 = arith.constant 0 : i32
    %c0_i32_1 = arith.constant 0 : i32
    return %c0_i32, %c0_i32_0 : i32, i32
  }
  func.func @transform_3(%arg0: i32) -> (i32, i32, i32) {
    %c0_i32 = arith.constant 0 : i32
    %c0_i32_0 = arith.constant 0 : i32
    %c0_i32_1 = arith.constant 0 : i32
    %c0_i32_2 = arith.constant 0 : i32
    return %c0_i32, %c0_i32_0, %c0_i32_1 : i32, i32, i32
  }
  func.func @transform_4(%arg0: i32) -> (i32, i32, i32) {
    %c0_i32 = arith.constant 0 : i32
    %c0_i32_0 = arith.constant 0 : i32
    %c0_i32_1 = arith.constant 0 : i32
    %c0_i32_2 = arith.constant 0 : i32
    return %c0_i32, %c0_i32_0, %c0_i32_1 : i32, i32, i32
  }
  func.func @transform_5(%arg0: i32) -> (i32, i32, i32) {
    %c0_i32 = arith.constant 0 : i32
    %c0_i32_0 = arith.constant 0 : i32
    %c0_i32_1 = arith.constant 0 : i32
    %c0_i32_2 = arith.constant 0 : i32
    return %c0_i32, %c0_i32_0, %c0_i32_1 : i32, i32, i32
  }
  func.func @transform_6(%arg0: i32) -> (i32, i32) {
    %c0_i32 = arith.constant 0 : i32
    %c0_i32_0 = arith.constant 0 : i32
    %c0_i32_1 = arith.constant 0 : i32
    return %c0_i32, %c0_i32_0 : i32, i32
  }
  func.func @transform_7(%arg0: i32) -> (i32, i32, i32) {
    %c0_i32 = arith.constant 0 : i32
    %c0_i32_0 = arith.constant 0 : i32
    %c0_i32_1 = arith.constant 0 : i32
    %c0_i32_2 = arith.constant 0 : i32
    return %c0_i32, %c0_i32_0, %c0_i32_1 : i32, i32, i32
  }
  func.func @transform_8(%arg0: i32) -> (i32, i32, i32) {
    %c0_i32 = arith.constant 0 : i32
    %c0_i32_0 = arith.constant 0 : i32
    %c0_i32_1 = arith.constant 0 : i32
    %c0_i32_2 = arith.constant 0 : i32
    return %c0_i32, %c0_i32_0, %c0_i32_1 : i32, i32, i32
  }
  func.func @transform_9(%arg0: i32) -> (i32, i32, i32) {
    %c0_i32 = arith.constant 0 : i32
    %c0_i32_0 = arith.constant 0 : i32
    %c0_i32_1 = arith.constant 0 : i32
    %c0_i32_2 = arith.constant 0 : i32
    return %c0_i32, %c0_i32_0, %c0_i32_1 : i32, i32, i32
  }
  func.func @transform_10(%arg0: i32) -> (i32, i32) {
    %c0_i32 = arith.constant 0 : i32
    %c0_i32_0 = arith.constant 0 : i32
    %c0_i32_1 = arith.constant 0 : i32
    return %c0_i32, %c0_i32_0 : i32, i32
  }
  func.func @transform_11(%arg0: i32) -> (i32, i32, i32) {
    %c0_i32 = arith.constant 0 : i32
    %c0_i32_0 = arith.constant 0 : i32
    %c0_i32_1 = arith.constant 0 : i32
    %c0_i32_2 = arith.constant 0 : i32
    return %c0_i32, %c0_i32_0, %c0_i32_1 : i32, i32, i32
  }
  func.func @transform_12(%arg0: i32) -> (i32, i32, i32) {
    %c0_i32 = arith.constant 0 : i32
    %c0_i32_0 = arith.constant 0 : i32
    %c0_i32_1 = arith.constant 0 : i32
    %c0_i32_2 = arith.constant 0 : i32
    return %c0_i32, %c0_i32_0, %c0_i32_1 : i32, i32, i32
  }
  func.func @transform_13(%arg0: i32) -> (i32, i32, i32) {
    %c0_i32 = arith.constant 0 : i32
    %c0_i32_0 = arith.constant 0 : i32
    %c0_i32_1 = arith.constant 0 : i32
    return %arg0, %c0_i32, %c0_i32_0 : i32, i32, i32
  }
}

</mosaic_0001>

<bundles_post_ra>
// kernel: cnn_forward.3
= control target key start
LH: loop header
LB: loop body
LE: loop exit
PB: predicated region body
PF: predicated region fallthrough
CT: control target
= control target key end

     0   :  { %vm946_vm0 = vcmask 261120   ;;  %s3134_s1 = inlined_call_operand.vmem [shape: bf16[288,1024], index: 1, kind: input, shape index: {}]   ;;  %s3135_s0 = inlined_call_operand.vmem [shape: bf16[16,288], index: 0, kind: input, shape index: {}]   ;;  %s3136_s3 = inlined_call_operand.vmem [shape: bf16[1024,128], index: 3, kind: input, shape index: {}]   ;;  %s3137_s2 = inlined_call_operand.vmem [shape: f32[1,1024], index: 2, kind: input, shape index: {}]   ;;  %s3138_s4 = inlined_call_operand.vmem [shape: f32[1,128], index: 4, kind: input, shape index: {}]   ;;  %s3139_s5 = inlined_call_operand.vmem [shape: f32[16,128], index: 5, kind: output, shape index: {}]  }
   0x1   :  { %v25_v0 = vld [vmem:[%s3134_s1] sm:$0xff]  ;;  %v26_v2 = vld [vmem:[%s3134_s1 + $0x8] sm:$0xff] }
   0x2   :  { %v29_v1 = vld [vmem:[%s3134_s1 + $0x20] sm:$0xff]  ;;  %v30_v4 = vld [vmem:[%s3134_s1 + $0x28] sm:$0xff] }
   0x3   :  { %v2011_v3 = vcombine.high %v25_v0, %v29_v1  ;;  %v2010_v5 = vcombine.low %v25_v0, %v29_v1  ;;  %v33_v6 = vld [vmem:[%s3134_s1 + $0x40] sm:$0xff]  ;;  %v2013_v8 = vcombine.high %v26_v2, %v30_v4  ;;  %v2012_v9 = vcombine.low %v26_v2, %v30_v4  ;;  %v34_v11 = vld [vmem:[%s3134_s1 + $0x48] sm:$0xff] }
   0x4   :  { %v37_v7 = vld [vmem:[%s3134_s1 + $0x60] sm:$0xff]  ;;  %v38_v12 = vld [vmem:[%s3134_s1 + $0x68] sm:$0xff] }
   0x5   :  { %v2019_v10 = vcombine.high %v33_v6, %v37_v7  ;;  %v41_v13 = vld [vmem:[%s3134_s1 + $0x80] sm:$0xff]  ;;  %950 = vmatprep.subr.bf16.mxu0 %v2011_v3  ;;  %v2021_v14 = vcombine.high %v34_v11, %v38_v12  ;;  %v42_v16 = vld [vmem:[%s3134_s1 + $0x88] sm:$0xff]  ;;  %1036 = vmatprep.subr.bf16.mxu1 %v2013_v8  ;;  %v2018_v18 = vcombine.low %v33_v6, %v37_v7 }
   0x6   :  { %v45_v15 = vld [vmem:[%s3134_s1 + $0xa0] sm:$0xff]  ;;  %v46_v17 = vld [vmem:[%s3134_s1 + $0xa8] sm:$0xff]  ;;  %951 = vmatpush1.bf16.msra.mxu0 %v2010_v5  ;;  %1037 = vmatpush1.bf16.msra.mxu1 %v2012_v9  ;;  %v2020_v19 = vcombine.low %v34_v11, %v38_v12 }
   0x7   :  { %952 = vmatprep.subr.bf16.mxu0 %v2019_v10  ;;  %v2027_v20 = vcombine.high %v41_v13, %v45_v15  ;;  %1038 = vmatprep.subr.bf16.mxu1 %v2021_v14  ;;  %v2029_v21 = vcombine.high %v42_v16, %v46_v17  ;;  %v49_v22 = vld [vmem:[%s3134_s1 + $0xc0] sm:$0xff]  ;;  %v50_v24 = vld [vmem:[%s3134_s1 + $0xc8] sm:$0xff]  ;;  %v2026_v26 = vcombine.low %v41_v13, %v45_v15 }
   0x8   :  { %v53_v23 = vld [vmem:[%s3134_s1 + $0xe0] sm:$0xff]  ;;  %v54_v25 = vld [vmem:[%s3134_s1 + $0xe8] sm:$0xff]  ;;  %v2028_v27 = vcombine.low %v42_v16, %v46_v17 }
   0x9   :  { %v2035_v28 = vcombine.high %v49_v22, %v53_v23  ;;  %v2037_v29 = vcombine.high %v50_v24, %v54_v25  ;;  %v57_v30 = vld [vmem:[%s3134_s1 + $0x100] sm:$0xff]  ;;  %v58_v32 = vld [vmem:[%s3134_s1 + $0x108] sm:$0xff]  ;;  %v2034_v34 = vcombine.low %v49_v22, %v53_v23  ;;  %v2036_v35 = vcombine.low %v50_v24, %v54_v25 }
   0xa   :  { %953 = vmatpush1.bf16.msra.mxu0 %v2018_v18  ;;  %1039 = vmatpush1.bf16.msra.mxu1 %v2020_v19  ;;  %v61_v31 = vld [vmem:[%s3134_s1 + $0x120] sm:$0xff]  ;;  %v62_v33 = vld [vmem:[%s3134_s1 + $0x128] sm:$0xff] }
   0xb   :  { %954 = vmatprep.subr.bf16.mxu0 %v2027_v20  ;;  %1040 = vmatprep.subr.bf16.mxu1 %v2029_v21  ;;  %v2043_v36 = vcombine.high %v57_v30, %v61_v31  ;;  %v2045_v37 = vcombine.high %v58_v32, %v62_v33  ;;  %v65_v38 = vld [vmem:[%s3134_s1 + $0x140] sm:$0xff]  ;;  %v66_v40 = vld [vmem:[%s3134_s1 + $0x148] sm:$0xff]  ;;  %v2042_v42 = vcombine.low %v57_v30, %v61_v31 }
   0xc   :  { %v69_v39 = vld [vmem:[%s3134_s1 + $0x160] sm:$0xff]  ;;  %v70_v41 = vld [vmem:[%s3134_s1 + $0x168] sm:$0xff]  ;;  %v2044_v43 = vcombine.low %v58_v32, %v62_v33 }
   0xd   :  { %v2051_v44 = vcombine.high %v65_v38, %v69_v39  ;;  %v2053_v45 = vcombine.high %v66_v40, %v70_v41  ;;  %v73_v46 = vld [vmem:[%s3134_s1 + $0x180] sm:$0xff]  ;;  %v74_v48 = vld [vmem:[%s3134_s1 + $0x188] sm:$0xff]  ;;  %v2050_v50 = vcombine.low %v65_v38, %v69_v39  ;;  %v2052_v51 = vcombine.low %v66_v40, %v70_v41 }
   0xe   :  { %955 = vmatpush1.bf16.msra.mxu0 %v2026_v26  ;;  %1041 = vmatpush1.bf16.msra.mxu1 %v2028_v27  ;;  %v77_v47 = vld [vmem:[%s3134_s1 + $0x1a0] sm:$0xff]  ;;  %v78_v49 = vld [vmem:[%s3134_s1 + $0x1a8] sm:$0xff] }
   0xf   :  { %956 = vmatprep.subr.bf16.mxu0 %v2035_v28  ;;  %1042 = vmatprep.subr.bf16.mxu1 %v2037_v29  ;;  %v2059_v52 = vcombine.high %v73_v46, %v77_v47  ;;  %v2061_v53 = vcombine.high %v74_v48, %v78_v49  ;;  %v81_v54 = vld [vmem:[%s3134_s1 + $0x1c0] sm:$0xff]  ;;  %v82_v57 = vld [vmem:[%s3134_s1 + $0x1c8] sm:$0xff]  ;;  %v2058_v59 = vcombine.low %v73_v46, %v77_v47 }
  0x10   :  { %v85_v55 = vld [vmem:[%s3134_s1 + $0x1e0] sm:$0xff]  ;;  %v86_v58 = vld [vmem:[%s3134_s1 + $0x1e8] sm:$0xff]  ;;  %v2060_v60 = vcombine.low %v74_v48, %v78_v49 }
  0x11   :  { %v2536_v56 = vld [vmem:[%s3135_s0 + $0x4] ss:$12 sps:$4 sm:$0xff]   ;;  %v2067_v61 = vcombine.high %v81_v54, %v85_v55  ;;  %v2069_v62 = vcombine.high %v82_v57, %v86_v58  ;;  %v90_v1 = vld [vmem:[%s3134_s1 + $0x208] sm:$0xff]  ;;  %v2066_v3 = vcombine.low %v81_v54, %v85_v55  ;;  %v2068_v4 = vcombine.low %v82_v57, %v86_v58 }
  0x12   :  { %957 = vmatpush1.bf16.msra.mxu0 %v2034_v34  ;;  %1043 = vmatpush1.bf16.msra.mxu1 %v2036_v35  ;;  %v89_v63 = vld [vmem:[%s3134_s1 + $0x200] sm:$0xff]  ;;  %v94_v2 = vld [vmem:[%s3134_s1 + $0x228] sm:$0xff] }
  0x13   :  { %958 = vmatprep.subr.bf16.mxu0 %v2043_v36  ;;  %1044 = vmatprep.subr.bf16.mxu1 %v2045_v37  ;;  %v93_v0 = vld [vmem:[%s3134_s1 + $0x220] sm:$0xff]  ;;  %v2077_v6 = vcombine.high %v90_v1, %v94_v2  ;;  %v98_v9 = vld [vmem:[%s3134_s1 + $0x248] sm:$0xff]  ;;  %v2076_v12 = vcombine.low %v90_v1, %v94_v2 }
  0x14   :  { %982 = vmatprep.mubr.bf16.mxu0 %v2536_v56  ;;  %1068 = vmatprep.mubr.bf16.mxu1 %v2536_v56  ;;  %v2075_v5 = vcombine.high %v89_v63, %v93_v0  ;;  %v97_v7 = vld [vmem:[%s3134_s1 + $0x240] sm:$0xff]  ;;  %v102_v10 = vld [vmem:[%s3134_s1 + $0x268] sm:$0xff]  ;;  %v2074_v11 = vcombine.low %v89_v63, %v93_v0 }
  0x15   :  { %v101_v8 = vld [vmem:[%s3134_s1 + $0x260] sm:$0xff]  ;;  %v2085_v14 = vcombine.high %v98_v9, %v102_v10  ;;  %v106_v17 = vld [vmem:[%s3134_s1 + $0x288] sm:$0xff]  ;;  %v2084_v20 = vcombine.low %v98_v9, %v102_v10 }
  0x16   :  { %959 = vmatpush1.bf16.msra.mxu0 %v2042_v42  ;;  %1045 = vmatpush1.bf16.msra.mxu1 %v2044_v43  ;;  %v2083_v13 = vcombine.high %v97_v7, %v101_v8  ;;  %v105_v15 = vld [vmem:[%s3134_s1 + $0x280] sm:$0xff]  ;;  %v110_v18 = vld [vmem:[%s3134_s1 + $0x2a8] sm:$0xff]  ;;  %v2082_v19 = vcombine.low %v97_v7, %v101_v8 }
  0x17   :  { %960 = vmatprep.subr.bf16.mxu0 %v2051_v44  ;;  %1046 = vmatprep.subr.bf16.mxu1 %v2053_v45  ;;  %v109_v16 = vld [vmem:[%s3134_s1 + $0x2a0] sm:$0xff]  ;;  %v2093_v22 = vcombine.high %v106_v17, %v110_v18  ;;  %v114_v25 = vld [vmem:[%s3134_s1 + $0x2c8] sm:$0xff]  ;;  %v2092_v28 = vcombine.low %v106_v17, %v110_v18  ;;  %v31_v17 = vld [vmem:[%s3134_s1 + $0x30] sm:$0xff] }
  0x18   :  { %v2091_v21 = vcombine.high %v105_v15, %v109_v16  ;;  %v113_v23 = vld [vmem:[%s3134_s1 + $0x2c0] sm:$0xff]  ;;  %v118_v26 = vld [vmem:[%s3134_s1 + $0x2e8] sm:$0xff]  ;;  %v2090_v27 = vcombine.low %v105_v15, %v109_v16 }
  0x19   :  { %v117_v24 = vld [vmem:[%s3134_s1 + $0x2e0] sm:$0xff]  ;;  %v2101_v30 = vcombine.high %v114_v25, %v118_v26  ;;  %v122_v33 = vld [vmem:[%s3134_s1 + $0x308] sm:$0xff]  ;;  %v2100_v36 = vcombine.low %v114_v25, %v118_v26  ;;  %v35_v26 = vld [vmem:[%s3134_s1 + $0x50] sm:$0xff] }
  0x1a   :  { %961 = vmatpush1.bf16.msra.mxu0 %v2050_v50  ;;  %1047 = vmatpush1.bf16.msra.mxu1 %v2052_v51  ;;  %v2099_v29 = vcombine.high %v113_v23, %v117_v24  ;;  %v121_v31 = vld [vmem:[%s3134_s1 + $0x300] sm:$0xff]  ;;  %v126_v34 = vld [vmem:[%s3134_s1 + $0x328] sm:$0xff]  ;;  %v2098_v35 = vcombine.low %v113_v23, %v117_v24  ;;  %v2412_v24 = vmov 0  }
  0x1b   :  { %962 = vmatprep.subr.bf16.mxu0 %v2059_v52  ;;  %1048 = vmatprep.subr.bf16.mxu1 %v2061_v53  ;;  %v125_v32 = vld [vmem:[%s3134_s1 + $0x320] sm:$0xff]  ;;  %v2109_v38 = vcombine.high %v122_v33, %v126_v34  ;;  %v130_v41 = vld [vmem:[%s3134_s1 + $0x348] sm:$0xff]  ;;  %v2108_v44 = vcombine.low %v122_v33, %v126_v34  ;;  %v47_v33 = vld [vmem:[%s3134_s1 + $0xb0] sm:$0xff] }
  0x1c   :  { %v2107_v37 = vcombine.high %v121_v31, %v125_v32  ;;  %v129_v39 = vld [vmem:[%s3134_s1 + $0x340] sm:$0xff]  ;;  %v134_v42 = vld [vmem:[%s3134_s1 + $0x368] sm:$0xff]  ;;  %v2106_v43 = vcombine.low %v121_v31, %v125_v32  ;;  %v43_v32 = vld [vmem:[%s3134_s1 + $0x90] sm:$0xff] }
  0x1d   :  { %v133_v40 = vld [vmem:[%s3134_s1 + $0x360] sm:$0xff]  ;;  %v2117_v48 = vcombine.high %v130_v41, %v134_v42  ;;  %v138_v49 = vld [vmem:[%s3134_s1 + $0x388] sm:$0xff]  ;;  %v2116_v53 = vcombine.low %v130_v41, %v134_v42  ;;  %v55_v41 = vld [vmem:[%s3134_s1 + $0xf0] sm:$0xff] }
  0x1e   :  { %963 = vmatpush1.bf16.msra.mxu0 %v2058_v59  ;;  %1049 = vmatpush1.bf16.msra.mxu1 %v2060_v60  ;;  %v2115_v45 = vcombine.high %v129_v39, %v133_v40  ;;  %v137_v46 = vld [vmem:[%s3134_s1 + $0x380] sm:$0xff]  ;;  %v142_v50 = vld [vmem:[%s3134_s1 + $0x3a8] sm:$0xff]  ;;  %v2114_v51 = vcombine.low %v129_v39, %v133_v40  ;;  %v51_v40 = vld [vmem:[%s3134_s1 + $0xd0] sm:$0xff] }
  0x1f   :  { %964 = vmatprep.subr.bf16.mxu0 %v2067_v61  ;;  %1050 = vmatprep.subr.bf16.mxu1 %v2069_v62  ;;  %v141_v47 = vld [vmem:[%s3134_s1 + $0x3a0] sm:$0xff]  ;;  %v2125_v57 = vcombine.high %v138_v49, %v142_v50  ;;  %v146_v58 = vld [vmem:[%s3134_s1 + $0x3c8] sm:$0xff]  ;;  %v2124_v62 = vcombine.low %v138_v49, %v142_v50  ;;  %v63_v49 = vld [vmem:[%s3134_s1 + $0x130] sm:$0xff] }
  0x20   :  { %v145_v52 = vld [vmem:[%s3134_s1 + $0x3c0] sm:$0xff]  ;;  %v2123_v54 = vcombine.high %v137_v46, %v141_v47  ;;  %v150_v59 = vld [vmem:[%s3134_s1 + $0x3e8] sm:$0xff]  ;;  %v2122_v60 = vcombine.low %v137_v46, %v141_v47  ;;  %v2030_v47 = vcombine.low %v43_v32, %v47_v33 }
  0x21   :  { %v149_v55 = vld [vmem:[%s3134_s1 + $0x3e0] sm:$0xff]  ;;  %v2133_v1 = vcombine.high %v146_v58, %v150_v59  ;;  %v154_v2 = vld [vmem:[%s3134_s1 + $0x408] sm:$0xff] }
  0x22   :  { %965 = vmatpush1.bf16.msra.mxu0 %v2066_v3  ;;  %1051 = vmatpush1.bf16.msra.mxu1 %v2068_v4  ;;  %v153_v61 = vld [vmem:[%s3134_s1 + $0x400] sm:$0xff]  ;;  %v2131_v63 = vcombine.high %v145_v52, %v149_v55  ;;  %v158_v3 = vld [vmem:[%s3134_s1 + $0x428] sm:$0xff]  ;;  %v2130_v4 = vcombine.low %v145_v52, %v149_v55  ;;  %v60_v52 = vld [vmem:[%s3134_s1 + $0x118] sm:$0xff] }
  0x23   :  { %966 = vmatprep.subr.bf16.mxu0 %v2075_v5  ;;  %1052 = vmatprep.subr.bf16.mxu1 %v2077_v6  ;;  %v157_v0 = vld [vmem:[%s3134_s1 + $0x420] sm:$0xff]  ;;  %v2132_v6 = vcombine.low %v146_v58, %v150_v59  ;;  %v2141_v10 = vcombine.high %v154_v2, %v158_v3  ;;  %v2140_v15 = vcombine.low %v154_v2, %v158_v3  ;;  %v67_v55 = vld [vmem:[%s3134_s1 + $0x150] sm:$0xff] }
  0x24   :  { %v161_v5 = vld [vmem:[%s3134_s1 + $0x440] sm:$0xff]  ;;  %v2139_v8 = vcombine.high %v153_v61, %v157_v0 }
  0x25   :  { %v2660_v7 = vld [vmem:[%s3135_s0] ss:$12 sps:$4 sm:$0xff]  }
  0x26   :  { %967 = vmatpush1.bf16.msra.mxu0 %v2074_v11  ;;  %1053 = vmatpush1.bf16.msra.mxu1 %v2076_v12  ;;  %v165_v9 = vld [vmem:[%s3134_s1 + $0x460] sm:$0xff]  ;;  %v162_v11 = vld [vmem:[%s3134_s1 + $0x448] sm:$0xff] }
  0x27   :  { %968 = vmatprep.subr.bf16.mxu0 %v2083_v13  ;;  %1054 = vmatprep.subr.bf16.mxu1 %v2085_v14  ;;  %v166_v12 = vld [vmem:[%s3134_s1 + $0x468] sm:$0xff]  ;;  %v2138_v13 = vcombine.low %v153_v61, %v157_v0  ;;  %v27_v14 = vld [vmem:[%s3134_s1 + $0x10] sm:$0xff]  ;;  %v2147_v16 = vcombine.high %v161_v5, %v165_v9  ;;  %v72_v61 = vld [vmem:[%s3134_s1 + $0x178] sm:$0xff] }
  0x28   :  { %v2149_v18 = vcombine.high %v162_v11, %v166_v12  ;;  %v2015_v23 = vcombine.high %v27_v14, %v31_v17  ;;  %v2014_v31 = vcombine.low %v27_v14, %v31_v17  ;;  %v75_v0 = vld [vmem:[%s3134_s1 + $0x190] sm:$0xff]  ;;  %v88_v14 = vld [vmem:[%s3134_s1 + $0x1f8] sm:$0xff] }
  0x2a   :  { %969 = vmatpush1.bf16.msra.mxu0 %v2082_v19  ;;  %1055 = vmatpush1.bf16.msra.mxu1 %v2084_v20  ;;  %v28_v19 = vld [vmem:[%s3134_s1 + $0x18] sm:$0xff] }
  0x2b   :  { %970 = vmatprep.subr.bf16.mxu0 %v2091_v21  ;;  %1056 = vmatprep.subr.bf16.mxu1 %v2093_v22  ;;  %v32_v20 = vld [vmem:[%s3134_s1 + $0x38] sm:$0xff]  ;;  %v2146_v21 = vcombine.low %v161_v5, %v165_v9  ;;  %v2148_v22 = vcombine.low %v162_v11, %v166_v12  ;;  %v83_v9 = vld [vmem:[%s3134_s1 + $0x1d0] sm:$0xff] }
  0x2c   :  { %v2017_v25 = vcombine.high %v28_v19, %v32_v20  ;;  %v2016_v34 = vcombine.low %v28_v19, %v32_v20  ;;  %v80_v5 = vld [vmem:[%s3134_s1 + $0x1b8] sm:$0xff]  ;;  %v91_v20 = vld [vmem:[%s3134_s1 + $0x210] sm:$0xff] }
  0x2e   :  { %971 = vmatpush1.bf16.msra.mxu0 %v2090_v27  ;;  %1057 = vmatpush1.bf16.msra.mxu1 %v2092_v28  ;;  %v39_v27 = vld [vmem:[%s3134_s1 + $0x70] sm:$0xff] }
  0x2f   :  { %972 = vmatprep.subr.bf16.mxu0 %v2099_v29  ;;  %1058 = vmatprep.subr.bf16.mxu1 %v2101_v30  ;;  %v2696_v28 = vld [vmem:[%s3135_s0 + $0x8] ss:$12 sps:$4 sm:$0xff]   ;;  %v36_v29 = vld [vmem:[%s3134_s1 + $0x58] sm:$0xff]  ;;  %v2022_v39 = vcombine.low %v35_v26, %v39_v27 }
  0x30   :  { %v40_v30 = vld [vmem:[%s3134_s1 + $0x78] sm:$0xff] }
  0x31   :  { %v2024_v42 = vcombine.low %v36_v29, %v40_v30 }
  0x32   :  { %973 = vmatpush1.bf16.msra.mxu0 %v2098_v35  ;;  %1059 = vmatpush1.bf16.msra.mxu1 %v2100_v36  ;;  %v2023_v35 = vcombine.high %v35_v26, %v39_v27  ;;  %v44_v36 = vld [vmem:[%s3134_s1 + $0x98] sm:$0xff] }
  0x33   :  { %974 = vmatprep.subr.bf16.mxu0 %v2107_v37  ;;  %1060 = vmatprep.subr.bf16.mxu1 %v2109_v38  ;;  %v48_v37 = vld [vmem:[%s3134_s1 + $0xb8] sm:$0xff]  ;;  %v2025_v38 = vcombine.high %v36_v29, %v40_v30  ;;  %v99_v30 = vld [vmem:[%s3134_s1 + $0x250] sm:$0xff] }
  0x34   :  { %v2033_v46 = vcombine.high %v44_v36, %v48_v37  ;;  %v2032_v50 = vcombine.low %v44_v36, %v48_v37 }
  0x36   :  { %975 = vmatpush1.bf16.msra.mxu0 %v2106_v43  ;;  %1061 = vmatpush1.bf16.msra.mxu1 %v2108_v44  ;;  %v2031_v43 = vcombine.high %v43_v32, %v47_v33  ;;  %v52_v44 = vld [vmem:[%s3134_s1 + $0xd8] sm:$0xff] }
  0x37   :  { %976 = vmatprep.subr.bf16.mxu0 %v2115_v45  ;;  %1062 = vmatprep.subr.bf16.mxu1 %v2117_v48  ;;  %v56_v45 = vld [vmem:[%s3134_s1 + $0xf8] sm:$0xff]  ;;  %v59_v48 = vld [vmem:[%s3134_s1 + $0x110] sm:$0xff] }
  0x38   :  { %v2040_v58 = vcombine.low %v52_v44, %v56_v45  ;;  %v2047_v59 = vcombine.high %v59_v48, %v63_v49  ;;  %v100_v32 = vld [vmem:[%s3134_s1 + $0x258] sm:$0xff] }
  0x39   :  { %v104_v33 = vld [vmem:[%s3134_s1 + $0x278] sm:$0xff] }
  0x3a   :  { %977 = vmatpush1.bf16.msra.mxu0 %v2114_v51  ;;  %1063 = vmatpush1.bf16.msra.mxu1 %v2116_v53  ;;  %v2039_v51 = vcombine.high %v51_v40, %v55_v41  ;;  %v2041_v53 = vcombine.high %v52_v44, %v56_v45  ;;  %v2089_v37 = vcombine.high %v100_v32, %v104_v33 }
  0x3b   :  { %978 = vmatprep.subr.bf16.mxu0 %v2123_v54  ;;  %1064 = vmatprep.subr.bf16.mxu1 %v2125_v57  ;;  %v2038_v54 = vcombine.low %v51_v40, %v55_v41  ;;  %v71_v57 = vld [vmem:[%s3134_s1 + $0x170] sm:$0xff]  ;;  %v108_v40 = vld [vmem:[%s3134_s1 + $0x298] sm:$0xff] }
  0x3c   :  { %v2055_v3 = vcombine.high %v67_v55, %v71_v57  ;;  %v112_v41 = vld [vmem:[%s3134_s1 + $0x2b8] sm:$0xff] }
  0x3d   :  { %v2097_v45 = vcombine.high %v108_v40, %v112_v41 }
  0x3e   :  { %979 = vmatpush1.bf16.msra.mxu0 %v2122_v60  ;;  %1065 = vmatpush1.bf16.msra.mxu1 %v2124_v62  ;;  %v68_v60 = vld [vmem:[%s3134_s1 + $0x158] sm:$0xff] }
  0x3f   :  { %980 = vmatprep.subr.bf16.mxu0 %v2131_v63  ;;  %1066 = vmatprep.subr.bf16.mxu1 %v2133_v1  ;;  %v2046_v63 = vcombine.low %v59_v48, %v63_v49  ;;  %v79_v1 = vld [vmem:[%s3134_s1 + $0x1b0] sm:$0xff]  ;;  %v2056_v11 = vcombine.low %v68_v60, %v72_v61  ;;  %v116_v48 = vld [vmem:[%s3134_s1 + $0x2d8] sm:$0xff] }
  0x40   :  { %v2063_v12 = vcombine.high %v75_v0, %v79_v1  ;;  %v120_v49 = vld [vmem:[%s3134_s1 + $0x2f8] sm:$0xff] }
  0x42   :  { %981 = vmatpush1.bf16.msra.mxu0 %v2130_v4  ;;  %1067 = vmatpush1.bf16.msra.mxu1 %v2132_v6  ;;  %v76_v4 = vld [vmem:[%s3134_s1 + $0x198] sm:$0xff]  ;;  %v2057_v6 = vcombine.high %v68_v60, %v72_v61 }
  0x43   :  { %993 = vmatprep.subr.bf16.mxu0 %v2139_v8  ;;  %1079 = vmatprep.subr.bf16.mxu1 %v2141_v10  ;;  %v2054_v8 = vcombine.low %v67_v55, %v71_v57  ;;  %v87_v10 = vld [vmem:[%s3134_s1 + $0x1f0] sm:$0xff]  ;;  %v2064_v17 = vcombine.low %v76_v4, %v80_v5  ;;  %v124_v55 = vld [vmem:[%s3134_s1 + $0x318] sm:$0xff] }
  0x44   :  { %v128_v57 = vld [vmem:[%s3134_s1 + $0x338] sm:$0xff] }
  0x45   :  { %983 = vmatmul.mubr.bf16.vlgmr.msra.gmra.mrb[0].mxu0 %v2660_v7  ;;  %1069 = vmatmul.mubr.bf16.vlgmr.msra.gmra.mrb[0].mxu1 %v2660_v7  ;;  %v2113_v61 = vcombine.high %v124_v55, %v128_v57 }
  0x46   :  { %994 = vmatpush1.bf16.msra.mxu0 %v2138_v13  ;;  %1080 = vmatpush1.bf16.msra.mxu1 %v2140_v15  ;;  %v84_v13 = vld [vmem:[%s3134_s1 + $0x1d8] sm:$0xff]  ;;  %v2065_v15 = vcombine.high %v76_v4, %v80_v5 }
  0x47   :  { %995 = vmatprep.subr.bf16.mxu0 %v2147_v16  ;;  %1081 = vmatprep.subr.bf16.mxu1 %v2149_v18  ;;  %v2062_v16 = vcombine.low %v75_v0, %v79_v1  ;;  %v2071_v18 = vcombine.high %v83_v9, %v87_v10  ;;  %v2073_v19 = vcombine.high %v84_v13, %v88_v14  ;;  %v132_v0 = vld [vmem:[%s3134_s1 + $0x358] sm:$0xff] }
  0x48   :  { %1025 = vmatprep.mubr.bf16.mxu0 %v2412_v24  ;;  %1111 = vmatprep.mubr.bf16.mxu1 %v2412_v24  ;;  %v2072_v26 = vcombine.low %v84_v13, %v88_v14  ;;  %v136_v1 = vld [vmem:[%s3134_s1 + $0x378] sm:$0xff] }
  0x49   :  { %v2121_v5 = vcombine.high %v132_v0, %v136_v1 }
  0x4a   :  { %996 = vmatpush1.bf16.msra.mxu0 %v2146_v21  ;;  %1082 = vmatpush1.bf16.msra.mxu1 %v2148_v22  ;;  %v95_v21 = vld [vmem:[%s3134_s1 + $0x230] sm:$0xff]  ;;  %v92_v22 = vld [vmem:[%s3134_s1 + $0x218] sm:$0xff] }
  0x4b   :  { %1122 = vmatprep.subr.bf16.mxu0 %v2015_v23  ;;  %1208 = vmatprep.subr.bf16.mxu1 %v2017_v25  ;;  %v96_v23 = vld [vmem:[%s3134_s1 + $0x238] sm:$0xff]  ;;  %v2070_v25 = vcombine.low %v83_v9, %v87_v10  ;;  %v2079_v27 = vcombine.high %v91_v20, %v95_v21 }
  0x4c   :  { %v2081_v29 = vcombine.high %v92_v22, %v96_v23  ;;  %v140_v9 = vld [vmem:[%s3134_s1 + $0x398] sm:$0xff] }
  0x4d   :  { %v144_v10 = vld [vmem:[%s3134_s1 + $0x3b8] sm:$0xff] }
  0x4e   :  { %v2129_v14 = vcombine.high %v140_v9, %v144_v10 }
  0x51   :  { %2154 = vmatmul.mubr.msk.bf16.vlgmr.msra.gmra.mrb[0].mxu0 %vm946_vm0, %v2696_v28  ;;  %2155 = vmatmul.mubr.msk.bf16.vlgmr.msra.gmra.mrb[0].mxu1 %vm946_vm0, %v2696_v28 }
  0x52   :  { %1123 = vmatpush1.bf16.msra.mxu0 %v2014_v31  ;;  %1209 = vmatpush1.bf16.msra.mxu1 %v2016_v34  ;;  %v103_v31 = vld [vmem:[%s3134_s1 + $0x270] sm:$0xff]  ;;  %v2078_v34 = vcombine.low %v91_v20, %v95_v21  ;;  %v2128_v20 = vcombine.low %v140_v9, %v144_v10  ;;  %v2380_v9 = vld [vmem:[%s3136_s3 + $0x140] sm:$0xff]  }
  0x53   :  { %1124 = vmatprep.subr.bf16.mxu0 %v2023_v35  ;;  %1210 = vmatprep.subr.bf16.mxu1 %v2025_v38  ;;  %v2080_v35 = vcombine.low %v92_v22, %v96_v23  ;;  %v2087_v36 = vcombine.high %v99_v30, %v103_v31  ;;  %v107_v38 = vld [vmem:[%s3134_s1 + $0x290] sm:$0xff]  ;;  %v2381_v10 = vld [vmem:[%s3136_s3 + $0x1c0] sm:$0xff]  }
  0x54   :  { %1154 = vmatprep.mubr.bf16.mxu0 %v2536_v56  ;;  %1240 = vmatprep.mubr.bf16.mxu1 %v2536_v56  ;;  %v64_v56 = vld [vmem:[%s3134_s1 + $0x138] sm:$0xff]  ;;  %v155_v23 = vld [vmem:[%s3134_s1 + $0x410] sm:$0xff] }
  0x55   :  { %v2049_v62 = vcombine.high %v60_v52, %v64_v56  ;;  %v2048_v2 = vcombine.low %v60_v52, %v64_v56  ;;  %v2105_v56 = vcombine.high %v116_v48, %v120_v49 }
  0x56   :  { %1125 = vmatpush1.bf16.msra.mxu0 %v2022_v39  ;;  %1211 = vmatpush1.bf16.msra.mxu1 %v2024_v42  ;;  %v111_v39 = vld [vmem:[%s3134_s1 + $0x2b0] sm:$0xff]  ;;  %v2086_v42 = vcombine.low %v99_v30, %v103_v31 }
  0x57   :  { %1126 = vmatprep.subr.bf16.mxu0 %v2031_v43  ;;  %1212 = vmatprep.subr.bf16.mxu1 %v2033_v46  ;;  %v2088_v43 = vcombine.low %v100_v32, %v104_v33  ;;  %v2095_v44 = vcombine.high %v107_v38, %v111_v39  ;;  %v115_v46 = vld [vmem:[%s3134_s1 + $0x2d0] sm:$0xff] }
  0x58   :  { %v163_v33 = vld [vmem:[%s3134_s1 + $0x450] sm:$0xff] }
  0x5a   :  { %1127 = vmatpush1.bf16.msra.mxu0 %v2030_v47  ;;  %1213 = vmatpush1.bf16.msra.mxu1 %v2032_v50  ;;  %v119_v47 = vld [vmem:[%s3134_s1 + $0x2f0] sm:$0xff]  ;;  %v2094_v50 = vcombine.low %v107_v38, %v111_v39 }
  0x5b   :  { %1128 = vmatprep.subr.bf16.mxu0 %v2039_v51  ;;  %1214 = vmatprep.subr.bf16.mxu1 %v2041_v53  ;;  %v2096_v51 = vcombine.low %v108_v40, %v112_v41  ;;  %v2103_v52 = vcombine.high %v115_v46, %v119_v47  ;;  %v123_v53 = vld [vmem:[%s3134_s1 + $0x310] sm:$0xff] }
  0x5e   :  { %1129 = vmatpush1.bf16.msra.mxu0 %v2038_v54  ;;  %1215 = vmatpush1.bf16.msra.mxu1 %v2040_v58  ;;  %v127_v54 = vld [vmem:[%s3134_s1 + $0x330] sm:$0xff]  ;;  %v2102_v58 = vcombine.low %v115_v46, %v119_v47  ;;  %v2352_v46 = vld [vmem:[%s3136_s3 + $0x48] sm:$0xff]  }
  0x5f   :  { %1130 = vmatprep.subr.bf16.mxu0 %v2047_v59  ;;  %1216 = vmatprep.subr.bf16.mxu1 %v2049_v62  ;;  %v2104_v59 = vcombine.low %v116_v48, %v120_v49  ;;  %v2111_v60 = vcombine.high %v123_v53, %v127_v54  ;;  %v131_v62 = vld [vmem:[%s3134_s1 + $0x350] sm:$0xff]  ;;  %v2354_v47 = vld [vmem:[%s3136_s3 + $0x8] sm:$0xff]  }
  0x60   :  { %v2355_v48 = vld [vmem:[%s3136_s3 + $0x88] sm:$0xff]   ;;  %v2356_v49 = vld [vmem:[%s3136_s3 + $0x50] sm:$0xff]  }
  0x62   :  { %1131 = vmatpush1.bf16.msra.mxu0 %v2046_v63  ;;  %1217 = vmatpush1.bf16.msra.mxu1 %v2048_v2  ;;  %v135_v63 = vld [vmem:[%s3134_s1 + $0x370] sm:$0xff]  ;;  %v2110_v2 = vcombine.low %v123_v53, %v127_v54  ;;  %v2362_v53 = vld [vmem:[%s3136_s3 + $0x18] sm:$0xff]  }
  0x63   :  { %1132 = vmatprep.subr.bf16.mxu0 %v2055_v3  ;;  %1218 = vmatprep.subr.bf16.mxu1 %v2057_v6  ;;  %v2112_v3 = vcombine.low %v124_v55, %v128_v57  ;;  %v2119_v4 = vcombine.high %v131_v62, %v135_v63  ;;  %v139_v6 = vld [vmem:[%s3134_s1 + $0x390] sm:$0xff]  ;;  %v2363_v54 = vld [vmem:[%s3136_s3 + $0x98] sm:$0xff]   ;;  %v2364_v55 = vld [vmem:[%s3136_s3 + $0x60] sm:$0xff]  }
  0x64   :  { %v2365_v57 = vld [vmem:[%s3136_s3 + $0xe0] sm:$0xff]  }
  0x66   :  { %1133 = vmatpush1.bf16.msra.mxu0 %v2054_v8  ;;  %1219 = vmatpush1.bf16.msra.mxu1 %v2056_v11  ;;  %v143_v8 = vld [vmem:[%s3134_s1 + $0x3b0] sm:$0xff]  ;;  %v2118_v11 = vcombine.low %v131_v62, %v135_v63  ;;  %v2370_v62 = vld [vmem:[%s3136_s3 + $0x28] sm:$0xff]  }
  0x67   :  { %1134 = vmatprep.subr.bf16.mxu0 %v2063_v12  ;;  %1220 = vmatprep.subr.bf16.mxu1 %v2065_v15  ;;  %v2120_v12 = vcombine.low %v132_v0, %v136_v1  ;;  %v2127_v13 = vcombine.high %v139_v6, %v143_v8  ;;  %v147_v15 = vld [vmem:[%s3134_s1 + $0x3d0] sm:$0xff]  ;;  %v2371_v63 = vld [vmem:[%s3136_s3 + $0xa8] sm:$0xff]  }
  0x68   :  { %v2372_v0 = vld [vmem:[%s3136_s3 + $0x70] sm:$0xff]  }
  0x69   :  { %v2373_v1 = vld [vmem:[%s3136_s3 + $0xf0] sm:$0xff]  }
  0x6a   :  { %1135 = vmatpush1.bf16.msra.mxu0 %v2062_v16  ;;  %1221 = vmatpush1.bf16.msra.mxu1 %v2064_v17  ;;  %v151_v16 = vld [vmem:[%s3134_s1 + $0x3f0] sm:$0xff]  ;;  %v148_v17 = vld [vmem:[%s3134_s1 + $0x3d8] sm:$0xff] }
  0x6b   :  { %1136 = vmatprep.subr.bf16.mxu0 %v2071_v18  ;;  %1222 = vmatprep.subr.bf16.mxu1 %v2073_v19  ;;  %v152_v18 = vld [vmem:[%s3134_s1 + $0x3f8] sm:$0xff]  ;;  %v2126_v19 = vcombine.low %v139_v6, %v143_v8  ;;  %v2135_v21 = vcombine.high %v147_v15, %v151_v16 }
  0x6c   :  { %v2137_v22 = vcombine.high %v148_v17, %v152_v18  ;;  %v2136_v30 = vcombine.low %v148_v17, %v152_v18  ;;  %v2378_v6 = vld [vmem:[%s3136_s3 + $0x38] sm:$0xff]  }
  0x6d   :  { %v2379_v8 = vld [vmem:[%s3136_s3 + $0xb8] sm:$0xff]  }
  0x6e   :  { %1137 = vmatpush1.bf16.msra.mxu0 %v2070_v25  ;;  %1223 = vmatpush1.bf16.msra.mxu1 %v2072_v26  ;;  %v159_v25 = vld [vmem:[%s3134_s1 + $0x430] sm:$0xff]  ;;  %v156_v26 = vld [vmem:[%s3134_s1 + $0x418] sm:$0xff] }
  0x6f   :  { %1138 = vmatprep.subr.bf16.mxu0 %v2079_v27  ;;  %1224 = vmatprep.subr.bf16.mxu1 %v2081_v29  ;;  %v160_v27 = vld [vmem:[%s3134_s1 + $0x438] sm:$0xff]  ;;  %v2134_v29 = vcombine.low %v147_v15, %v151_v16  ;;  %v2143_v31 = vcombine.high %v155_v23, %v159_v25 }
  0x70   :  { %v2145_v32 = vcombine.high %v156_v26, %v160_v27  ;;  %v2144_v38 = vcombine.low %v156_v26, %v160_v27 }
  0x72   :  { %1139 = vmatpush1.bf16.msra.mxu0 %v2078_v34  ;;  %1225 = vmatpush1.bf16.msra.mxu1 %v2080_v35  ;;  %v167_v34 = vld [vmem:[%s3134_s1 + $0x470] sm:$0xff]  ;;  %v164_v35 = vld [vmem:[%s3134_s1 + $0x458] sm:$0xff] }
  0x73   :  { %1140 = vmatprep.subr.bf16.mxu0 %v2087_v36  ;;  %1226 = vmatprep.subr.bf16.mxu1 %v2089_v37  ;;  %v168_v36 = vld [vmem:[%s3134_s1 + $0x478] sm:$0xff]  ;;  %v2142_v37 = vcombine.low %v155_v23, %v159_v25  ;;  %v2151_v39 = vcombine.high %v163_v33, %v167_v34  ;;  %v2150_v41 = vcombine.low %v163_v33, %v167_v34 }
  0x74   :  { %v2153_v40 = vcombine.high %v164_v35, %v168_v36 }
  0x76   :  { %1141 = vmatpush1.bf16.msra.mxu0 %v2086_v42  ;;  %1227 = vmatpush1.bf16.msra.mxu1 %v2088_v43  ;;  %v2152_v42 = vcombine.low %v164_v35, %v168_v36  ;;  %v2348_v43 = vld [vmem:[%s3136_s3 + $0x40] sm:$0xff]  }
  0x77   :  { %1142 = vmatprep.subr.bf16.mxu0 %v2095_v44  ;;  %1228 = vmatprep.subr.bf16.mxu1 %v2097_v45  ;;  %v2349_v44 = vld [vmem:[%s3136_s3 + $0xc0] sm:$0xff]  }
  0x78   :  { %v2351_v45 = vld [vmem:[%s3136_s3 + $0x80] sm:$0xff]  }
  0x7a   :  { %1143 = vmatpush1.bf16.msra.mxu0 %v2094_v50  ;;  %1229 = vmatpush1.bf16.msra.mxu1 %v2096_v51  ;;  %v2358_v50 = vld [vmem:[%s3136_s3 + $0x10] sm:$0xff]  }
  0x7b   :  { %1144 = vmatprep.subr.bf16.mxu0 %v2103_v52  ;;  %1230 = vmatprep.subr.bf16.mxu1 %v2105_v56  ;;  %v2359_v51 = vld [vmem:[%s3136_s3 + $0x90] sm:$0xff]   ;;  %v2360_v52 = vld [vmem:[%s3136_s3 + $0x58] sm:$0xff]  }
  0x7c   :  { %v2361_v56 = vld [vmem:[%s3136_s3 + $0xd8] sm:$0xff]  }
  0x7e   :  { %1145 = vmatpush1.bf16.msra.mxu0 %v2102_v58  ;;  %1231 = vmatpush1.bf16.msra.mxu1 %v2104_v59  ;;  %v2366_v58 = vld [vmem:[%s3136_s3 + $0x20] sm:$0xff]  }
  0x7f   :  { %1146 = vmatprep.subr.bf16.mxu0 %v2111_v60  ;;  %1232 = vmatprep.subr.bf16.mxu1 %v2113_v61  ;;  %v2367_v59 = vld [vmem:[%s3136_s3 + $0xa0] sm:$0xff]   ;;  %v2368_v60 = vld [vmem:[%s3136_s3 + $0x68] sm:$0xff]  }
  0x80   :  { %v2369_v61 = vld [vmem:[%s3136_s3 + $0xe8] sm:$0xff]  }
  0x82   :  { %1147 = vmatpush1.bf16.msra.mxu0 %v2110_v2  ;;  %1233 = vmatpush1.bf16.msra.mxu1 %v2112_v3  ;;  %v2374_v2 = vld [vmem:[%s3136_s3 + $0x30] sm:$0xff]  }
  0x83   :  { %1148 = vmatprep.subr.bf16.mxu0 %v2119_v4  ;;  %1234 = vmatprep.subr.bf16.mxu1 %v2121_v5  ;;  %v2375_v3 = vld [vmem:[%s3136_s3 + $0xb0] sm:$0xff]   ;;  %v2376_v4 = vld [vmem:[%s3136_s3 + $0x78] sm:$0xff]  }
  0x84   :  { %v2377_v5 = vld [vmem:[%s3136_s3 + $0xf8] sm:$0xff]  }
  0x86   :  { %1149 = vmatpush1.bf16.msra.mxu0 %v2118_v11  ;;  %1235 = vmatpush1.bf16.msra.mxu1 %v2120_v12  ;;  %v171_v11 = vlaneseq }
  0x87   :  { %1150 = vmatprep.subr.bf16.mxu0 %v2127_v13  ;;  %1236 = vmatprep.subr.bf16.mxu1 %v2129_v14  ;;  %v3018_v14 = vld [vmem:[%s3137_s2] sm:$0xff] }
  0x88   :  { %v3012_v12 = vshrl.u32 %v171_v11, 7  ;;  %v2407_v11 = vld [vmem:[%s3136_s3 + $0x1b0] sm:$0xff]  }
  0x8a   :  { %1151 = vmatpush1.bf16.msra.mxu0 %v2126_v19  ;;  %1237 = vmatpush1.bf16.msra.mxu1 %v2128_v20  ;;  %v173_v13 = vsub.s32 0, %v3012_v12  ;;  %v181_v15 = vsub.s32 2, %v3012_v12  ;;  %v177_v16 = vsub.s32 1, %v3012_v12  ;;  %v185_v17 = vsub.s32 3, %v3012_v12 }
  0x8b   :  { %1152 = vmatprep.subr.bf16.mxu0 %v2135_v21  ;;  %1238 = vmatprep.subr.bf16.mxu1 %v2137_v22 }
  0x8c   :  { %v174_v18 = vrot.slane %v3018_v14, %v173_v13  ;;  %v182_v19 = vrot.slane %v3018_v14, %v181_v15  ;;  %v178_v20 = vrot.slane %v3018_v14, %v177_v16  ;;  %v186_v21 = vrot.slane %v3018_v14, %v185_v17  ;;  %v2408_v13 = vld [vmem:[%s3136_s3 + $0x178] sm:$0xff]  }
  0x8d   :  { %v2409_v15 = vld [vmem:[%s3136_s3 + $0x1f8] sm:$0xff]  }
  0x8e   :  { %1153 = vmatpush1.bf16.msra.mxu0 %v2134_v29  ;;  %1239 = vmatpush1.bf16.msra.mxu1 %v2136_v30  ;;  %v2410_v16 = vld [vmem:[%s3136_s3 + $0x138] sm:$0xff]  }
  0x8f   :  { %1165 = vmatprep.subr.bf16.mxu0 %v2143_v31  ;;  %1251 = vmatprep.subr.bf16.mxu1 %v2145_v32  ;;  %v2411_v17 = vld [vmem:[%s3136_s3 + $0x1b8] sm:$0xff]  }
  0x91   :  { %1155 = vmatmul.mubr.bf16.vlgmr.msra.gmra.mrb[4].mxu0 %v2660_v7  ;;  %1241 = vmatmul.mubr.bf16.vlgmr.msra.gmra.mrb[4].mxu1 %v2660_v7  ;;  %v2350_v7 = vld [vmem:[%s3136_s3] sm:$0xff]  }
  0x92   :  { %1166 = vmatpush1.bf16.msra.mxu0 %v2142_v37  ;;  %1252 = vmatpush1.bf16.msra.mxu1 %v2144_v38 }
  0x93   :  { %1167 = vmatprep.subr.bf16.mxu0 %v2151_v39  ;;  %1253 = vmatprep.subr.bf16.mxu1 %v2153_v40 }
  0x94   :  { %1197 = vmatprep.mubr.bf16.mxu0 %v2412_v24  ;;  %1283 = vmatprep.mubr.bf16.mxu1 %v2412_v24  ;;  %v2353_v24 = vld [vmem:[%s3136_s3 + $0xc8] sm:$0xff]  }
  0x96   :  { %1168 = vmatpush1.bf16.msra.mxu0 %v2150_v41  ;;  %1254 = vmatpush1.bf16.msra.mxu1 %v2152_v42 }
  0x97   :  { %2223 = vmatprep.subr.bf16.mxu0 %v2348_v43  ;;  %2245 = vmatprep.subr.bf16.mxu1 %v2349_v44 }
  0x9d   :  { %2156 = vmatmul.mubr.msk.bf16.vlgmr.msra.gmra.mrb[4].mxu0 %vm946_vm0, %v2696_v28  ;;  %2157 = vmatmul.mubr.msk.bf16.vlgmr.msra.gmra.mrb[4].mxu1 %vm946_vm0, %v2696_v28  ;;  %v2357_v28 = vld [vmem:[%s3136_s3 + $0xd0] sm:$0xff]  }
  0x9e   :  { %2224 = vmatpush3.bf16.msra.mxu0 %v2350_v7  ;;  %2246 = vmatpush3.bf16.msra.mxu1 %v2351_v45 }
  0x9f   :  { %2225 = vmatprep.subr.bf16.mxu0 %v2352_v46  ;;  %2247 = vmatprep.subr.bf16.mxu1 %v2353_v24 }
  0xa2   :  { %2226 = vmatpush3.bf16.msra.mxu0 %v2354_v47  ;;  %2248 = vmatpush3.bf16.msra.mxu1 %v2355_v48 }
  0xa3   :  { %2227 = vmatprep.subr.bf16.mxu0 %v2356_v49  ;;  %2249 = vmatprep.subr.bf16.mxu1 %v2357_v28  ;;  %v2382_v49 = vld [vmem:[%s3136_s3 + $0x100] sm:$0xff]  }
  0xa6   :  { %2228 = vmatpush3.bf16.msra.mxu0 %v2358_v50  ;;  %2250 = vmatpush3.bf16.msra.mxu1 %v2359_v51  ;;  %v2383_v50 = vld [vmem:[%s3136_s3 + $0x180] sm:$0xff]   ;;  %v2384_v51 = vld [vmem:[%s3136_s3 + $0x148] sm:$0xff]  }
  0xa7   :  { %2229 = vmatprep.subr.bf16.mxu0 %v2360_v52  ;;  %2251 = vmatprep.subr.bf16.mxu1 %v2361_v56  ;;  %v2385_v52 = vld [vmem:[%s3136_s3 + $0x1c8] sm:$0xff]  }
  0xa8   :  { %v2386_v56 = vld [vmem:[%s3136_s3 + $0x108] sm:$0xff]  }
  0xaa   :  { %2230 = vmatpush3.bf16.msra.mxu0 %v2362_v53  ;;  %2252 = vmatpush3.bf16.msra.mxu1 %v2363_v54  ;;  %v2387_v53 = vld [vmem:[%s3136_s3 + $0x188] sm:$0xff]   ;;  %v2388_v54 = vld [vmem:[%s3136_s3 + $0x150] sm:$0xff]  }
  0xab   :  { %2231 = vmatprep.subr.bf16.mxu0 %v2364_v55  ;;  %2253 = vmatprep.subr.bf16.mxu1 %v2365_v57  ;;  %v2389_v55 = vld [vmem:[%s3136_s3 + $0x1d0] sm:$0xff]  }
  0xac   :  { %v2390_v57 = vld [vmem:[%s3136_s3 + $0x110] sm:$0xff]  }
  0xae   :  { %2232 = vmatpush3.bf16.msra.mxu0 %v2366_v58  ;;  %2254 = vmatpush3.bf16.msra.mxu1 %v2367_v59  ;;  %v2391_v58 = vld [vmem:[%s3136_s3 + $0x190] sm:$0xff]   ;;  %v2392_v59 = vld [vmem:[%s3136_s3 + $0x158] sm:$0xff]  }
  0xaf   :  { %2233 = vmatprep.subr.bf16.mxu0 %v2368_v60  ;;  %2255 = vmatprep.subr.bf16.mxu1 %v2369_v61  ;;  %v2393_v60 = vld [vmem:[%s3136_s3 + $0x1d8] sm:$0xff]  }
  0xb0   :  { %v2394_v61 = vld [vmem:[%s3136_s3 + $0x118] sm:$0xff]  }
  0xb2   :  { %2234 = vmatpush3.bf16.msra.mxu0 %v2370_v62  ;;  %2256 = vmatpush3.bf16.msra.mxu1 %v2371_v63  ;;  %v2395_v62 = vld [vmem:[%s3136_s3 + $0x198] sm:$0xff]   ;;  %v2396_v63 = vld [vmem:[%s3136_s3 + $0x160] sm:$0xff]  }
  0xb3   :  { %2235 = vmatprep.subr.bf16.mxu0 %v2372_v0  ;;  %2257 = vmatprep.subr.bf16.mxu1 %v2373_v1  ;;  %v2397_v0 = vld [vmem:[%s3136_s3 + $0x1e0] sm:$0xff]  }
  0xb4   :  { %v2398_v1 = vld [vmem:[%s3136_s3 + $0x120] sm:$0xff]  }
  0xb6   :  { %2236 = vmatpush3.bf16.msra.mxu0 %v2374_v2  ;;  %2258 = vmatpush3.bf16.msra.mxu1 %v2375_v3  ;;  %v2399_v2 = vld [vmem:[%s3136_s3 + $0x1a0] sm:$0xff]   ;;  %v2400_v3 = vld [vmem:[%s3136_s3 + $0x168] sm:$0xff]  }
  0xb7   :  { %2237 = vmatprep.subr.bf16.mxu0 %v2376_v4  ;;  %2259 = vmatprep.subr.bf16.mxu1 %v2377_v5  ;;  %v2401_v4 = vld [vmem:[%s3136_s3 + $0x1e8] sm:$0xff]  }
  0xb8   :  { %v2402_v5 = vld [vmem:[%s3136_s3 + $0x128] sm:$0xff]  }
  0xba   :  { %2238 = vmatpush3.bf16.msra.mxu0 %v2378_v6  ;;  %2260 = vmatpush3.bf16.msra.mxu1 %v2379_v8  ;;  %v2403_v6 = vld [vmem:[%s3136_s3 + $0x1a8] sm:$0xff]   ;;  %v2404_v8 = vld [vmem:[%s3136_s3 + $0x170] sm:$0xff]  }
  0xbb   :  { %2267 = vmatprep.subr.bf16.mxu0 %v2380_v9  ;;  %2289 = vmatprep.subr.bf16.mxu1 %v2381_v10  ;;  %v2405_v9 = vld [vmem:[%s3136_s3 + $0x1f0] sm:$0xff]  }
  0xbc   :  { %v2406_v10 = vld [vmem:[%s3136_s3 + $0x130] sm:$0xff]  }
 0x124   :  { %v1027_v22 = vpop.f32.mrb[0].mxu0  ;;  %v1113_v25 = vpop.f32.mrb[0].mxu1 }
 0x125   :  { %v2311_v23 = vadd.f32 %v1027_v22, %v174_v18  ;;  %v1029_v26 = vpop.f32.mrb[1].mxu0  ;;  %v2315_v27 = vadd.f32 %v1113_v25, %v182_v19  ;;  %v1115_v30 = vpop.f32.mrb[1].mxu1 }
 0x126   :  { %v2312_v29 = vadd.f32 %v1029_v26, %v178_v20  ;;  %v1031_v31 = vpop.f32.mrb[2].mxu0  ;;  %v2316_v32 = vadd.f32 %v1115_v30, %v186_v21  ;;  %v1117_v34 = vpop.f32.mrb[2].mxu1 }
 0x127   :  { %v2313_v33 = vadd.f32 %v1031_v31, %v174_v18  ;;  %v1033_v35 = vpop.f32.mrb[3].mxu0  ;;  %v2317_v36 = vadd.f32 %v1117_v34, %v182_v19  ;;  %v1119_v38 = vpop.f32.mrb[3].mxu1  ;;  %v1294_v39 = vmax.f32 %v2311_v23, 0.0  ;;  %v1296_v42 = vmax.f32 %v2315_v27, 0.0 }
 0x128   :  { %v2314_v37 = vadd.f32 %v1033_v35, %v178_v20  ;;  %v2318_v41 = vadd.f32 %v1119_v38, %v186_v21  ;;  %v1295_v43 = vmax.f32 %v2312_v29, 0.0  ;;  %v1297_v45 = vmax.f32 %v2316_v32, 0.0 }
 0x129   :  { %v1302_v40 = vmax.f32 %v2313_v33, 0.0  ;;  %v1304_v44 = vmax.f32 %v2317_v36, 0.0  ;;  %v189_v18 = vsub.s32 4, %v3012_v12  ;;  %v197_v19 = vsub.s32 6, %v3012_v12 }
 0x12a   :  { %v1303_v7 = vmax.f32 %v2314_v37, 0.0  ;;  %v1305_v24 = vmax.f32 %v2318_v41, 0.0  ;;  %v193_v20 = vsub.s32 5, %v3012_v12  ;;  %v201_v21 = vsub.s32 7, %v3012_v12 }
 0x12b   :  { %v1310_v46 = vpack.c.bf16 %v1302_v40, %v1294_v39  ;;  %v1312_v47 = vpack.c.bf16 %v1304_v44, %v1296_v42  ;;  %v190_v22 = vrot.slane %v3018_v14, %v189_v18  ;;  %v198_v23 = vrot.slane %v3018_v14, %v197_v19 }
 0x12c   :  { %v1311_v48 = vpack.c.bf16 %v1303_v7, %v1295_v43  ;;  %v1313_v28 = vpack.c.bf16 %v1305_v24, %v1297_v45  ;;  %v194_v25 = vrot.slane %v3018_v14, %v193_v20  ;;  %v202_v26 = vrot.slane %v3018_v14, %v201_v21 }
 0x12e   :  { %1869 = vmatprep.mubr.bf16.mxu0 %v1311_v48  ;;  %1910 = vmatprep.mubr.bf16.mxu1 %v1313_v28 }
 0x12f   :  { %1870 = vmatmul.mubr.bf16.vlgmr.msra.gmra.mrb[8].mxu0 %v1310_v46  ;;  %1911 = vmatmul.mubr.bf16.vlgmr.msra.gmra.mrb[8].mxu1 %v1312_v47 }
 0x130   :  { %2268 = vmatpush3.bf16.msra.mxu0 %v2382_v49  ;;  %2290 = vmatpush3.bf16.msra.mxu1 %v2383_v50 }
 0x131   :  { %2269 = vmatprep.subr.bf16.mxu0 %v2384_v51  ;;  %2291 = vmatprep.subr.bf16.mxu1 %v2385_v52 }
 0x134   :  { %2270 = vmatpush3.bf16.msra.mxu0 %v2386_v56  ;;  %2292 = vmatpush3.bf16.msra.mxu1 %v2387_v53  ;;  %v2158_v56 = vld [vmem:[%s3138_s4] ss:$0 sm:$0xff] }
 0x135   :  { %2271 = vmatprep.subr.bf16.mxu0 %v2388_v54  ;;  %2293 = vmatprep.subr.bf16.mxu1 %v2389_v55 }
 0x138   :  { %2272 = vmatpush3.bf16.msra.mxu0 %v2390_v57  ;;  %2294 = vmatpush3.bf16.msra.mxu1 %v2391_v58 }
 0x139   :  { %2273 = vmatprep.subr.bf16.mxu0 %v2392_v59  ;;  %2295 = vmatprep.subr.bf16.mxu1 %v2393_v60 }
 0x13c   :  { %2274 = vmatpush3.bf16.msra.mxu0 %v2394_v61  ;;  %2296 = vmatpush3.bf16.msra.mxu1 %v2395_v62 }
 0x13d   :  { %2275 = vmatprep.subr.bf16.mxu0 %v2396_v63  ;;  %2297 = vmatprep.subr.bf16.mxu1 %v2397_v0 }
 0x140   :  { %2276 = vmatpush3.bf16.msra.mxu0 %v2398_v1  ;;  %2298 = vmatpush3.bf16.msra.mxu1 %v2399_v2 }
 0x141   :  { %2277 = vmatprep.subr.bf16.mxu0 %v2400_v3  ;;  %2299 = vmatprep.subr.bf16.mxu1 %v2401_v4 }
 0x144   :  { %2278 = vmatpush3.bf16.msra.mxu0 %v2402_v5  ;;  %2300 = vmatpush3.bf16.msra.mxu1 %v2403_v6 }
 0x145   :  { %2279 = vmatprep.subr.bf16.mxu0 %v2404_v8  ;;  %2301 = vmatprep.subr.bf16.mxu1 %v2405_v9 }
 0x148   :  { %2280 = vmatpush3.bf16.msra.mxu0 %v2406_v10  ;;  %2302 = vmatpush3.bf16.msra.mxu1 %v2407_v11 }
 0x149   :  { %2281 = vmatprep.subr.bf16.mxu0 %v2408_v13  ;;  %2303 = vmatprep.subr.bf16.mxu1 %v2409_v15 }
 0x14c   :  { %2282 = vmatpush3.bf16.msra.mxu0 %v2410_v16  ;;  %2304 = vmatpush3.bf16.msra.mxu1 %v2411_v17 }
 0x170   :  { %v1199_v27 = vpop.f32.mrb[4].mxu0  ;;  %v1285_v30 = vpop.f32.mrb[4].mxu1 }
 0x171   :  { %v2319_v29 = vadd.f32 %v1199_v27, %v190_v22  ;;  %v1201_v31 = vpop.f32.mrb[5].mxu0  ;;  %v2323_v32 = vadd.f32 %v1285_v30, %v198_v23  ;;  %v1287_v34 = vpop.f32.mrb[5].mxu1 }
 0x172   :  { %v2320_v33 = vadd.f32 %v1201_v31, %v194_v25  ;;  %v1203_v35 = vpop.f32.mrb[6].mxu0  ;;  %v2324_v36 = vadd.f32 %v1287_v34, %v202_v26  ;;  %v1289_v38 = vpop.f32.mrb[6].mxu1 }
 0x173   :  { %v2321_v37 = vadd.f32 %v1203_v35, %v190_v22  ;;  %v1205_v12 = vpop.f32.mrb[7].mxu0  ;;  %v2325_v39 = vadd.f32 %v1289_v38, %v198_v23  ;;  %v1291_v41 = vpop.f32.mrb[7].mxu1  ;;  %v1298_v42 = vmax.f32 %v2319_v29, 0.0  ;;  %v1300_v7 = vmax.f32 %v2323_v32, 0.0 }
 0x174   :  { %v2322_v40 = vadd.f32 %v1205_v12, %v194_v25  ;;  %v2326_v44 = vadd.f32 %v1291_v41, %v202_v26  ;;  %v1299_v14 = vmax.f32 %v2320_v33, 0.0  ;;  %v1301_v24 = vmax.f32 %v2324_v36, 0.0 }
 0x175   :  { %v1306_v43 = vmax.f32 %v2321_v37, 0.0  ;;  %v1308_v45 = vmax.f32 %v2325_v39, 0.0 }
 0x176   :  { %v1307_v46 = vmax.f32 %v2322_v40, 0.0  ;;  %v1309_v48 = vmax.f32 %v2326_v44, 0.0 }
 0x177   :  { %v1314_v47 = vpack.c.bf16 %v1306_v43, %v1298_v42  ;;  %v1316_v49 = vpack.c.bf16 %v1308_v45, %v1300_v7 }
 0x178   :  { %v1315_v28 = vpack.c.bf16 %v1307_v46, %v1299_v14  ;;  %v1317_v50 = vpack.c.bf16 %v1309_v48, %v1301_v24 }
 0x17a   :  { %1951 = vmatprep.mubr.bf16.mxu0 %v1315_v28  ;;  %1992 = vmatprep.mubr.bf16.mxu1 %v1317_v50 }
 0x17b   :  { %1952 = vmatmul.mubr.bf16.vlgmr.msra.gmra.mrb[12].mxu0 %v1314_v47  ;;  %1993 = vmatmul.mubr.bf16.vlgmr.msra.gmra.mrb[12].mxu1 %v1316_v49 }
 0x202   :  { %v2239_v51 = vpop.f32.mrb[8].mxu0  ;;  %v2261_v52 = vpop.f32.mrb[8].mxu1 }
 0x203   :  { %v2240_v53 = vpop.f32.mrb[9].mxu0  ;;  %v2262_v55 = vpop.f32.mrb[9].mxu1 }
 0x204   :  { %v2241_v54 = vadd.f32 %v2240_v53, %v2239_v51  ;;  %v2242_v57 = vpop.f32.mrb[10].mxu0  ;;  %v2263_v58 = vadd.f32 %v2262_v55, %v2261_v52  ;;  %v2264_v59 = vpop.f32.mrb[10].mxu1 }
 0x205   :  { %v2243_v60 = vpop.f32.mrb[11].mxu0  ;;  %v2265_v63 = vpop.f32.mrb[11].mxu1 }
 0x206   :  { %v1872_v61 = vadd.f32 %v2241_v54, %v2158_v56  ;;  %v2244_v62 = vadd.f32 %v2243_v60, %v2242_v57  ;;  %v2266_v0 = vadd.f32 %v2265_v63, %v2264_v59 }
 0x208   :  { %v1913_v1 = vadd.f32 %v2263_v58, %v1872_v61  ;;  %v1875_v2 = vadd.f32 %v2244_v62, %v2158_v56 }
 0x20a   :  { %v1916_v3 = vadd.f32 %v2266_v0, %v1875_v2 }
 0x24e   :  { %v2283_v4 = vpop.f32.mrb[12].mxu0  ;;  %v2305_v5 = vpop.f32.mrb[12].mxu1 }
 0x24f   :  { %v2284_v6 = vpop.f32.mrb[13].mxu0  ;;  %v2306_v9 = vpop.f32.mrb[13].mxu1 }
 0x250   :  { %v2285_v8 = vadd.f32 %v2284_v6, %v2283_v4  ;;  %v2286_v10 = vpop.f32.mrb[14].mxu0  ;;  %v2307_v11 = vadd.f32 %v2306_v9, %v2305_v5  ;;  %v2308_v13 = vpop.f32.mrb[14].mxu1 }
 0x251   :  { %v2287_v15 = vpop.f32.mrb[15].mxu0  ;;  %v2309_v18 = vpop.f32.mrb[15].mxu1 }
 0x252   :  { %v1954_v16 = vadd.f32 %v2285_v8, %v1913_v1  ;;  %v2288_v17 = vadd.f32 %v2287_v15, %v2286_v10  ;;  %v2310_v19 = vadd.f32 %v2309_v18, %v2308_v13 }
 0x254   :  { %v1995_v20 = vadd.f32 %v2307_v11, %v1954_v16  ;;  %v1957_v21 = vadd.f32 %v2288_v17, %v1916_v3 }
 0x256   :  { %2001 = vst [vmem:[%s3139_s5] sm:$0xff] %v1995_v20  ;;  %v1998_v22 = vadd.f32 %v2310_v19, %v1957_v21 }
 0x258   :  { %2002 = vst [vmem:[%s3139_s5 + $0x8] sm:$0xff] %v1998_v22 }

// kernel: cnn_forward.2
= control target key start
LH: loop header
LB: loop body
LE: loop exit
PB: predicated region body
PF: predicated region fallthrough
CT: control target
= control target key end

     0   :  { %s7521_s0 = inlined_call_operand.vmem [shape: bf16[2,32,96], index: 0, kind: input, shape index: {}]   ;;  %s7522_s1 = inlined_call_operand.hbm [shape: bf16[9,90,240], index: 1, kind: input, shape index: {}]   ;;  %s7523_s2 = inlined_call_operand.vmem [shape: f32[1,240], index: 2, kind: input, shape index: {}]   ;;  %s7524_s3 = inlined_call_operand.vmem [shape: bf16[2,15,30], index: 3, kind: input, shape index: {}]   ;;  %s7525_s4 = inlined_call_operand.vmem [shape: bf16[2,240,120], index: 4, kind: input, shape index: {}]   ;;  %s7526_s5 = inlined_call_operand.hbm [shape: bf16[9,104,208], index: 5, kind: input, shape index: {}]   ;;  %s7527_s6 = inlined_call_operand.vmem [shape: f32[1,208], index: 6, kind: input, shape index: {}]   ;;  %s7528_s7 = inlined_call_operand.vmem [shape: bf16[2,7,13], index: 7, kind: input, shape index: {}]   ;;  %s7529_s8 = inlined_call_operand.vmem [shape: bf16[2,208,112], index: 8, kind: input, shape index: {}]   ;;  %s7530_s9 = inlined_call_operand.hbm [shape: bf16[9,80,160], index: 9, kind: input, shape index: {}]   ;;  %s7531_s10 = inlined_call_operand.vmem [shape: f32[1,160], index: 10, kind: input, shape index: {}]   ;;  %s7532_s11 = inlined_call_operand.vmem [shape: bf16[2,3,5], index: 11, kind: input, shape index: {}]   ;;  %s7533_s12 = inlined_call_operand.vmem [shape: bf16[2,160,96], index: 12, kind: input, shape index: {}]   ;;  %s7534_s13 = inlined_call_operand.vmem [shape: bf16[2,3,96], index: 13, kind: output, shape index: {}]  }
   0x1   :  { %7538 = sst [smem:[#allocation10_spill]] %s7534_s13 }
   0x2   :  { %18 = vsyncpa [#allocation3], 0 }
   0x3   :  { %19 = vsyncpa [#allocation5], 0  ;;  %s6845_s25 = smov 0  }
   0x4 LB: > { %7539 = sst [smem:[#allocation9_spill]] %s6761_s25  ;;  %s6851_s26 = sadd.s32 4294967295, %s6761_s25   ;;  %s6761_s25 = sphi %s6845_s25, %s25_s25  }
   0x5   : > { %p5395_p0 = scmp.ge.s32.totalorder %s6761_s25, 1  ;;  %p334_p1 = scmp.lt.s32.totalorder %s6761_s25, 3 }
   0x6   : > { %p7535_p2 = scmp.eq.s32.totalorder %s6851_s26, 0  ;;  %s6763_s28 = smov [#allocation4]  }
   0x7   : > { %p6856_p3 = pnand %p5395_p0, %p334_p1  ;;  %s368_s29 = sshll.u32 %s6763_s28, 4  ;;  %s369_s29 = int_to_ptr.vmem [resolvable:$true] %s368_s29 }
   0x8   : > { %s6764_s30 = smov [#allocation2]   ;;  %s6765_s16 = smov [#allocation6]  }
   0x9   : > { %s7540_s27 = scalar_select %p6856_p3, 1, 0 }
   0xa   : > { %p6070_p4 = pneg %p6856_p3  ;;  %s346_s14 = sshll.u32 %s6764_s30, 4  ;;  %s6868_s14 = int_to_ptr.vmem [resolvable:$true] %s346_s14 }
   0xb   : > { %s390_s17 = sshll.u32 %s6765_s16, 4  ;;  %s6663_s20 = scalar_lea.hbm %s7526_s5, 14976  ;;  %s6870_s17 = int_to_ptr.vmem [resolvable:$true] %s390_s17 }
   0xc   : > { %p6864_p5 = pnand %p7535_p2, %p6070_p4  ;;  %p6664_p6 = scmp.ne.s32.totalorder %s7526_s5, %s6663_s20 }
   0xd   : > { %p6670_p10 = scmp.lt.u32.totalorder %s6663_s20, %s7526_s5 }
   0xe   : > { %p6880_p7 = pneg %p6864_p5 }
  0x10   : > { %p6666_p8 = pnand %p6880_p7, %p6664_p6 }
  0x12   : > { %p6667_p9 = pneg %p6666_p8 }
  0x14   : > { %p6672_p11 = pnand %p6670_p10, %p6667_p9 }
  0x16   : > { %6675 = shalt.err (!%p6672_p11)
}
  0x17   : > { %s6676_s30 = scalar_lea.vmem %s369_s29, 14976  ;;  %p6684_p1 = scmp.lt.s32.totalorder %s369_s29, %s369_s29 }
  0x18   : > { %p6677_p12 = scmp.ne.s32.totalorder %s369_s29, %s6676_s30  ;;  %p6685_p4 = scmp.lt.s32.totalorder %s6676_s30, %s6676_s30 }
  0x1a   : > { %p6679_p13 = pnand %p6677_p12, %p6880_p7  ;;  %p6686_p2 = por %p6685_p4, %p6684_p1 }
  0x1c   : > { %p6680_p0 = pneg %p6679_p13 }
  0x1e   : > { %p6687_p3 = pnand %p6686_p2, %p6680_p0 }
  0x20   : > { %6690 = shalt.err (!%p6687_p3)
}
  0x21   : > { %s6766_s16 = smov 128   ;;  %s6767_s18 = smov 8  }
  0x22   : > { %6076 = dma.hbm_to_vmem [thread:$0]  (!%p6864_p5), %s7526_s5, 14976, %s369_s29, [#allocation5], %s6766_s16, %s6766_s16, %s6767_s18  }
  0x23   : > { %s6691_s24 = scalar_lea.hbm %s7522_s1, 13824 }
  0x24   : > { %p6692_p2 = scmp.ne.s32.totalorder %s7522_s1, %s6691_s24  ;;  %p6698_p8 = scmp.lt.u32.totalorder %s6691_s24, %s7522_s1 }
  0x26   : > { %p6694_p3 = pnand %p6692_p2, %p6880_p7 }
  0x28   : > { %p6695_p6 = pneg %p6694_p3 }
  0x2a   : > { %p6700_p9 = pnand %p6698_p8, %p6695_p6 }
  0x2c   : > { %6703 = shalt.err (!%p6700_p9)
}
  0x2d   : > { %s6704_s29 = scalar_lea.vmem %s6868_s14, 13824  ;;  %p6712_p13 = scmp.lt.s32.totalorder %s6868_s14, %s6868_s14 }
  0x2e   : > { %p6705_p10 = scmp.ne.s32.totalorder %s6868_s14, %s6704_s29  ;;  %p6713_p0 = scmp.lt.s32.totalorder %s6704_s29, %s6704_s29 }
  0x30   : > { %p6707_p11 = pnand %p6705_p10, %p6880_p7  ;;  %p6714_p1 = por %p6713_p0, %p6712_p13 }
  0x32   : > { %p6708_p12 = pneg %p6707_p11 }
  0x34   : > { %p6715_p4 = pnand %p6714_p1, %p6708_p12 }
  0x36   : > { %6718 = shalt.err (!%p6715_p4)
}
  0x37   : > { %6073 = dma.hbm_to_vmem [thread:$0]  (!%p6864_p5), %s7522_s1, 13824, %s6868_s14, [#allocation3], %s6766_s16, %s6766_s16, %s6767_s18  }
  0x38   : > { %s6719_s21 = scalar_lea.hbm %s7530_s9, 11520 }
  0x39   : > { %p6720_p2 = scmp.ne.s32.totalorder %s7530_s9, %s6719_s21  ;;  %p6726_p8 = scmp.lt.u32.totalorder %s6719_s21, %s7530_s9 }
  0x3b   : > { %p6722_p3 = pnand %p6720_p2, %p6880_p7 }
  0x3d   : > { %p6723_p6 = pneg %p6722_p3 }
  0x3f   : > { %p6728_p9 = pnand %p6726_p8, %p6723_p6 }
  0x41   : > { %6731 = shalt.err (!%p6728_p9)
}
  0x42   : > { %s6732_s14 = scalar_lea.vmem %s6870_s17, 11520  ;;  %p6740_p13 = scmp.lt.s32.totalorder %s6870_s17, %s6870_s17 }
  0x43   : > { %p6733_p10 = scmp.ne.s32.totalorder %s6870_s17, %s6732_s14  ;;  %p6741_p0 = scmp.lt.s32.totalorder %s6732_s14, %s6732_s14 }
  0x45   : > { %p6735_p11 = pnand %p6733_p10, %p6880_p7  ;;  %p6742_p1 = por %p6741_p0, %p6740_p13 }
  0x47   : > { %p6736_p12 = pneg %p6735_p11 }
  0x49   : > { %p6743_p4 = pnand %p6742_p1, %p6736_p12 }
  0x4b   : > { %6746 = shalt.err (!%p6743_p4)
}
  0x4c   : > { %6079 = dma.hbm_to_vmem [thread:$0]  (!%p6864_p5), %s7530_s9, 11520, %s6870_s17, [#allocation5], %s6766_s16, %s6766_s16, %s6767_s18  }
  0x4d   : > { %p7543_p2 = scmp.ne.s32.totalorder %s7540_s27, 0 }
  0x4e   : > { %p7544_p7 = scmp.eq.s32.totalorder (!%p7543_p2), %s6851_s26, 0 }
  0x4f   : > { %423 = sbr.rel (%p7543_p2) target bundleno = 3089 (0xc11), region = 72 }
  0x56   : > { %6752 = dma.done.wait (%p7544_p7), [#allocation3], 13824   ;;  %p7545_p3 = pmov %p7544_p7 }
  0x58   : > { %6754 = vsyncadd (%p7545_p3), [#allocation3], 4294953472  ;;  %p7546_p6 = pmov %p7545_p3 }
  0x59   : > { %p7547_p8 = pmov %p7545_p3 }
  0x5a   : > { %6756 = dma.done.wait (%p7546_p6), [#allocation5], 26496  }
  0x5b   : > { %6758 = vsyncadd (%p7547_p8), [#allocation5], 4294940800  ;;  %p474_p9 = scmp.lt.s32.totalorder %s6851_s26, 1  ;;  %v6768_v0 = vmov 0   ;;  %s6769_s16 = smov 125   ;;  %vm592_vm1 = vcmask 1044480  }
  0x5c   : > { %631 = vmatprep.mubr.bf16.mxu0 %v6768_v0  ;;  %1903 = vmatprep.mubr.bf16.mxu1 %v6768_v0  ;;  %s6770_s18 = smov 122   ;;  %v6108_v3 = vld [vmem:[#allocation2 + $0x64] ss:$8 sps:$4 sm:$0xff]   ;;  %v6110_v6 = vld [vmem:[#allocation2 + $0x60] ss:$8 sps:$4 sm:$0xff]   ;;  %vm1390_vm2 = vcmask 1046528  }
  0x5d   : > { %s7551_s26 = smov (!%p474_p9, %s6851_s26), 1  ;;  %599 = vmatprep.subr.bf16.mxu0 %v6108_v3  ;;  %v6111_v9 = vld [vmem:[#allocation2 + $0x74] ss:$8 sps:$4 sm:$0xff]   ;;  %v6113_v11 = vld [vmem:[#allocation2 + $0x70] ss:$8 sps:$4 sm:$0xff]   ;;  %vm585_vm3 = vcmask 736256  }
  0x5e   : > { %s5961_s27 = sshll.u32 %s7551_s26, 4  ;;  %600 = vmatpush1.bf16.msra.mxu0 %v6110_v6  ;;  %vm936_vm0 = vsmask.f32 7424  ;;  %v6114_v14 = vld [vmem:[#allocation2 + $0x84] ss:$8 sps:$4 sm:$0xff]   ;;  %vm1860_vm4 = vcmask 244736  }
  0x5f   : > { %s478_s23 = scalar_lea.vmem %s7521_s0, %s5961_s27  ;;  %601 = vmatprep.subr.bf16.mxu0 %v6111_v9  ;;  %v6116_v17 = vld [vmem:[#allocation2 + $0x80] ss:$8 sps:$4 sm:$0xff]   ;;  %v6117_v18 = vld [vmem:[#allocation2 + $0x94] ss:$8 sps:$4 sm:$0xff]   ;;  %v6119_v19 = vld [vmem:[#allocation2 + $0x90] ss:$8 sps:$4 sm:$0xff]  }
  0x60   : > { %v6971_v1 = vld [vmem:[%s478_s23] sm:$0xff]   ;;  %v6973_v2 = vld [vmem:[%s478_s23 + $0x8] sm:$0xff]   ;;  %v6123_v22 = vld [vmem:[#allocation2 + $0xb4] ss:$8 sps:$4 sm:$0x1f]   ;;  %vm2094_vm5 = vcmask 916480  }
  0x61   : > { %523 = vrot.lane.b32.xlu0 %v6971_v1, %s6769_s16  ;;  %788 = vrot.lane.b32.xlu1 %v6971_v1, %s6770_s18  ;;  %v937_v4 = vshrl.u32 %v6971_v1, 16  ;;  %v939_v5 = vshll.u32 %v6971_v1, 16  ;;  %v943_v7 = vshll.u32 %v6973_v2, 16  ;;  %v947_v8 = vshrl.u32 %v6973_v2, 16  ;;  %v6120_v20 = vld [vmem:[#allocation2 + $0xa4] ss:$8 sps:$4 sm:$0xff]  }
  0x62   : > { %602 = vmatpush1.bf16.msra.mxu0 %v6113_v11  ;;  %v6122_v21 = vld [vmem:[#allocation2 + $0xa0] ss:$8 sps:$4 sm:$0xff]   ;;  %v6125_v23 = vld [vmem:[#allocation2 + $0xb0] ss:$8 sps:$4 sm:$0x1f]   ;;  %v1391_v26 = vrot.slane %v6971_v1, 1 }
  0x63   : > { %v941_v10 = vrot.slane %v939_v5, 1  ;;  %v945_v12 = vrot.slane %v943_v7, 1  ;;  %603 = vmatprep.subr.bf16.mxu0 %v6114_v14  ;;  %v594_v24 = vsel %vm592_vm1, %v6125_v23, 0  ;;  %v6128_v25 = vld [vmem:[#allocation2 + $0x4] ss:$8 sps:$4 sm:$0xff]   ;;  %v7003_v27 = vrot.slane %v6973_v2, 1 }
  0x64   : > { %v6126_v29 = vld [vmem:[#allocation2] ss:$8 sps:$4 sm:$0xff]   ;;  %v6131_v30 = vld [vmem:[#allocation2 + $0x14] ss:$8 sps:$4 sm:$0xff]   ;;  %v6129_v32 = vld [vmem:[#allocation2 + $0x10] ss:$8 sps:$4 sm:$0xff]  }
  0x65   : > { %525 = vrot.lane.b32.xlu0 %v6973_v2, %s6769_s16  ;;  %790 = vrot.lane.b32.xlu1 %v6973_v2, %s6770_s18  ;;  %v942_v13 = vor.u32 %v941_v10, %v937_v4  ;;  %v6987_v15 = vor.u32 %v947_v8, %v945_v12  ;;  %v7007_v28 = vsel %vm1390_vm2, %v1391_v26, %v7003_v27  ;;  %v6134_v33 = vld [vmem:[#allocation2 + $0x24] ss:$8 sps:$4 sm:$0xff]   ;;  %v6132_v34 = vld [vmem:[#allocation2 + $0x20] ss:$8 sps:$4 sm:$0xff]   ;;  %v6137_v35 = vld [vmem:[#allocation2 + $0x34] ss:$8 sps:$4 sm:$0xff]  }
  0x66   : > { %604 = vmatpush1.bf16.msra.mxu0 %v6116_v17  ;;  %v6135_v37 = vld [vmem:[#allocation2 + $0x30] ss:$8 sps:$4 sm:$0xff]   ;;  %v6140_v38 = vld [vmem:[#allocation2 + $0x44] ss:$8 sps:$4 sm:$0xff]   ;;  %v6138_v39 = vld [vmem:[#allocation2 + $0x40] ss:$8 sps:$4 sm:$0xff]  }
  0x67   : > { %v6989_v16 = vsel %vm936_vm0, %v942_v13, %v945_v12  ;;  %605 = vmatprep.subr.bf16.mxu0 %v6117_v18  ;;  %v6141_v40 = vld [vmem:[#allocation2 + $0x54] ss:$8 sps:$4 sm:$0x1f]   ;;  %v6143_v41 = vld [vmem:[#allocation2 + $0x50] ss:$8 sps:$4 sm:$0x1f]  }
  0x68   : > { %v717_v42 = vsel %vm592_vm1, %v6143_v41, 0  ;;  %v6146_v43 = vld [vmem:[#allocation2 + $0xc4] ss:$8 sps:$4 sm:$0xff]   ;;  %v6144_v44 = vld [vmem:[#allocation2 + $0xc0] ss:$8 sps:$4 sm:$0xff]   ;;  %vm2403_vm6 = vcmask 1043456  }
  0x69   : > { %1094 = vrot.lane.b32.xlu0 %v6989_v16, %s6769_s16  ;;  %1096 = vrot.lane.b32.xlu1 %v6987_v15, %s6769_s16  ;;  %v6149_v45 = vld [vmem:[#allocation2 + $0xd4] ss:$8 sps:$4 sm:$0xff]   ;;  %v6147_v46 = vld [vmem:[#allocation2 + $0xd0] ss:$8 sps:$4 sm:$0xff]   ;;  %v6152_v47 = vld [vmem:[#allocation2 + $0xe4] ss:$8 sps:$4 sm:$0xff]  }
  0x6a   : > { %606 = vmatpush1.bf16.msra.mxu0 %v6119_v19  ;;  %v6150_v48 = vld [vmem:[#allocation2 + $0xe0] ss:$8 sps:$4 sm:$0xff]   ;;  %v6155_v49 = vld [vmem:[#allocation2 + $0xf4] ss:$8 sps:$4 sm:$0xff]   ;;  %v6153_v50 = vld [vmem:[#allocation2 + $0xf0] ss:$8 sps:$4 sm:$0xff]  }
  0x6b   : > { %607 = vmatprep.subr.bf16.mxu0 %v6120_v20  ;;  %v6158_v51 = vld [vmem:[#allocation2 + $0x104] ss:$8 sps:$4 sm:$0xff]   ;;  %v6159_v52 = vld [vmem:[#allocation2 + $0x114] ss:$8 sps:$4 sm:$0x1f]   ;;  %vm2399_vm7 = vcmask 850944  }
  0x6c   : > { %v6156_v53 = vld [vmem:[#allocation2 + $0x100] ss:$8 sps:$4 sm:$0xff]   ;;  %v6161_v54 = vld [vmem:[#allocation2 + $0x110] ss:$8 sps:$4 sm:$0x1f]   ;;  %vm3559_vm8 = vcmask 1045504  }
  0x6d   : > { %1242 = vrot.lane.b32.xlu0 %v6989_v16, %s6770_s18  ;;  %1244 = vrot.lane.b32.xlu1 %v6987_v15, %s6770_s18  ;;  %v6164_v55 = vld [vmem:[#allocation2 + $0x124] ss:$8 sps:$4 sm:$0xff]   ;;  %v857_v56 = vsel %vm592_vm1, %v6161_v54, 0  ;;  %v6162_v58 = vld [vmem:[#allocation2 + $0x120] ss:$8 sps:$4 sm:$0xff]   ;;  %vm3555_vm9 = vcmask 105472  }
  0x6e   : > { %608 = vmatpush1.bf16.msra.mxu0 %v6122_v21  ;;  %v6167_v59 = vld [vmem:[#allocation2 + $0x134] ss:$8 sps:$4 sm:$0xff]   ;;  %v6165_v60 = vld [vmem:[#allocation2 + $0x130] ss:$8 sps:$4 sm:$0xff]   ;;  %v6170_v61 = vld [vmem:[#allocation2 + $0x144] ss:$8 sps:$4 sm:$0xff]  }
  0x6f   : > { %5421 = vmatprep.subr.msk.bf16.mxu0 %vm592_vm1, %v6123_v22  ;;  %v6168_v62 = vld [vmem:[#allocation2 + $0x140] ss:$8 sps:$4 sm:$0xff]   ;;  %v6173_v63 = vld [vmem:[#allocation2 + $0x154] ss:$8 sps:$4 sm:$0xff]   ;;  %v6176_v4 = vld [vmem:[#allocation2 + $0x164] ss:$8 sps:$4 sm:$0xff]  }
  0x70   : > { %v6179_v3 = vld [vmem:[#allocation2 + $0x170] ss:$8 sps:$4 sm:$0x1f]   ;;  %v6174_v5 = vld [vmem:[#allocation2 + $0x160] ss:$8 sps:$4 sm:$0xff]   ;;  %vm3763_vm10 = vcmask 654336  }
  0x71   : > { %1540 = vrot.lane.b32.xlu1 %v7003_v27, %s6769_s16  ;;  %1538 = vrot.lane.b32.xlu0 %v7007_v28, %s6769_s16  ;;  %v6177_v6 = vld [vmem:[#allocation2 + $0x174] ss:$8 sps:$4 sm:$0x1f]   ;;  %v1015_v7 = vsel %vm592_vm1, %v6179_v3, 0  ;;  %v6182_v8 = vld [vmem:[#allocation2 + $0x184] ss:$8 sps:$4 sm:$0xff]  }
  0x72   : > { %610 = vmatpush1.bf16.msra.mxu0 %v594_v24  ;;  %v6180_v9 = vld [vmem:[#allocation2 + $0x180] ss:$8 sps:$4 sm:$0xff]   ;;  %v6185_v10 = vld [vmem:[#allocation2 + $0x194] ss:$8 sps:$4 sm:$0xff]   ;;  %v6183_v11 = vld [vmem:[#allocation2 + $0x190] ss:$8 sps:$4 sm:$0xff]  }
  0x73   : > { %722 = vmatprep.subr.bf16.mxu0 %v6128_v25  ;;  %v6188_v12 = vld [vmem:[#allocation2 + $0x1a4] ss:$8 sps:$4 sm:$0xff]   ;;  %v6186_v13 = vld [vmem:[#allocation2 + $0x1a0] ss:$8 sps:$4 sm:$0xff]   ;;  %v6191_v14 = vld [vmem:[#allocation2 + $0x1b4] ss:$8 sps:$4 sm:$0xff]  }
  0x74   : > { %v6189_v17 = vld [vmem:[#allocation2 + $0x1b0] ss:$8 sps:$4 sm:$0xff]   ;;  %v6194_v18 = vld [vmem:[#allocation2 + $0x1c4] ss:$8 sps:$4 sm:$0xff]   ;;  %v6203_v24 = vld [vmem:[#allocation2 + $0x1f4] ss:$8 sps:$4 sm:$0xff]  }
  0x75   : > { %1688 = vrot.lane.b32.xlu1 %v7003_v27, %s6770_s18  ;;  %1686 = vrot.lane.b32.xlu0 %v7007_v28, %s6770_s18  ;;  %v6195_v19 = vld [vmem:[#allocation2 + $0x1d4] ss:$8 sps:$4 sm:$0x1f]   ;;  %v6197_v20 = vld [vmem:[#allocation2 + $0x1d0] ss:$8 sps:$4 sm:$0x1f]  }
  0x76   : > { %v1163_v21 = vsel %vm592_vm1, %v6197_v20, 0  ;;  %v6200_v22 = vld [vmem:[#allocation2 + $0x1e4] ss:$8 sps:$4 sm:$0xff]   ;;  %v6201_v25 = vld [vmem:[#allocation2 + $0x1f0] ss:$8 sps:$4 sm:$0xff]   ;;  %s6771_s16 = smov 112  }
  0x77   : > { %v6206_v26 = vld [vmem:[#allocation2 + $0x204] ss:$8 sps:$4 sm:$0xff]   ;;  %v6221_v41 = vld [vmem:[#allocation2 + $0x254] ss:$8 sps:$4 sm:$0xff]   ;;  %v6234_v54 = vld [vmem:[#allocation2 + $0x2a0] ss:$8 sps:$4 sm:$0xff]  }
  0x78   : > { %s6772_s18 = smov 120   ;;  %s6774_s13 = smov 96   ;;  %vm4955_vm11 = vcmask 1041408   ;;  %vm4956_vm12 = vcmask 1042432   ;;  %vm4951_vm13 = vcmask 39936   ;;  %vm5136_vm14 = vcmask 261120  }
  0x79   : > { %s5406_s28 = sshll.u32 %s7551_s26, 1  ;;  %s7548_s29 = sld [smem:[#allocation10_spill]]  ;;  %vm5303_vm15 = vcmask 779264   ;;  %vm5304_vm0 = vsmask.f32 1280 }
  0xd3   : > { %v524_v31 = vpop.permute.xlu0 %523  ;;  %v789_v57 = vpop.permute.xlu1 %788 }
  0xd4   : > { %5422 = vmatmul.mubr.msk.bf16.vlgmr.msra.gmra.mrb[0].mxu0 %vm585_vm3, %v524_v31  ;;  %v6209_v31 = vld [vmem:[#allocation2 + $0x214] ss:$8 sps:$4 sm:$0xff]  }
  0xd5   : > { %723 = vmatpush1.bf16.msra.mxu0 %v6126_v29  ;;  %641 = vmatprep.mubr.bf16.mxu0 %v6768_v0  ;;  %v6204_v29 = vld [vmem:[#allocation2 + $0x200] ss:$8 sps:$4 sm:$0xff]  }
  0xd6   : > { %724 = vmatprep.subr.bf16.mxu0 %v6131_v30 }
  0xd7   : > { %v526_v36 = vpop.permute.xlu0 %525 }
  0xd9   : > { %725 = vmatpush1.bf16.msra.mxu0 %v6129_v32  ;;  %v6207_v32 = vld [vmem:[#allocation2 + $0x210] ss:$8 sps:$4 sm:$0xff]  }
  0xda   : > { %726 = vmatprep.subr.bf16.mxu0 %v6134_v33  ;;  %v6212_v33 = vld [vmem:[#allocation2 + $0x224] ss:$8 sps:$4 sm:$0xff]  }
  0xdb   : > { %v1095_v23 = vpop.permute.xlu0 %1094 }
  0xdc   : > { %5423 = vmatmul.mubr.msk.bf16.gmra.mrb[4].mxu0 %vm585_vm3, %v526_v36  ;;  %v6215_v36 = vld [vmem:[#allocation2 + $0x230] ss:$8 sps:$4 sm:$0x1f]  }
  0xdd   : > { %727 = vmatpush1.bf16.msra.mxu0 %v6132_v34  ;;  %754 = vmatprep.mubr.bf16.mxu0 %v6768_v0  ;;  %v6210_v34 = vld [vmem:[#allocation2 + $0x220] ss:$8 sps:$4 sm:$0xff]  }
  0xde   : > { %728 = vmatprep.subr.bf16.mxu0 %v6137_v35  ;;  %v6213_v35 = vld [vmem:[#allocation2 + $0x234] ss:$8 sps:$4 sm:$0x1f]  }
  0xe1   : > { %729 = vmatpush1.bf16.msra.mxu0 %v6135_v37  ;;  %v1311_v37 = vsel %vm592_vm1, %v6215_v36, 0 }
  0xe2   : > { %730 = vmatprep.subr.bf16.mxu0 %v6140_v38  ;;  %v6218_v38 = vld [vmem:[#allocation2 + $0x244] ss:$8 sps:$4 sm:$0xff]  }
  0xe5   : > { %731 = vmatpush1.bf16.msra.mxu0 %v6138_v39  ;;  %v1243_v39 = vpop.permute.xlu0 %1242 }
  0xe6   : > { %5436 = vmatprep.subr.msk.bf16.mxu0 %vm592_vm1, %v6141_v40  ;;  %v6216_v40 = vld [vmem:[#allocation2 + $0x240] ss:$8 sps:$4 sm:$0xff]  }
  0xe9   : > { %733 = vmatpush1.bf16.msra.mxu0 %v717_v42  ;;  %v6219_v42 = vld [vmem:[#allocation2 + $0x250] ss:$8 sps:$4 sm:$0xff]   ;;  %v1539_v3 = vpop.permute.xlu0 %1538 }
  0xea   : > { %862 = vmatprep.subr.bf16.mxu0 %v6146_v43  ;;  %v6224_v43 = vld [vmem:[#allocation2 + $0x264] ss:$8 sps:$4 sm:$0xff]  }
  0xec   : > { %5437 = vmatmul.mubr.msk.bf16.vlgmr.msra.gmra.mrb[0].mxu0 %vm585_vm3, %v6971_v1  ;;  %v791_v1 = vpop.permute.xlu1 %790 }
  0xed   : > { %863 = vmatpush1.bf16.msra.mxu0 %v6144_v44  ;;  %764 = vmatprep.mubr.bf16.mxu0 %v6768_v0  ;;  %v6222_v44 = vld [vmem:[#allocation2 + $0x260] ss:$8 sps:$4 sm:$0xff]  }
  0xee   : > { %864 = vmatprep.subr.bf16.mxu0 %v6149_v45 }
  0xf0   : > { %v1097_v30 = vpop.permute.xlu1 %1096 }
  0xf1   : > { %865 = vmatpush1.bf16.msra.mxu0 %v6147_v46  ;;  %v6227_v46 = vld [vmem:[#allocation2 + $0x274] ss:$8 sps:$4 sm:$0xff]  }
  0xf2   : > { %866 = vmatprep.subr.bf16.mxu0 %v6152_v47  ;;  %v6225_v47 = vld [vmem:[#allocation2 + $0x270] ss:$8 sps:$4 sm:$0xff]  }
  0xf4   : > { %5438 = vmatmul.mubr.msk.bf16.gmra.mrb[4].mxu0 %vm585_vm3, %v6973_v2  ;;  %v6171_v2 = vld [vmem:[#allocation2 + $0x150] ss:$8 sps:$4 sm:$0xff]   ;;  %v1245_v45 = vpop.permute.xlu1 %1244 }
  0xf5   : > { %867 = vmatpush1.bf16.msra.mxu0 %v6150_v48  ;;  %894 = vmatprep.mubr.bf16.mxu0 %v6768_v0  ;;  %v6230_v48 = vld [vmem:[#allocation2 + $0x284] ss:$8 sps:$4 sm:$0xff]  }
  0xf6   : > { %868 = vmatprep.subr.bf16.mxu0 %v6155_v49  ;;  %v6228_v49 = vld [vmem:[#allocation2 + $0x280] ss:$8 sps:$4 sm:$0xff]  }
  0xf9   : > { %869 = vmatpush1.bf16.msra.mxu0 %v6153_v50  ;;  %v6231_v50 = vld [vmem:[#allocation2 + $0x294] ss:$8 sps:$4 sm:$0x1f]  }
  0xfa   : > { %870 = vmatprep.subr.bf16.mxu0 %v6158_v51  ;;  %v6233_v51 = vld [vmem:[#allocation2 + $0x290] ss:$8 sps:$4 sm:$0x1f]  }
  0xfd   : > { %871 = vmatpush1.bf16.msra.mxu0 %v6156_v53  ;;  %v6236_v53 = vld [vmem:[#allocation2 + $0x2a4] ss:$8 sps:$4 sm:$0xff]  }
  0xfe   : > { %5451 = vmatprep.subr.msk.bf16.mxu0 %vm592_vm1, %v6159_v52  ;;  %v1459_v52 = vsel %vm592_vm1, %v6233_v51, 0 }
 0x101   : > { %873 = vmatpush1.bf16.msra.mxu0 %v857_v56  ;;  %v6237_v56 = vld [vmem:[#allocation2 + $0x2b0] ss:$8 sps:$4 sm:$0xff]  }
 0x102   : > { %1020 = vmatprep.subr.bf16.mxu0 %v6164_v55  ;;  %v6239_v55 = vld [vmem:[#allocation2 + $0x2b4] ss:$8 sps:$4 sm:$0xff]  }
 0x104   : > { %5452 = vmatmul.mubr.msk.bf16.vlgmr.msra.gmra.mrb[0].mxu0 %vm585_vm3, %v789_v57  ;;  %v6242_v57 = vld [vmem:[#allocation2 + $0x2c4] ss:$8 sps:$4 sm:$0xff]  }
 0x105   : > { %1021 = vmatpush1.bf16.msra.mxu0 %v6162_v58  ;;  %904 = vmatprep.mubr.bf16.mxu0 %v6768_v0  ;;  %v6240_v58 = vld [vmem:[#allocation2 + $0x2c0] ss:$8 sps:$4 sm:$0xff]  }
 0x106   : > { %1022 = vmatprep.subr.bf16.mxu0 %v6167_v59  ;;  %v6245_v59 = vld [vmem:[#allocation2 + $0x2d4] ss:$8 sps:$4 sm:$0xff]  }
 0x109   : > { %1023 = vmatpush1.bf16.msra.mxu0 %v6165_v60  ;;  %v6243_v60 = vld [vmem:[#allocation2 + $0x2d0] ss:$8 sps:$4 sm:$0xff]  }
 0x10a   : > { %1024 = vmatprep.subr.bf16.mxu0 %v6170_v61  ;;  %v6248_v61 = vld [vmem:[#allocation2 + $0x2e4] ss:$8 sps:$4 sm:$0xff]  }
 0x10c   : > { %5453 = vmatmul.mubr.msk.bf16.gmra.mrb[4].mxu0 %vm585_vm3, %v791_v1 }
 0x10d   : > { %1025 = vmatpush1.bf16.msra.mxu0 %v6168_v62  ;;  %1052 = vmatprep.mubr.bf16.mxu0 %v6768_v0  ;;  %v6249_v62 = vld [vmem:[#allocation2 + $0x2f4] ss:$8 sps:$4 sm:$0x1f]  }
 0x10e   : > { %1026 = vmatprep.subr.bf16.mxu0 %v6173_v63  ;;  %v6251_v63 = vld [vmem:[#allocation2 + $0x2f0] ss:$8 sps:$4 sm:$0x1f]  }
 0x10f   : > { %v1607_v1 = vsel %vm592_vm1, %v6251_v63, 0  ;;  %v6278_v63 = vld [vmem:[%s7525_s4 + $0x30] sm:$0xff]  }
 0x111   : > { %1027 = vmatpush1.bf16.msra.mxu0 %v6171_v2  ;;  %v6254_v2 = vld [vmem:[#allocation2 + $0x304] ss:$8 sps:$4 sm:$0xff]  }
 0x112   : > { %1028 = vmatprep.subr.bf16.mxu0 %v6176_v4  ;;  %v6257_v4 = vld [vmem:[#allocation2 + $0x314] ss:$8 sps:$4 sm:$0xff]  }
 0x115   : > { %1029 = vmatpush1.bf16.msra.mxu0 %v6174_v5  ;;  %v6255_v5 = vld [vmem:[#allocation2 + $0x310] ss:$8 sps:$4 sm:$0xff]  }
 0x116   : > { %5466 = vmatprep.subr.msk.bf16.mxu0 %vm592_vm1, %v6177_v6  ;;  %v6260_v6 = vld [vmem:[#allocation2 + $0x324] ss:$8 sps:$4 sm:$0xff]  }
 0x119   : > { %1031 = vmatpush1.bf16.msra.mxu0 %v1015_v7  ;;  %v6258_v7 = vld [vmem:[#allocation2 + $0x320] ss:$8 sps:$4 sm:$0xff]  }
 0x11a   : > { %1168 = vmatprep.subr.bf16.mxu0 %v6182_v8  ;;  %v1541_v8 = vpop.permute.xlu1 %1540 }
 0x11c   : > { %5467 = vmatmul.mubr.msk.bf16.vlgmr.msra.gmra.mrb[0].mxu0 %vm585_vm3, %v6989_v16  ;;  %v6192_v16 = vld [vmem:[#allocation2 + $0x1c0] ss:$8 sps:$4 sm:$0xff]  }
 0x11d   : > { %1169 = vmatpush1.bf16.msra.mxu0 %v6180_v9  ;;  %1062 = vmatprep.mubr.bf16.mxu0 %v6768_v0  ;;  %v6263_v9 = vld [vmem:[#allocation2 + $0x334] ss:$8 sps:$4 sm:$0xff]  }
 0x11e   : > { %1170 = vmatprep.subr.bf16.mxu0 %v6185_v10  ;;  %v6261_v10 = vld [vmem:[#allocation2 + $0x330] ss:$8 sps:$4 sm:$0xff]  }
 0x121   : > { %1171 = vmatpush1.bf16.msra.mxu0 %v6183_v11  ;;  %v6266_v11 = vld [vmem:[#allocation2 + $0x344] ss:$8 sps:$4 sm:$0xff]  }
 0x122   : > { %1172 = vmatprep.subr.bf16.mxu0 %v6188_v12  ;;  %v6264_v12 = vld [vmem:[#allocation2 + $0x340] ss:$8 sps:$4 sm:$0xff]  }
 0x124   : > { %5468 = vmatmul.mubr.msk.bf16.gmra.mrb[4].mxu0 %vm585_vm3, %v6987_v15  ;;  %v6198_v15 = vld [vmem:[#allocation2 + $0x1e0] ss:$8 sps:$4 sm:$0xff]  }
 0x125   : > { %1173 = vmatpush1.bf16.msra.mxu0 %v6186_v13  ;;  %1200 = vmatprep.mubr.bf16.mxu0 %v6768_v0  ;;  %v6267_v13 = vld [vmem:[#allocation2 + $0x354] ss:$8 sps:$4 sm:$0x1f]  }
 0x126   : > { %1174 = vmatprep.subr.bf16.mxu0 %v6191_v14  ;;  %v6269_v14 = vld [vmem:[#allocation2 + $0x350] ss:$8 sps:$4 sm:$0x1f]  }
 0x129   : > { %1175 = vmatpush1.bf16.msra.mxu0 %v6189_v17  ;;  %v1755_v17 = vsel %vm592_vm1, %v6269_v14, 0 }
 0x12a   : > { %1176 = vmatprep.subr.bf16.mxu0 %v6194_v18  ;;  %v1687_v18 = vpop.permute.xlu0 %1686 }
 0x12d   : > { %1177 = vmatpush1.bf16.msra.mxu0 %v6192_v16  ;;  %v1689_v16 = vpop.permute.xlu1 %1688 }
 0x12e   : > { %5481 = vmatprep.subr.msk.bf16.mxu0 %vm592_vm1, %v6195_v19  ;;  %v1823_v19 = vlaneseq }
 0x130   : > { %v1824_v20 = vshrl.u32 %v1823_v19, 7 }
 0x131   : > { %1179 = vmatpush1.bf16.msra.mxu0 %v1163_v21 }
 0x132   : > { %1316 = vmatprep.subr.bf16.mxu0 %v6200_v22  ;;  %v7075_v21 = vsub.s32 0, %v1824_v20  ;;  %v1821_v22 = vld [vmem:[%s7523_s2] sm:$0x3] }
 0x134   : > { %5482 = vmatmul.mubr.msk.bf16.vlgmr.msra.gmra.mrb[0].mxu0 %vm585_vm3, %v1095_v23  ;;  %v7080_v23 = vsub.s32 1, %v1824_v20 }
 0x135   : > { %1317 = vmatpush1.bf16.msra.mxu0 %v6198_v15  ;;  %1210 = vmatprep.mubr.bf16.mxu0 %v6768_v0  ;;  %v1826_v15 = vrot.slane %v1821_v22, %v7075_v21 }
 0x136   : > { %1318 = vmatprep.subr.bf16.mxu0 %v6203_v24  ;;  %v1830_v24 = vrot.slane %v1821_v22, %v7080_v23 }
 0x139   : > { %1319 = vmatpush1.bf16.msra.mxu0 %v6201_v25 }
 0x13a   : > { %1320 = vmatprep.subr.bf16.mxu0 %v6206_v26 }
 0x13c   : > { %5483 = vmatmul.mubr.msk.bf16.gmra.mrb[4].mxu0 %vm585_vm3, %v1097_v30 }
 0x13d   : > { %1321 = vmatpush1.bf16.msra.mxu0 %v6204_v29  ;;  %1348 = vmatprep.mubr.bf16.mxu0 %v6768_v0 }
 0x13e   : > { %1322 = vmatprep.subr.bf16.mxu0 %v6209_v31 }
 0x141   : > { %1323 = vmatpush1.bf16.msra.mxu0 %v6207_v32 }
 0x142   : > { %1324 = vmatprep.subr.bf16.mxu0 %v6212_v33 }
 0x145   : > { %1325 = vmatpush1.bf16.msra.mxu0 %v6210_v34 }
 0x146   : > { %5496 = vmatprep.subr.msk.bf16.mxu0 %vm592_vm1, %v6213_v35 }
 0x149   : > { %1327 = vmatpush1.bf16.msra.mxu0 %v1311_v37 }
 0x14a   : > { %1464 = vmatprep.subr.bf16.mxu0 %v6218_v38 }
 0x14c   : > { %5497 = vmatmul.mubr.msk.bf16.vlgmr.msra.gmra.mrb[0].mxu0 %vm585_vm3, %v1243_v39 }
 0x14d   : > { %1465 = vmatpush1.bf16.msra.mxu0 %v6216_v40  ;;  %1358 = vmatprep.mubr.bf16.mxu0 %v6768_v0 }
 0x14e   : > { %1466 = vmatprep.subr.bf16.mxu0 %v6221_v41 }
 0x151   : > { %1467 = vmatpush1.bf16.msra.mxu0 %v6219_v42 }
 0x152   : > { %1468 = vmatprep.subr.bf16.mxu0 %v6224_v43 }
 0x154   : > { %5498 = vmatmul.mubr.msk.bf16.gmra.mrb[4].mxu0 %vm585_vm3, %v1245_v45 }
 0x155   : > { %1469 = vmatpush1.bf16.msra.mxu0 %v6222_v44  ;;  %1496 = vmatprep.mubr.bf16.mxu0 %v6768_v0 }
 0x156   : > { %1470 = vmatprep.subr.bf16.mxu0 %v6227_v46 }
 0x159   : > { %1471 = vmatpush1.bf16.msra.mxu0 %v6225_v47 }
 0x15a   : > { %1472 = vmatprep.subr.bf16.mxu0 %v6230_v48 }
 0x15d   : > { %1473 = vmatpush1.bf16.msra.mxu0 %v6228_v49 }
 0x15e   : > { %5511 = vmatprep.subr.msk.bf16.mxu0 %vm592_vm1, %v6231_v50 }
 0x161   : > { %1475 = vmatpush1.bf16.msra.mxu0 %v1459_v52 }
 0x162   : > { %1612 = vmatprep.subr.bf16.mxu0 %v6236_v53 }
 0x164   : > { %5512 = vmatmul.mubr.msk.bf16.vlgmr.msra.gmra.mrb[0].mxu0 %vm585_vm3, %v7007_v28  ;;  %v6246_v28 = vld [vmem:[#allocation2 + $0x2e0] ss:$8 sps:$4 sm:$0xff]  }
 0x165   : > { %1613 = vmatpush1.bf16.msra.mxu0 %v6234_v54  ;;  %1506 = vmatprep.mubr.bf16.mxu0 %v6768_v0 }
 0x166   : > { %1614 = vmatprep.subr.bf16.mxu0 %v6239_v55 }
 0x169   : > { %1615 = vmatpush1.bf16.msra.mxu0 %v6237_v56  ;;  %v6270_v56 = vld [vmem:[%s7524_s3] sm:$0xff]  }
 0x16a   : > { %1616 = vmatprep.subr.bf16.mxu0 %v6242_v57  ;;  %v6271_v57 = vld [vmem:[%s7524_s3 + $0x8] sm:$0xff]  }
 0x16c   : > { %5513 = vmatmul.mubr.msk.bf16.gmra.mrb[4].mxu0 %vm585_vm3, %v7003_v27  ;;  %v6252_v27 = vld [vmem:[#allocation2 + $0x300] ss:$8 sps:$4 sm:$0xff]  }
 0x16d   : > { %1617 = vmatpush1.bf16.msra.mxu0 %v6240_v58  ;;  %1644 = vmatprep.mubr.bf16.mxu0 %v6768_v0  ;;  %v6272_v58 = vld [vmem:[%s7525_s4] sm:$0xff]  }
 0x16e   : > { %1618 = vmatprep.subr.bf16.mxu0 %v6245_v59  ;;  %v6273_v59 = vld [vmem:[%s7525_s4 + $0x8] sm:$0xff]  }
 0x171   : > { %1619 = vmatpush1.bf16.msra.mxu0 %v6243_v60  ;;  %v6274_v60 = vld [vmem:[%s7525_s4 + $0x10] sm:$0xff]  }
 0x172   : > { %1620 = vmatprep.subr.bf16.mxu0 %v6248_v61  ;;  %v6275_v61 = vld [vmem:[%s7525_s4 + $0x18] sm:$0xff]  }
 0x175   : > { %1621 = vmatpush1.bf16.msra.mxu0 %v6246_v28  ;;  %v6276_v28 = vld [vmem:[%s7525_s4 + $0x20] sm:$0xff]  }
 0x176   : > { %5526 = vmatprep.subr.msk.bf16.mxu0 %vm592_vm1, %v6249_v62  ;;  %v6277_v62 = vld [vmem:[%s7525_s4 + $0x28] sm:$0xff]  }
 0x179   : > { %1623 = vmatpush1.bf16.msra.mxu0 %v1607_v1  ;;  %v6279_v1 = vld [vmem:[%s7525_s4 + $0x38] sm:$0xff]  }
 0x17a   : > { %1760 = vmatprep.subr.bf16.mxu0 %v6254_v2  ;;  %v6280_v2 = vld [vmem:[%s7525_s4 + $0x40] sm:$0xff]  }
 0x17c   : > { %5527 = vmatmul.mubr.msk.bf16.vlgmr.msra.gmra.mrb[0].mxu0 %vm585_vm3, %v1539_v3  ;;  %v6281_v3 = vld [vmem:[%s7525_s4 + $0x48] sm:$0xff]  }
 0x17d   : > { %1761 = vmatpush1.bf16.msra.mxu0 %v6252_v27  ;;  %1654 = vmatprep.mubr.bf16.mxu0 %v6768_v0  ;;  %v6282_v27 = vld [vmem:[%s7525_s4 + $0x50] sm:$0xff]  }
 0x17e   : > { %1762 = vmatprep.subr.bf16.mxu0 %v6257_v4  ;;  %v6283_v4 = vld [vmem:[%s7525_s4 + $0x58] sm:$0xff]  }
 0x181   : > { %1763 = vmatpush1.bf16.msra.mxu0 %v6255_v5  ;;  %v6284_v5 = vld [vmem:[%s7525_s4 + $0x60] sm:$0xff]  }
 0x182   : > { %1764 = vmatprep.subr.bf16.mxu0 %v6260_v6  ;;  %v6285_v6 = vld [vmem:[%s7525_s4 + $0x68] sm:$0xff]  }
 0x184   : > { %5528 = vmatmul.mubr.msk.bf16.gmra.mrb[4].mxu0 %vm585_vm3, %v1541_v8 }
 0x185   : > { %1765 = vmatpush1.bf16.msra.mxu0 %v6258_v7  ;;  %1792 = vmatprep.mubr.bf16.mxu0 %v6768_v0  ;;  %v6286_v7 = vld [vmem:[%s7525_s4 + $0x70] sm:$0xff]  }
 0x186   : > { %1766 = vmatprep.subr.bf16.mxu0 %v6263_v9 }
 0x189   : > { %1767 = vmatpush1.bf16.msra.mxu0 %v6261_v10 }
 0x18a   : > { %1768 = vmatprep.subr.bf16.mxu0 %v6266_v11 }
 0x18d   : > { %1769 = vmatpush1.bf16.msra.mxu0 %v6264_v12 }
 0x18e   : > { %5541 = vmatprep.subr.msk.bf16.mxu0 %vm592_vm1, %v6267_v13  ;;  %vm5305_vm1 = vmand %vm5303_vm15, %vm5304_vm0 }
 0x191   : > { %1771 = vmatpush1.bf16.msra.mxu0 %v1755_v17 }
 0x194   : > { %5542 = vmatmul.mubr.msk.bf16.vlgmr.msra.gmra.mrb[0].mxu0 %vm585_vm3, %v1687_v18 }
 0x195   : > { %1802 = vmatprep.mubr.bf16.mxu0 %v6768_v0 }
 0x19c   : > { %5543 = vmatmul.mubr.msk.bf16.gmra.mrb[4].mxu0 %vm585_vm3, %v1689_v16 }
 0x19d   : > { %3600 = vmatprep.mubr.bf16.mxu0 %v6768_v0 }
 0x267   : > { %v1794_v25 = vpop.f32.mrb[0].mxu0 }
 0x268   : > { %v1833_v26 = vadd.f32 %v1826_v15, %v1794_v25  ;;  %v1796_v29 = vpop.f32.mrb[1].mxu0  ;;  %v6288_v25 = vld [vmem:[%s7525_s4 + $0x80] sm:$0xff]  }
 0x269   : > { %v1834_v30 = vadd.f32 %v1830_v24, %v1796_v29  ;;  %v1798_v31 = vpop.f32.mrb[2].mxu0  ;;  %v6290_v29 = vld [vmem:[%s7525_s4 + $0x90] sm:$0xff]  }
 0x26a   : > { %v1835_v32 = vadd.f32 %v1826_v15, %v1798_v31  ;;  %v1800_v33 = vpop.f32.mrb[3].mxu0  ;;  %v1841_v35 = vmax.f32 %v1833_v26, 0.0  ;;  %v6289_v26 = vld [vmem:[%s7525_s4 + $0x88] sm:$0xff]   ;;  %v6292_v31 = vld [vmem:[%s7525_s4 + $0xa0] sm:$0xff]  }
 0x26b   : > { %v1836_v34 = vadd.f32 %v1830_v24, %v1800_v33  ;;  %v1842_v37 = vmax.f32 %v1834_v30, 0.0  ;;  %v6291_v30 = vld [vmem:[%s7525_s4 + $0x98] sm:$0xff]   ;;  %v6294_v33 = vld [vmem:[%s7525_s4 + $0xb0] sm:$0xff]  }
 0x26c   : > { %v1843_v36 = vmax.f32 %v1835_v32, 0.0  ;;  %v6293_v32 = vld [vmem:[%s7525_s4 + $0xa8] sm:$0xff]  }
 0x26d   : > { %v1844_v38 = vmax.f32 %v1836_v34, 0.0  ;;  %v6295_v34 = vld [vmem:[%s7525_s4 + $0xb8] sm:$0xff]  }
 0x26e   : > { %v1849_v39 = vpack.c.bf16 %v1843_v36, %v1841_v35  ;;  %v6296_v35 = vld [vmem:[%s7525_s4 + $0xc0] sm:$0xff]   ;;  %v6297_v36 = vld [vmem:[%s7525_s4 + $0xc8] sm:$0xff]  }
 0x26f   : > { %v1804_v40 = vpop.f32.mrb[4].mxu0  ;;  %v1850_v41 = vpack.c.bf16 %v1844_v38, %v1842_v37  ;;  %v6298_v37 = vld [vmem:[%s7525_s4 + $0xd0] sm:$0xff]   ;;  %v6299_v38 = vld [vmem:[%s7525_s4 + $0xd8] sm:$0xff]  }
 0x270   : > { %v1837_v42 = vadd.f32 %v1826_v15, %v1804_v40  ;;  %v1806_v43 = vpop.f32.mrb[5].mxu0  ;;  %v6301_v40 = vld [vmem:[%s7525_s4 + $0xe8] sm:$0xff]  }
 0x271   : > { %v1838_v44 = vadd.f32 %v1830_v24, %v1806_v43  ;;  %v1808_v45 = vpop.f32.mrb[6].mxu0  ;;  %1871 = vmatprep.subr.bf16.mxu1 %v1850_v41  ;;  %v6307_v43 = vld [vmem:[#allocation4 + $0x7c] ss:$8 sps:$4 sm:$0xff]  }
 0x272   : > { %v1839_v46 = vadd.f32 %v1826_v15, %v1808_v45  ;;  %v1810_v47 = vpop.f32.mrb[7].mxu0  ;;  %1872 = vmatpush1.bf16.msra.mxu1 %v1849_v39  ;;  %v1845_v49 = vmax.f32 %v1837_v42, 0.0  ;;  %v6304_v42 = vld [vmem:[#allocation4 + $0x6c] ss:$8 sps:$4 sm:$0xff]  }
 0x273   : > { %v1840_v48 = vadd.f32 %v1830_v24, %v1810_v47  ;;  %v1846_v51 = vmax.f32 %v1838_v44, 0.0  ;;  %v6287_v24 = vld [vmem:[%s7525_s4 + $0x78] sm:$0xff]   ;;  %v6310_v45 = vld [vmem:[#allocation4 + $0x8c] ss:$8 sps:$4 sm:$0xff]  }
 0x274   : > { %v1847_v50 = vmax.f32 %v1839_v46, 0.0  ;;  %v6305_v44 = vld [vmem:[#allocation4 + $0x78] ss:$8 sps:$4 sm:$0xff]   ;;  %v6308_v46 = vld [vmem:[#allocation4 + $0x88] ss:$8 sps:$4 sm:$0xff]  }
 0x275   : > { %v1848_v52 = vmax.f32 %v1840_v48, 0.0  ;;  %v6313_v47 = vld [vmem:[#allocation4 + $0x9c] ss:$8 sps:$4 sm:$0xff]   ;;  %v6311_v48 = vld [vmem:[#allocation4 + $0x98] ss:$8 sps:$4 sm:$0xff]  }
 0x276   : > { %v1851_v53 = vpack.c.bf16 %v1847_v50, %v1845_v49  ;;  %v6316_v49 = vld [vmem:[#allocation4 + $0xac] ss:$8 sps:$4 sm:$0xff]   ;;  %v6314_v50 = vld [vmem:[#allocation4 + $0xa8] ss:$8 sps:$4 sm:$0xff]  }
 0x277   : > { %v1852_v54 = vpack.c.bf16 %v1848_v52, %v1846_v51  ;;  %v6319_v51 = vld [vmem:[#allocation4 + $0xbc] ss:$8 sps:$4 sm:$0xff]   ;;  %v2330_v52 = vld [vmem:[#allocation4 + $0xc8] sm:$0xff] }
 0x278   : > { %v1866_v55 = vsel %vm1390_vm2, %v1851_v53, 0  ;;  %v6317_v53 = vld [vmem:[#allocation4 + $0xb8] ss:$8 sps:$4 sm:$0xff]  }
 0x279   : > { %5545 = vmatprep.subr.msk.bf16.mxu1 %vm1390_vm2, %v1852_v54 }
 0x27a   : > { %1874 = vmatpush1.bf16.msra.mxu1 %v1866_v55 }
 0x27b   : > { %1925 = vmatprep.subr.bf16.mxu1 %v1850_v41  ;;  %v6302_v41 = vld [vmem:[#allocation4 + $0x68] ss:$8 sps:$4 sm:$0xff]  }
 0x27d   : > { %5546 = vmatmul.mubr.msk.bf16.vlgmr.msra.gmra.mrb[0].mxu1 %vm1860_vm4, %v6270_v56 }
 0x27e   : > { %1926 = vmatpush1.bf16.msra.mxu1 %v1849_v39  ;;  %1957 = vmatprep.mubr.bf16.mxu1 %v6768_v0  ;;  %v6300_v39 = vld [vmem:[%s7525_s4 + $0xe0] sm:$0xff]  }
 0x27f   : > { %5550 = vmatprep.subr.msk.bf16.mxu1 %vm1390_vm2, %v1852_v54  ;;  %v5627_v54 = vcombine.high %v2330_v52, %v2330_v52 }
 0x282   : > { %1928 = vmatpush1.bf16.msra.mxu1 %v1866_v55  ;;  %v5626_v55 = vcombine.low %v2330_v52, %v2330_v52  ;;  %v6373_v52 = vld [vmem:[#allocation4 + $0x16c] ss:$8 sps:$4 sm:$0xff]  }
 0x283   : > { %2098 = vmatprep.subr.bf16.mxu1 %v6768_v0 }
 0x284   : > { %v2405_v56 = vsel %vm2403_vm6, %v5626_v55, 0  ;;  %v6374_v55 = vld [vmem:[#allocation4 + $0x178] ss:$8 sps:$4 sm:$0xff]  }
 0x285   : > { %5551 = vmatmul.mubr.msk.bf16.vlgmr.msra.gmra.mrb[4].mxu1 %vm1860_vm4, %v6271_v57  ;;  %v6324_v57 = vld [vmem:[#allocation4 + $0x4] ss:$8 sps:$4 sm:$0xff]  }
 0x286   : > { %2099 = vmatpush1.bf16.msra.mxu1 %v6272_v58 }
 0x287   : > { %2100 = vmatprep.subr.bf16.mxu1 %v6768_v0 }
 0x28a   : > { %2101 = vmatpush1.bf16.msra.mxu1 %v6273_v59 }
 0x28b   : > { %2102 = vmatprep.subr.bf16.mxu1 %v6768_v0 }
 0x28e   : > { %2103 = vmatpush1.bf16.msra.mxu1 %v6274_v60 }
 0x28f   : > { %2104 = vmatprep.subr.bf16.mxu1 %v6768_v0 }
 0x292   : > { %2105 = vmatpush1.bf16.msra.mxu1 %v6275_v61 }
 0x293   : > { %2106 = vmatprep.subr.bf16.mxu1 %v6768_v0 }
 0x296   : > { %2107 = vmatpush1.bf16.msra.mxu1 %v6276_v28 }
 0x297   : > { %2108 = vmatprep.subr.bf16.mxu1 %v6768_v0 }
 0x29a   : > { %2109 = vmatpush1.bf16.msra.mxu1 %v6277_v62 }
 0x29b   : > { %2110 = vmatprep.subr.bf16.mxu1 %v6768_v0 }
 0x29e   : > { %2111 = vmatpush1.bf16.msra.mxu1 %v6278_v63 }
 0x29f   : > { %2112 = vmatprep.subr.bf16.mxu1 %v6768_v0 }
 0x2a2   : > { %2113 = vmatpush1.bf16.msra.mxu1 %v6279_v1 }
 0x2a3   : > { %2114 = vmatprep.subr.bf16.mxu1 %v6768_v0 }
 0x2a6   : > { %2115 = vmatpush1.bf16.msra.mxu1 %v6280_v2 }
 0x2a7   : > { %2116 = vmatprep.subr.bf16.mxu1 %v6768_v0 }
 0x2aa   : > { %2117 = vmatpush1.bf16.msra.mxu1 %v6281_v3 }
 0x2ab   : > { %2118 = vmatprep.subr.bf16.mxu1 %v6768_v0 }
 0x2ae   : > { %2119 = vmatpush1.bf16.msra.mxu1 %v6282_v27 }
 0x2af   : > { %2120 = vmatprep.subr.bf16.mxu1 %v6768_v0 }
 0x2b2   : > { %2121 = vmatpush1.bf16.msra.mxu1 %v6283_v4 }
 0x2b3   : > { %2122 = vmatprep.subr.bf16.mxu1 %v6768_v0 }
 0x2b6   : > { %2123 = vmatpush1.bf16.msra.mxu1 %v6284_v5 }
 0x2b7   : > { %2124 = vmatprep.subr.bf16.mxu1 %v6768_v0 }
 0x2ba   : > { %2125 = vmatpush1.bf16.msra.mxu1 %v6285_v6 }
 0x2bb   : > { %2126 = vmatprep.subr.bf16.mxu1 %v6768_v0 }
 0x2be   : > { %2127 = vmatpush1.bf16.msra.mxu1 %v6286_v7 }
 0x2bf   : > { %2260 = vmatprep.subr.bf16.mxu1 %v6768_v0 }
 0x350   : > { %v1905_v8 = vpop.f32.mrb[0].mxu1 }
 0x351   : > { %v1907_v9 = vpop.f32.mrb[1].mxu1 }
 0x352   : > { %v1909_v10 = vpop.f32.mrb[2].mxu1 }
 0x353   : > { %v1911_v11 = vpop.f32.mrb[3].mxu1 }
 0x358   : > { %v1959_v12 = vpop.f32.mrb[4].mxu1 }
 0x359   : > { %v1968_v13 = vmax.f32 %v1905_v8, %v1959_v12  ;;  %v1961_v14 = vpop.f32.mrb[5].mxu1  ;;  %v6325_v12 = vld [vmem:[#allocation4 + $0x10] ss:$8 sps:$4 sm:$0xff]  }
 0x35a   : > { %v1969_v17 = vmax.f32 %v1907_v9, %v1961_v14  ;;  %v1963_v18 = vpop.f32.mrb[6].mxu1  ;;  %v6322_v9 = vld [vmem:[#allocation4] ss:$8 sps:$4 sm:$0xff]  }
 0x35b   : > { %v1970_v16 = vmax.f32 %v1909_v10, %v1963_v18  ;;  %v1965_v19 = vpop.f32.mrb[7].mxu1  ;;  %v6327_v10 = vld [vmem:[#allocation4 + $0x14] ss:$8 sps:$4 sm:$0xff]   ;;  %v6328_v14 = vld [vmem:[#allocation4 + $0x20] ss:$8 sps:$4 sm:$0xff]  }
 0x35c   : > { %v1971_v20 = vmax.f32 %v1911_v11, %v1965_v19  ;;  %v6331_v18 = vld [vmem:[#allocation4 + $0x30] ss:$8 sps:$4 sm:$0xff]   ;;  %v6334_v19 = vld [vmem:[#allocation4 + $0x40] ss:$8 sps:$4 sm:$0xff]  }
 0x35d   : > { %v1972_v22 = vpack.c.bf16 %v1970_v16, %v1968_v13  ;;  %v6330_v13 = vld [vmem:[#allocation4 + $0x24] ss:$8 sps:$4 sm:$0xff]  }
 0x35e   : > { %v1973_v15 = vpack.c.bf16 %v1971_v20, %v1969_v17  ;;  %v6333_v17 = vld [vmem:[#allocation4 + $0x34] ss:$8 sps:$4 sm:$0xff]   ;;  %v6336_v16 = vld [vmem:[#allocation4 + $0x44] ss:$8 sps:$4 sm:$0xff]  }
 0x35f   : > { %v6339_v20 = vld [vmem:[#allocation4 + $0x54] ss:$8 sps:$4 sm:$0xff]  }
 0x360   : > { %5567 = vmatprep.mubr.msk.bf16.mxu1 %vm2094_vm5, %v1973_v15 }
 0x361   : > { %2131 = vmatmul.mubr.bf16.vlgmr.msra.gmra.mrb[8].mxu1 %v1972_v22 }
 0x362   : > { %2261 = vmatpush1.bf16.msra.mxu1 %v6287_v24  ;;  %5613 = vmatprep.mubr.msk.bf16.mxu1 %vm2094_vm5, %v1973_v15  ;;  %v6337_v15 = vld [vmem:[#allocation4 + $0x50] ss:$8 sps:$4 sm:$0xff]  }
 0x363   : > { %2262 = vmatprep.subr.bf16.mxu1 %v6768_v0 }
 0x366   : > { %2263 = vmatpush1.bf16.msra.mxu1 %v6288_v25 }
 0x367   : > { %2264 = vmatprep.subr.bf16.mxu1 %v6768_v0 }
 0x36a   : > { %2265 = vmatpush1.bf16.msra.mxu1 %v6289_v26 }
 0x36b   : > { %2266 = vmatprep.subr.bf16.mxu1 %v6768_v0 }
 0x36e   : > { %2267 = vmatpush1.bf16.msra.mxu1 %v6290_v29  ;;  %v6344_v29 = vld [vmem:[#allocation4 + $0xd4] ss:$8 sps:$4 sm:$0xff]  }
 0x36f   : > { %2268 = vmatprep.subr.bf16.mxu1 %v6768_v0 }
 0x372   : > { %2269 = vmatpush1.bf16.msra.mxu1 %v6291_v30  ;;  %v6342_v30 = vld [vmem:[#allocation4 + $0xd0] ss:$8 sps:$4 sm:$0xff]  }
 0x373   : > { %2270 = vmatprep.subr.bf16.mxu1 %v6768_v0 }
 0x376   : > { %2271 = vmatpush1.bf16.msra.mxu1 %v6292_v31  ;;  %v6347_v31 = vld [vmem:[#allocation4 + $0xe4] ss:$8 sps:$4 sm:$0xff]  }
 0x377   : > { %2272 = vmatprep.subr.bf16.mxu1 %v6768_v0 }
 0x37a   : > { %2273 = vmatpush1.bf16.msra.mxu1 %v6293_v32  ;;  %v6345_v32 = vld [vmem:[#allocation4 + $0xe0] ss:$8 sps:$4 sm:$0xff]  }
 0x37b   : > { %2274 = vmatprep.subr.bf16.mxu1 %v6768_v0 }
 0x37e   : > { %2275 = vmatpush1.bf16.msra.mxu1 %v6294_v33  ;;  %v6350_v33 = vld [vmem:[#allocation4 + $0xf4] ss:$8 sps:$4 sm:$0xff]  }
 0x37f   : > { %2276 = vmatprep.subr.bf16.mxu1 %v6768_v0 }
 0x382   : > { %2277 = vmatpush1.bf16.msra.mxu1 %v6295_v34  ;;  %v6348_v34 = vld [vmem:[#allocation4 + $0xf0] ss:$8 sps:$4 sm:$0xff]  }
 0x383   : > { %2278 = vmatprep.subr.bf16.mxu1 %v6768_v0 }
 0x386   : > { %2279 = vmatpush1.bf16.msra.mxu1 %v6296_v35  ;;  %v6353_v35 = vld [vmem:[#allocation4 + $0x104] ss:$8 sps:$4 sm:$0xff]  }
 0x387   : > { %2280 = vmatprep.subr.bf16.mxu1 %v6768_v0 }
 0x38a   : > { %2281 = vmatpush1.bf16.msra.mxu1 %v6297_v36  ;;  %v6351_v36 = vld [vmem:[#allocation4 + $0x100] ss:$8 sps:$4 sm:$0xff]  }
 0x38b   : > { %2282 = vmatprep.subr.bf16.mxu1 %v6768_v0 }
 0x38e   : > { %2283 = vmatpush1.bf16.msra.mxu1 %v6298_v37  ;;  %v6356_v37 = vld [vmem:[#allocation4 + $0x114] ss:$8 sps:$4 sm:$0xff]  }
 0x38f   : > { %2284 = vmatprep.subr.bf16.mxu1 %v6768_v0 }
 0x392   : > { %2285 = vmatpush1.bf16.msra.mxu1 %v6299_v38  ;;  %v6354_v38 = vld [vmem:[#allocation4 + $0x110] ss:$8 sps:$4 sm:$0xff]  }
 0x393   : > { %2286 = vmatprep.subr.bf16.mxu1 %v6768_v0 }
 0x396   : > { %2287 = vmatpush1.bf16.msra.mxu1 %v6300_v39  ;;  %v6359_v39 = vld [vmem:[#allocation4 + $0x124] ss:$8 sps:$4 sm:$0xff]  }
 0x397   : > { %2288 = vmatprep.subr.bf16.mxu1 %v6768_v0 }
 0x39a   : > { %2289 = vmatpush1.bf16.msra.mxu1 %v6301_v40  ;;  %v2583_v40 = vld [vmem:[#allocation4 + $0x130] sm:$0xff] }
 0x39b   : > { %2410 = vmatprep.subr.bf16.mxu1 %v6304_v42  ;;  %v5659_v42 = vcombine.high %v2583_v40, %v2583_v40 }
 0x39d   : > { %2293 = vmatmul.mubr.bf16.vlgmr.msra.gmra.mrb[12].mxu1 %v1972_v22  ;;  %v2316_v22 = vld [vmem:[#allocation4 + $0x60] sm:$0xff] }
 0x39e   : > { %2442 = vmatprep.mubr.bf16.mxu1 %v6768_v0  ;;  %2411 = vmatpush1.bf16.msra.mxu1 %v6302_v41  ;;  %v5643_v24 = vcombine.high %v2316_v22, %v2316_v22  ;;  %v5642_v25 = vcombine.low %v2316_v22, %v2316_v22  ;;  %v6357_v41 = vld [vmem:[#allocation4 + $0x120] ss:$8 sps:$4 sm:$0xff]  }
 0x39f   : > { %2412 = vmatprep.subr.bf16.mxu1 %v6307_v43  ;;  %v5658_v43 = vcombine.low %v2583_v40, %v2583_v40  ;;  %v6408_v22 = vld [vmem:[#allocation4 + $0x228] ss:$8 sps:$4 sm:$0xff]   ;;  %v6430_v40 = vld [vmem:[#allocation4 + $0x294] ss:$8 sps:$4 sm:$0xff]  }
 0x3a0   : > { %v2522_v26 = vsel %vm2403_vm6, %v5642_v25, 0  ;;  %v6416_v25 = vld [vmem:[#allocation4 + $0x24c] ss:$8 sps:$4 sm:$0xff]  }
 0x3a2   : > { %2413 = vmatpush1.bf16.msra.mxu1 %v6305_v44  ;;  %v2655_v44 = vsel %vm2403_vm6, %v5658_v43, 0  ;;  %v6431_v43 = vld [vmem:[#allocation4 + $0x2a0] ss:$8 sps:$4 sm:$0xff]  }
 0x3a3   : > { %2414 = vmatprep.subr.bf16.mxu1 %v6310_v45  ;;  %v6364_v45 = vld [vmem:[#allocation4 + $0x13c] ss:$8 sps:$4 sm:$0xff]  }
 0x3a6   : > { %2415 = vmatpush1.bf16.msra.mxu1 %v6308_v46  ;;  %v6362_v46 = vld [vmem:[#allocation4 + $0x138] ss:$8 sps:$4 sm:$0xff]  }
 0x3a7   : > { %2416 = vmatprep.subr.bf16.mxu1 %v6313_v47  ;;  %v6367_v47 = vld [vmem:[#allocation4 + $0x14c] ss:$8 sps:$4 sm:$0xff]  }
 0x3aa   : > { %2417 = vmatpush1.bf16.msra.mxu1 %v6311_v48 }
 0x3ab   : > { %2418 = vmatprep.subr.bf16.mxu1 %v6316_v49  ;;  %v6365_v49 = vld [vmem:[#allocation4 + $0x148] ss:$8 sps:$4 sm:$0xff]  }
 0x3ae   : > { %2419 = vmatpush1.bf16.msra.mxu1 %v6314_v50  ;;  %v6370_v50 = vld [vmem:[#allocation4 + $0x15c] ss:$8 sps:$4 sm:$0xff]  }
 0x3af   : > { %2420 = vmatprep.subr.bf16.mxu1 %v6319_v51  ;;  %v6368_v51 = vld [vmem:[#allocation4 + $0x158] ss:$8 sps:$4 sm:$0xff]  }
 0x3b2   : > { %2421 = vmatpush1.bf16.msra.mxu1 %v6317_v53  ;;  %v6371_v53 = vld [vmem:[#allocation4 + $0x168] ss:$8 sps:$4 sm:$0xff]  }
 0x3b3   : > { %5628 = vmatprep.subr.msk.bf16.mxu1 %vm2403_vm6, %v5627_v54  ;;  %v6376_v54 = vld [vmem:[#allocation4 + $0x17c] ss:$8 sps:$4 sm:$0xff]  }
 0x3b6   : > { %2423 = vmatpush1.bf16.msra.mxu1 %v2405_v56  ;;  %v6379_v56 = vld [vmem:[#allocation4 + $0x18c] ss:$8 sps:$4 sm:$0xff]  }
 0x3b7   : > { %2527 = vmatprep.subr.bf16.mxu1 %v6324_v57  ;;  %v2720_v57 = vld [vmem:[#allocation4 + $0x198] sm:$0xff] }
 0x434   : > { %v2132_v58 = vpop.f32.mrb[8].mxu1 }
 0x435   : > { %v2134_v59 = vpop.f32.mrb[9].mxu1 }
 0x436   : > { %v2135_v60 = vpop.f32.mrb[10].mxu1  ;;  %v5675_v59 = vcombine.high %v2720_v57, %v2720_v57 }
 0x437   : > { %v2137_v61 = vpop.f32.mrb[11].mxu1 }
 0x470   : > { %v2294_v28 = vpop.f32.mrb[12].mxu1 }
 0x471   : > { %v2301_v62 = vmax.f32 %v2132_v58, %v2294_v28  ;;  %v2296_v63 = vpop.f32.mrb[13].mxu1  ;;  %v6377_v58 = vld [vmem:[#allocation4 + $0x188] ss:$8 sps:$4 sm:$0xff]   ;;  %v6384_v28 = vld [vmem:[#allocation4 + $0x1a4] ss:$8 sps:$4 sm:$0xff]  }
 0x472   : > { %v2297_v1 = vpop.f32.mrb[14].mxu1  ;;  %v6387_v63 = vld [vmem:[#allocation4 + $0x1b4] ss:$8 sps:$4 sm:$0xff]  }
 0x473   : > { %v2302_v2 = vmax.f32 %v2135_v60, %v2297_v1  ;;  %v2299_v3 = vpop.f32.mrb[15].mxu1  ;;  %v5674_v60 = vcombine.low %v2720_v57, %v2720_v57  ;;  %v6385_v1 = vld [vmem:[#allocation4 + $0x1b0] ss:$8 sps:$4 sm:$0xff]  }
 0x474   : > { %v6388_v3 = vld [vmem:[#allocation4 + $0x1c0] ss:$8 sps:$4 sm:$0xff]  }
 0x475   : > { %v2303_v27 = vpack.c.bf16 %v2302_v2, %v2301_v62  ;;  %v2796_v61 = vsel %vm2403_vm6, %v5674_v60, 0  ;;  %v6382_v62 = vld [vmem:[#allocation4 + $0x1a0] ss:$8 sps:$4 sm:$0xff]   ;;  %v6390_v2 = vld [vmem:[#allocation4 + $0x1c4] ss:$8 sps:$4 sm:$0xff]  }
 0x476   : > { %v6448_v57 = vld [vmem:[#allocation4 + $0x2f8] ss:$8 sps:$4 sm:$0xff]   ;;  %v6456_v60 = vld [vmem:[#allocation4 + $0x31c] ss:$8 sps:$4 sm:$0xff]  }
 0x477   : > { %2584 = vrot.lane.b32.xlu1 %v2303_v27, %s6771_s16  ;;  %2332 = vrot.lane.b32.xlu0 %v2303_v27, %s6772_s18  ;;  %v2723_v4 = vshll.u32 %v2303_v27, 16  ;;  %v2721_v5 = vshrl.u32 %v2303_v27, 16  ;;  %v7223_v8 = vrot.slane %v2303_v27, 1 }
 0x479   : > { %v2725_v6 = vrot.slane %v2723_v4, 1  ;;  %v6391_v4 = vld [vmem:[#allocation4 + $0x1d0] ss:$8 sps:$4 sm:$0xff]  }
 0x47b   : > { %v7218_v7 = vor.u32 %v2725_v6, %v2721_v5  ;;  %v6396_v5 = vld [vmem:[#allocation4 + $0x1e4] ss:$8 sps:$4 sm:$0xff]   ;;  %v6394_v6 = vld [vmem:[#allocation4 + $0x1e0] ss:$8 sps:$4 sm:$0xff]  }
 0x47d   : > { %2999 = vrot.lane.b32.xlu1 %v7218_v7, %s6771_s16  ;;  %2862 = vrot.lane.b32.xlu0 %v7218_v7, %s6772_s18 }
 0x481   : > { %3409 = vrot.lane.b32.xlu1 %v7223_v8, %s6771_s16  ;;  %3272 = vrot.lane.b32.xlu0 %v7223_v8, %s6772_s18 }
 0x4e9   : > { %v2333_v11 = vpop.permute.xlu0 %2332  ;;  %v2585_v48 = vpop.permute.xlu1 %2584 }
 0x4ea   : > { %5629 = vmatmul.mubr.msk.bf16.vlgmr.msra.gmra.mrb[16].mxu1 %vm2399_vm7, %v2333_v11 }
 0x4eb   : > { %2528 = vmatpush1.bf16.msra.mxu1 %v6322_v9  ;;  %2559 = vmatprep.mubr.bf16.mxu1 %v6768_v0  ;;  %v6399_v9 = vld [vmem:[#allocation4 + $0x1f4] ss:$8 sps:$4 sm:$0xff]  }
 0x4ec   : > { %2529 = vmatprep.subr.bf16.mxu1 %v6327_v10  ;;  %v2861_v10 = vld [vmem:[#allocation4 + $0x200] sm:$0xff] }
 0x4ed   : > { %v5691_v11 = vcombine.high %v2861_v10, %v2861_v10 }
 0x4ef   : > { %2530 = vmatpush1.bf16.msra.mxu1 %v6325_v12  ;;  %v5690_v12 = vcombine.low %v2861_v10, %v2861_v10  ;;  %v6468_v10 = vld [vmem:[#allocation4 + $0x360] ss:$8 sps:$4 sm:$0xff]  }
 0x4f0   : > { %2531 = vmatprep.subr.bf16.mxu1 %v6330_v13 }
 0x4f1   : > { %v2933_v13 = vsel %vm2403_vm6, %v5690_v12, 0  ;;  %v6476_v12 = vld [vmem:[#allocation4 + $0x384] ss:$8 sps:$4 sm:$0xff]  }
 0x4f3   : > { %2532 = vmatpush1.bf16.msra.mxu1 %v6328_v14  ;;  %v6404_v14 = vld [vmem:[#allocation4 + $0x20c] ss:$8 sps:$4 sm:$0xff]  }
 0x4f4   : > { %2533 = vmatprep.subr.bf16.mxu1 %v6333_v17  ;;  %v6402_v17 = vld [vmem:[#allocation4 + $0x208] ss:$8 sps:$4 sm:$0xff]  }
 0x4f7   : > { %2534 = vmatpush1.bf16.msra.mxu1 %v6331_v18  ;;  %v6407_v18 = vld [vmem:[#allocation4 + $0x21c] ss:$8 sps:$4 sm:$0xff]  }
 0x4f8   : > { %2535 = vmatprep.subr.bf16.mxu1 %v6336_v16  ;;  %v2863_v16 = vpop.permute.xlu0 %2862 }
 0x4fb   : > { %2536 = vmatpush1.bf16.msra.mxu1 %v6334_v19  ;;  %v6405_v19 = vld [vmem:[#allocation4 + $0x218] ss:$8 sps:$4 sm:$0xff]  }
 0x4fc   : > { %2537 = vmatprep.subr.bf16.mxu1 %v6339_v20  ;;  %v6410_v20 = vld [vmem:[#allocation4 + $0x22c] ss:$8 sps:$4 sm:$0xff]  }
 0x4ff   : > { %2538 = vmatpush1.bf16.msra.mxu1 %v6337_v15  ;;  %v6413_v15 = vld [vmem:[#allocation4 + $0x23c] ss:$8 sps:$4 sm:$0xff]  }
 0x500   : > { %5644 = vmatprep.subr.msk.bf16.mxu1 %vm2403_vm6, %v5643_v24  ;;  %v6411_v24 = vld [vmem:[#allocation4 + $0x238] ss:$8 sps:$4 sm:$0xff]  }
 0x503   : > { %2540 = vmatpush1.bf16.msra.mxu1 %v2522_v26  ;;  %v6414_v26 = vld [vmem:[#allocation4 + $0x248] ss:$8 sps:$4 sm:$0xff]  }
 0x504   : > { %2660 = vmatprep.subr.bf16.mxu1 %v6344_v29  ;;  %v6419_v29 = vld [vmem:[#allocation4 + $0x25c] ss:$8 sps:$4 sm:$0xff]  }
 0x506   : > { %5645 = vmatmul.mubr.msk.bf16.vlgmr.msra.gmra.mrb[16].mxu1 %vm2399_vm7, %v2303_v27  ;;  %v6393_v27 = vld [vmem:[#allocation4 + $0x1d4] ss:$8 sps:$4 sm:$0xff]  }
 0x507   : > { %2661 = vmatpush1.bf16.msra.mxu1 %v6342_v30  ;;  %2692 = vmatprep.mubr.bf16.mxu1 %v6768_v0  ;;  %v2998_v30 = vld [vmem:[#allocation4 + $0x268] sm:$0xff] }
 0x508   : > { %2662 = vmatprep.subr.bf16.mxu1 %v6347_v31  ;;  %v6417_v31 = vld [vmem:[#allocation4 + $0x258] ss:$8 sps:$4 sm:$0xff]  }
 0x50b   : > { %2663 = vmatpush1.bf16.msra.mxu1 %v6345_v32  ;;  %v5707_v32 = vcombine.high %v2998_v30, %v2998_v30 }
 0x50c   : > { %2664 = vmatprep.subr.bf16.mxu1 %v6350_v33  ;;  %v5706_v33 = vcombine.low %v2998_v30, %v2998_v30 }
 0x50f   : > { %2665 = vmatpush1.bf16.msra.mxu1 %v6348_v34  ;;  %v3070_v34 = vsel %vm2403_vm6, %v5706_v33, 0 }
 0x510   : > { %2666 = vmatprep.subr.bf16.mxu1 %v6353_v35  ;;  %v6424_v35 = vld [vmem:[#allocation4 + $0x274] ss:$8 sps:$4 sm:$0xff]  }
 0x513   : > { %2667 = vmatpush1.bf16.msra.mxu1 %v6351_v36  ;;  %v6422_v36 = vld [vmem:[#allocation4 + $0x270] ss:$8 sps:$4 sm:$0xff]  }
 0x514   : > { %2668 = vmatprep.subr.bf16.mxu1 %v6356_v37  ;;  %v6427_v37 = vld [vmem:[#allocation4 + $0x284] ss:$8 sps:$4 sm:$0xff]  }
 0x517   : > { %2669 = vmatpush1.bf16.msra.mxu1 %v6354_v38  ;;  %v3000_v38 = vpop.permute.xlu1 %2999 }
 0x518   : > { %2670 = vmatprep.subr.bf16.mxu1 %v6359_v39  ;;  %v6425_v39 = vld [vmem:[#allocation4 + $0x280] ss:$8 sps:$4 sm:$0xff]  }
 0x51b   : > { %2671 = vmatpush1.bf16.msra.mxu1 %v6357_v41  ;;  %v6428_v41 = vld [vmem:[#allocation4 + $0x290] ss:$8 sps:$4 sm:$0xff]  }
 0x51c   : > { %5660 = vmatprep.subr.msk.bf16.mxu1 %vm2403_vm6, %v5659_v42  ;;  %v6433_v42 = vld [vmem:[#allocation4 + $0x2a4] ss:$8 sps:$4 sm:$0xff]  }
 0x51f   : > { %2673 = vmatpush1.bf16.msra.mxu1 %v2655_v44  ;;  %v6436_v44 = vld [vmem:[#allocation4 + $0x2b4] ss:$8 sps:$4 sm:$0xff]  }
 0x520   : > { %2801 = vmatprep.subr.bf16.mxu1 %v6364_v45  ;;  %v6434_v45 = vld [vmem:[#allocation4 + $0x2b0] ss:$8 sps:$4 sm:$0xff]  }
 0x522   : > { %5661 = vmatmul.mubr.msk.bf16.vlgmr.msra.gmra.mrb[16].mxu1 %vm2399_vm7, %v2585_v48  ;;  %v6437_v48 = vld [vmem:[#allocation4 + $0x2c0] ss:$8 sps:$4 sm:$0xff]  }
 0x523   : > { %2802 = vmatpush1.bf16.msra.mxu1 %v6362_v46  ;;  %2833 = vmatprep.mubr.bf16.mxu1 %v6768_v0  ;;  %v6439_v46 = vld [vmem:[#allocation4 + $0x2c4] ss:$8 sps:$4 sm:$0xff]  }
 0x524   : > { %2803 = vmatprep.subr.bf16.mxu1 %v6367_v47  ;;  %v3135_v47 = vld [vmem:[#allocation4 + $0x2d0] sm:$0xff] }
 0x527   : > { %2804 = vmatpush1.bf16.msra.mxu1 %v6365_v49  ;;  %v5723_v49 = vcombine.high %v3135_v47, %v3135_v47 }
 0x528   : > { %2805 = vmatprep.subr.bf16.mxu1 %v6370_v50  ;;  %v5722_v50 = vcombine.low %v3135_v47, %v3135_v47  ;;  %v3554_v47 = vld [vmem:[%s7528_s7] sm:$0xf] }
 0x52b   : > { %2806 = vmatpush1.bf16.msra.mxu1 %v6368_v51  ;;  %v3206_v51 = vsel %vm2403_vm6, %v5722_v50, 0  ;;  %v6483_v50 = vld [vmem:[%s7529_s8 + $0x8] sm:$0xff]  }
 0x52c   : > { %2807 = vmatprep.subr.bf16.mxu1 %v6373_v52  ;;  %v6444_v52 = vld [vmem:[#allocation4 + $0x2dc] ss:$8 sps:$4 sm:$0xff]  }
 0x52f   : > { %2808 = vmatpush1.bf16.msra.mxu1 %v6371_v53  ;;  %v6442_v53 = vld [vmem:[#allocation4 + $0x2d8] ss:$8 sps:$4 sm:$0xff]  }
 0x530   : > { %2809 = vmatprep.subr.bf16.mxu1 %v6376_v54  ;;  %v6447_v54 = vld [vmem:[#allocation4 + $0x2ec] ss:$8 sps:$4 sm:$0xff]  }
 0x533   : > { %2810 = vmatpush1.bf16.msra.mxu1 %v6374_v55  ;;  %v6445_v55 = vld [vmem:[#allocation4 + $0x2e8] ss:$8 sps:$4 sm:$0xff]  }
 0x534   : > { %2811 = vmatprep.subr.bf16.mxu1 %v6379_v56  ;;  %v6450_v56 = vld [vmem:[#allocation4 + $0x2fc] ss:$8 sps:$4 sm:$0xff]  }
 0x537   : > { %2812 = vmatpush1.bf16.msra.mxu1 %v6377_v58  ;;  %v6453_v58 = vld [vmem:[#allocation4 + $0x30c] ss:$8 sps:$4 sm:$0xff]  }
 0x538   : > { %5676 = vmatprep.subr.msk.bf16.mxu1 %vm2403_vm6, %v5675_v59  ;;  %v6451_v59 = vld [vmem:[#allocation4 + $0x308] ss:$8 sps:$4 sm:$0xff]  }
 0x53b   : > { %2814 = vmatpush1.bf16.msra.mxu1 %v2796_v61  ;;  %v6454_v61 = vld [vmem:[#allocation4 + $0x318] ss:$8 sps:$4 sm:$0xff]  }
 0x53c   : > { %2938 = vmatprep.subr.bf16.mxu1 %v6384_v28  ;;  %v6459_v28 = vld [vmem:[#allocation4 + $0x32c] ss:$8 sps:$4 sm:$0xff]  }
 0x53e   : > { %5677 = vmatmul.mubr.msk.bf16.vlgmr.msra.gmra.mrb[16].mxu1 %vm2399_vm7, %v7218_v7  ;;  %v6397_v7 = vld [vmem:[#allocation4 + $0x1f0] ss:$8 sps:$4 sm:$0xff]  }
 0x53f   : > { %2939 = vmatpush1.bf16.msra.mxu1 %v6382_v62  ;;  %2970 = vmatprep.mubr.bf16.mxu1 %v6768_v0  ;;  %v3271_v62 = vld [vmem:[#allocation4 + $0x338] sm:$0xff] }
 0x540   : > { %2940 = vmatprep.subr.bf16.mxu1 %v6387_v63  ;;  %v5739_v63 = vcombine.high %v3271_v62, %v3271_v62 }
 0x543   : > { %2941 = vmatpush1.bf16.msra.mxu1 %v6385_v1  ;;  %v5738_v1 = vcombine.low %v3271_v62, %v3271_v62 }
 0x544   : > { %2942 = vmatprep.subr.bf16.mxu1 %v6390_v2 }
 0x545   : > { %v3343_v2 = vsel %vm2403_vm6, %v5738_v1, 0 }
 0x547   : > { %2943 = vmatpush1.bf16.msra.mxu1 %v6388_v3  ;;  %v6464_v3 = vld [vmem:[#allocation4 + $0x344] ss:$8 sps:$4 sm:$0xff]  }
 0x548   : > { %2944 = vmatprep.subr.bf16.mxu1 %v6393_v27  ;;  %v6462_v27 = vld [vmem:[#allocation4 + $0x340] ss:$8 sps:$4 sm:$0xff]  }
 0x54b   : > { %2945 = vmatpush1.bf16.msra.mxu1 %v6391_v4  ;;  %v6467_v4 = vld [vmem:[#allocation4 + $0x354] ss:$8 sps:$4 sm:$0xff]  }
 0x54c   : > { %2946 = vmatprep.subr.bf16.mxu1 %v6396_v5  ;;  %v3273_v5 = vpop.permute.xlu0 %3272 }
 0x54f   : > { %2947 = vmatpush1.bf16.msra.mxu1 %v6394_v6  ;;  %v6465_v6 = vld [vmem:[#allocation4 + $0x350] ss:$8 sps:$4 sm:$0xff]  }
 0x550   : > { %2948 = vmatprep.subr.bf16.mxu1 %v6399_v9  ;;  %v6470_v9 = vld [vmem:[#allocation4 + $0x364] ss:$8 sps:$4 sm:$0xff]  }
 0x553   : > { %2949 = vmatpush1.bf16.msra.mxu1 %v6397_v7  ;;  %v6473_v7 = vld [vmem:[#allocation4 + $0x374] ss:$8 sps:$4 sm:$0xff]  }
 0x554   : > { %5692 = vmatprep.subr.msk.bf16.mxu1 %vm2403_vm6, %v5691_v11  ;;  %v6471_v11 = vld [vmem:[#allocation4 + $0x370] ss:$8 sps:$4 sm:$0xff]  }
 0x557   : > { %2951 = vmatpush1.bf16.msra.mxu1 %v2933_v13  ;;  %v6474_v13 = vld [vmem:[#allocation4 + $0x380] ss:$8 sps:$4 sm:$0xff]  }
 0x558   : > { %3075 = vmatprep.subr.bf16.mxu1 %v6404_v14  ;;  %v6479_v14 = vld [vmem:[#allocation4 + $0x394] ss:$8 sps:$4 sm:$0xff]  }
 0x55a   : > { %5693 = vmatmul.mubr.msk.bf16.vlgmr.msra.gmra.mrb[16].mxu1 %vm2399_vm7, %v2863_v16 }
 0x55b   : > { %3076 = vmatpush1.bf16.msra.mxu1 %v6402_v17  ;;  %3107 = vmatprep.mubr.bf16.mxu1 %v6768_v0  ;;  %v3408_v17 = vld [vmem:[#allocation4 + $0x3a0] sm:$0xff] }
 0x55c   : > { %3077 = vmatprep.subr.bf16.mxu1 %v6407_v18  ;;  %v6477_v18 = vld [vmem:[#allocation4 + $0x390] ss:$8 sps:$4 sm:$0xff]   ;;  %v5755_v16 = vcombine.high %v3408_v17, %v3408_v17 }
 0x55f   : > { %3078 = vmatpush1.bf16.msra.mxu1 %v6405_v19  ;;  %v5754_v19 = vcombine.low %v3408_v17, %v3408_v17  ;;  %v6501_v17 = vld [vmem:[%s7529_s8 + $0x98] sm:$0xff]  }
 0x560   : > { %3079 = vmatprep.subr.bf16.mxu1 %v6410_v20 }
 0x561   : > { %v3480_v20 = vsel %vm2403_vm6, %v5754_v19, 0  ;;  %v6504_v19 = vld [vmem:[%s7529_s8 + $0xb0] sm:$0xff]  }
 0x563   : > { %3080 = vmatpush1.bf16.msra.mxu1 %v6408_v22  ;;  %v3410_v22 = vpop.permute.xlu1 %3409 }
 0x564   : > { %3081 = vmatprep.subr.bf16.mxu1 %v6413_v15  ;;  %v3532_v15 = vld [vmem:[%s7527_s6] sm:$0x3] }
 0x567   : > { %3082 = vmatpush1.bf16.msra.mxu1 %v6411_v24  ;;  %v3537_v24 = vrot.slane %v3532_v15, %v7075_v21 }
 0x568   : > { %3083 = vmatprep.subr.bf16.mxu1 %v6416_v25  ;;  %v3541_v25 = vrot.slane %v3532_v15, %v7080_v23  ;;  %v6507_v15 = vld [vmem:[%s7529_s8 + $0xc8] sm:$0xff]  }
 0x56b   : > { %3084 = vmatpush1.bf16.msra.mxu1 %v6414_v26 }
 0x56c   : > { %3085 = vmatprep.subr.bf16.mxu1 %v6419_v29 }
 0x56f   : > { %3086 = vmatpush1.bf16.msra.mxu1 %v6417_v31 }
 0x570   : > { %5708 = vmatprep.subr.msk.bf16.mxu1 %vm2403_vm6, %v5707_v32 }
 0x573   : > { %3088 = vmatpush1.bf16.msra.mxu1 %v3070_v34 }
 0x574   : > { %3211 = vmatprep.subr.bf16.mxu1 %v6424_v35  ;;  %v6773_v35 = vmov 65535  }
 0x576   : > { %5709 = vmatmul.mubr.msk.bf16.vlgmr.msra.gmra.mrb[16].mxu1 %vm2399_vm7, %v3000_v38 }
 0x577   : > { %3212 = vmatpush1.bf16.msra.mxu1 %v6422_v36  ;;  %3243 = vmatprep.mubr.bf16.mxu1 %v6768_v0  ;;  %v3560_v36 = vsel %vm3559_vm8, 4294967295, %v6773_v35 }
 0x578   : > { %3213 = vmatprep.subr.bf16.mxu1 %v6427_v37 }
 0x57b   : > { %3214 = vmatpush1.bf16.msra.mxu1 %v6425_v39 }
 0x57c   : > { %3215 = vmatprep.subr.bf16.mxu1 %v6430_v40 }
 0x57f   : > { %3216 = vmatpush1.bf16.msra.mxu1 %v6428_v41 }
 0x580   : > { %3217 = vmatprep.subr.bf16.mxu1 %v6433_v42 }
 0x583   : > { %3218 = vmatpush1.bf16.msra.mxu1 %v6431_v43  ;;  %v3561_v43 = vsel %vm1390_vm2, %v3560_v36, 0  ;;  %v6522_v36 = vld [vmem:[#allocation6 + $0x134] ss:$8 sps:$4 sm:$0xff]  }
 0x584   : > { %3219 = vmatprep.subr.bf16.mxu1 %v6436_v44 }
 0x587   : > { %3220 = vmatpush1.bf16.msra.mxu1 %v6434_v45 }
 0x588   : > { %3221 = vmatprep.subr.bf16.mxu1 %v6439_v46 }
 0x58b   : > { %3222 = vmatpush1.bf16.msra.mxu1 %v6437_v48  ;;  %v5759_v48 = vld [vmem:[%s7528_s7 + $0x4] sm:$0xf] }
 0x58c   : > { %5724 = vmatprep.subr.msk.bf16.mxu1 %vm2403_vm6, %v5723_v49  ;;  %v6482_v49 = vld [vmem:[%s7529_s8] sm:$0xff]  }
 0x58f   : > { %3224 = vmatpush1.bf16.msra.mxu1 %v3206_v51  ;;  %v6484_v51 = vld [vmem:[%s7529_s8 + $0x10] sm:$0xff]  }
 0x590   : > { %3348 = vmatprep.subr.bf16.mxu1 %v6444_v52  ;;  %v6485_v52 = vld [vmem:[%s7529_s8 + $0x18] sm:$0xff]  }
 0x592   : > { %5725 = vmatmul.mubr.msk.bf16.vlgmr.msra.gmra.mrb[16].mxu1 %vm2399_vm7, %v7223_v8  ;;  %v6457_v8 = vld [vmem:[#allocation4 + $0x328] ss:$8 sps:$4 sm:$0xff]  }
 0x593   : > { %3349 = vmatpush1.bf16.msra.mxu1 %v6442_v53  ;;  %3380 = vmatprep.mubr.bf16.mxu1 %v6768_v0  ;;  %v6486_v53 = vld [vmem:[%s7529_s8 + $0x20] sm:$0xff]  }
 0x594   : > { %3350 = vmatprep.subr.bf16.mxu1 %v6447_v54  ;;  %v6487_v54 = vld [vmem:[%s7529_s8 + $0x28] sm:$0xff]  }
 0x597   : > { %3351 = vmatpush1.bf16.msra.mxu1 %v6445_v55  ;;  %v6488_v55 = vld [vmem:[%s7529_s8 + $0x30] sm:$0xff]  }
 0x598   : > { %3352 = vmatprep.subr.bf16.mxu1 %v6450_v56  ;;  %v6489_v56 = vld [vmem:[%s7529_s8 + $0x38] sm:$0xff]  }
 0x59b   : > { %3353 = vmatpush1.bf16.msra.mxu1 %v6448_v57  ;;  %v6490_v57 = vld [vmem:[%s7529_s8 + $0x40] sm:$0xff]  }
 0x59c   : > { %3354 = vmatprep.subr.bf16.mxu1 %v6453_v58  ;;  %v6491_v58 = vld [vmem:[%s7529_s8 + $0x48] sm:$0xff]  }
 0x59f   : > { %3355 = vmatpush1.bf16.msra.mxu1 %v6451_v59  ;;  %v6492_v59 = vld [vmem:[%s7529_s8 + $0x50] sm:$0xff]  }
 0x5a0   : > { %3356 = vmatprep.subr.bf16.mxu1 %v6456_v60  ;;  %v6493_v60 = vld [vmem:[%s7529_s8 + $0x58] sm:$0xff]  }
 0x5a3   : > { %3357 = vmatpush1.bf16.msra.mxu1 %v6454_v61  ;;  %v6494_v61 = vld [vmem:[%s7529_s8 + $0x60] sm:$0xff]  }
 0x5a4   : > { %3358 = vmatprep.subr.bf16.mxu1 %v6459_v28 }
 0x5a7   : > { %3359 = vmatpush1.bf16.msra.mxu1 %v6457_v8 }
 0x5a8   : > { %5740 = vmatprep.subr.msk.bf16.mxu1 %vm2403_vm6, %v5739_v63 }
 0x5ab   : > { %3361 = vmatpush1.bf16.msra.mxu1 %v3343_v2 }
 0x5ac   : > { %3485 = vmatprep.subr.bf16.mxu1 %v6464_v3 }
 0x5ae   : > { %5741 = vmatmul.mubr.msk.bf16.vlgmr.msra.gmra.mrb[16].mxu1 %vm2399_vm7, %v3273_v5 }
 0x5af   : > { %3486 = vmatpush1.bf16.msra.mxu1 %v6462_v27  ;;  %3517 = vmatprep.mubr.bf16.mxu1 %v6768_v0 }
 0x5b0   : > { %3487 = vmatprep.subr.bf16.mxu1 %v6467_v4 }
 0x5b3   : > { %3488 = vmatpush1.bf16.msra.mxu1 %v6465_v6 }
 0x5b4   : > { %3489 = vmatprep.subr.bf16.mxu1 %v6470_v9  ;;  %v6495_v9 = vld [vmem:[%s7529_s8 + $0x68] sm:$0xff]  }
 0x5b7   : > { %3490 = vmatpush1.bf16.msra.mxu1 %v6468_v10 }
 0x5b8   : > { %3491 = vmatprep.subr.bf16.mxu1 %v6473_v7  ;;  %v6496_v7 = vld [vmem:[%s7529_s8 + $0x70] sm:$0xff]  }
 0x5bb   : > { %3492 = vmatpush1.bf16.msra.mxu1 %v6471_v11  ;;  %v6497_v11 = vld [vmem:[%s7529_s8 + $0x78] sm:$0xff]  }
 0x5bc   : > { %3493 = vmatprep.subr.bf16.mxu1 %v6476_v12  ;;  %v6498_v12 = vld [vmem:[%s7529_s8 + $0x80] sm:$0xff]  }
 0x5bf   : > { %3494 = vmatpush1.bf16.msra.mxu1 %v6474_v13  ;;  %v6499_v13 = vld [vmem:[%s7529_s8 + $0x88] sm:$0xff]  }
 0x5c0   : > { %3495 = vmatprep.subr.bf16.mxu1 %v6479_v14  ;;  %v6500_v14 = vld [vmem:[%s7529_s8 + $0x90] sm:$0xff]  }
 0x5c3   : > { %3496 = vmatpush1.bf16.msra.mxu1 %v6477_v18  ;;  %v6502_v18 = vld [vmem:[%s7529_s8 + $0xa0] sm:$0xff]  }
 0x5c4   : > { %5756 = vmatprep.subr.msk.bf16.mxu1 %vm2403_vm6, %v5755_v16  ;;  %v6503_v16 = vld [vmem:[%s7529_s8 + $0xa8] sm:$0xff]  }
 0x5c7   : > { %3498 = vmatpush1.bf16.msra.mxu1 %v3480_v20  ;;  %v6505_v20 = vld [vmem:[%s7529_s8 + $0xb8] sm:$0xff]  }
 0x5ca   : > { %5757 = vmatmul.mubr.msk.bf16.vlgmr.msra.gmra.mrb[16].mxu1 %vm2399_vm7, %v3410_v22  ;;  %v6506_v22 = vld [vmem:[%s7529_s8 + $0xc0] sm:$0xff]  }
 0x5cb   : > { %4377 = vmatprep.mubr.bf16.mxu1 %v6768_v0 }
 0x69d   : > { %v3519_v26 = vpop.f32.mrb[16].mxu1 }
 0x69e   : > { %v3544_v29 = vadd.f32 %v3537_v24, %v3519_v26  ;;  %v3521_v30 = vpop.f32.mrb[17].mxu1  ;;  %v6513_v26 = vld [vmem:[#allocation6 + $0x104] ss:$8 sps:$4 sm:$0xff]  }
 0x69f   : > { %v3545_v31 = vadd.f32 %v3541_v25, %v3521_v30  ;;  %v3523_v32 = vpop.f32.mrb[18].mxu1  ;;  %v6516_v30 = vld [vmem:[#allocation6 + $0x114] ss:$8 sps:$4 sm:$0xff]  }
 0x6a0   : > { %v3546_v33 = vadd.f32 %v3537_v24, %v3523_v32  ;;  %v3525_v34 = vpop.f32.mrb[19].mxu1  ;;  %v3548_v38 = vmax.f32 %v3544_v29, 0.0  ;;  %v6508_v24 = vld [vmem:[#allocation6 + $0xf0] ss:$8 sps:$4 sm:$0xff]   ;;  %v6511_v29 = vld [vmem:[#allocation6 + $0x100] ss:$8 sps:$4 sm:$0xff]  }
 0x6a1   : > { %v3547_v37 = vadd.f32 %v3541_v25, %v3525_v34  ;;  %v3549_v40 = vmax.f32 %v3545_v31, 0.0  ;;  %v6510_v25 = vld [vmem:[#allocation6 + $0xf4] ss:$8 sps:$4 sm:$0xff]   ;;  %v6514_v31 = vld [vmem:[#allocation6 + $0x110] ss:$8 sps:$4 sm:$0xff]  }
 0x6a2   : > { %v3550_v39 = vmax.f32 %v3546_v33, 0.0  ;;  %4345 = vmatprep.subr.bf16.mxu1 %v6510_v25  ;;  %v6519_v32 = vld [vmem:[#allocation6 + $0x124] ss:$8 sps:$4 sm:$0xff]   ;;  %v6517_v33 = vld [vmem:[#allocation6 + $0x120] ss:$8 sps:$4 sm:$0xff]  }
 0x6a3   : > { %v3551_v41 = vmax.f32 %v3547_v37, 0.0  ;;  %4346 = vmatpush1.bf16.msra.mxu1 %v6508_v24  ;;  %v6520_v34 = vld [vmem:[#allocation6 + $0x130] ss:$8 sps:$4 sm:$0xff]   ;;  %v6576_v25 = vld [vmem:[#allocation6 + $0x44] ss:$8 sps:$4 sm:$0xff]  }
 0x6a4   : > { %v3552_v42 = vpack.c.bf16 %v3550_v39, %v3548_v38  ;;  %4347 = vmatprep.subr.bf16.mxu1 %v6513_v26  ;;  %v6523_v37 = vld [vmem:[#allocation6 + $0x50] ss:$8 sps:$4 sm:$0xff]   ;;  %v6525_v38 = vld [vmem:[#allocation6 + $0x54] ss:$8 sps:$4 sm:$0xff]   ;;  %v6528_v39 = vld [vmem:[#allocation6 + $0x64] ss:$8 sps:$4 sm:$0xff]  }
 0x6a5   : > { %v3553_v44 = vpack.c.bf16 %v3551_v41, %v3549_v40  ;;  %v6531_v40 = vld [vmem:[#allocation6 + $0x194] ss:$8 sps:$4 sm:$0xff]   ;;  %v6526_v41 = vld [vmem:[#allocation6 + $0x60] ss:$8 sps:$4 sm:$0xff]   ;;  %v6568_v24 = vld [vmem:[#allocation6 + $0x30] ss:$8 sps:$4 sm:$0xff]  }
 0x6a6   : > { %v3563_v46 = vand.u32 %v3561_v43, %v3552_v42  ;;  %v6534_v42 = vld [vmem:[#allocation6 + $0x74] ss:$8 sps:$4 sm:$0xff]   ;;  %v6571_v26 = vld [vmem:[#allocation6 + $0x250] ss:$8 sps:$4 sm:$0xff]  }
 0x6a7   : > { %v3566_v45 = vand.u32 %v3561_v43, %v3553_v44  ;;  %4348 = vmatpush1.bf16.msra.mxu1 %v6511_v29  ;;  %v6532_v43 = vld [vmem:[#allocation6 + $0x70] ss:$8 sps:$4 sm:$0xff]   ;;  %v6540_v44 = vld [vmem:[#allocation6 + $0x84] ss:$8 sps:$4 sm:$0xff]  }
 0x6a8   : > { %4349 = vmatprep.subr.bf16.mxu1 %v6516_v30  ;;  %v6579_v29 = vld [vmem:[#allocation6 + $0x264] ss:$8 sps:$4 sm:$0xff]   ;;  %v6574_v30 = vld [vmem:[#allocation6 + $0x40] ss:$8 sps:$4 sm:$0xff]  }
 0x6a9   : > { %3568 = vmatprep.subr.bf16.mxu0 %v3566_v45 }
 0x6aa   : > { %3569 = vmatpush1.bf16.msra.mxu0 %v3563_v46 }
 0x6ab   : > { %3614 = vmatprep.subr.bf16.mxu0 %v3566_v45  ;;  %4350 = vmatpush1.bf16.msra.mxu1 %v6514_v31  ;;  %v6538_v45 = vld [vmem:[#allocation6 + $0x80] ss:$8 sps:$4 sm:$0xff]   ;;  %v6582_v31 = vld [vmem:[#allocation6 + $0xa4] ss:$8 sps:$4 sm:$0xff]  }
 0x6ac   : > { %4351 = vmatprep.subr.bf16.mxu1 %v6519_v32  ;;  %v6577_v32 = vld [vmem:[#allocation6 + $0x260] ss:$8 sps:$4 sm:$0xff]  }
 0x6ad   : > { %5758 = vmatmul.mubr.msk.bf16.vlgmr.msra.gmra.mrb[8].mxu0 %vm3555_vm9, %v3554_v47  ;;  %v6544_v47 = vld [vmem:[#allocation6 + $0x90] ss:$8 sps:$4 sm:$0xff]  }
 0x6ae   : > { %3615 = vmatpush1.bf16.msra.mxu0 %v3563_v46  ;;  %3646 = vmatprep.mubr.bf16.mxu0 %v6768_v0  ;;  %v6546_v46 = vld [vmem:[#allocation6 + $0x94] ss:$8 sps:$4 sm:$0xff]  }
 0x6af   : > { %3767 = vmatprep.subr.bf16.mxu0 %v6768_v0  ;;  %4352 = vmatpush1.bf16.msra.mxu1 %v6517_v33  ;;  %v6585_v33 = vld [vmem:[#allocation6 + $0x274] ss:$8 sps:$4 sm:$0xff]  }
 0x6b0   : > { %4353 = vmatprep.subr.bf16.mxu1 %v6522_v36  ;;  %v6588_v36 = vld [vmem:[#allocation6 + $0xb4] ss:$8 sps:$4 sm:$0xff]  }
 0x6b3   : > { %4354 = vmatpush1.bf16.msra.mxu1 %v6520_v34  ;;  %v6580_v34 = vld [vmem:[#allocation6 + $0xa0] ss:$8 sps:$4 sm:$0xff]  }
 0x6b4   : > { %4563 = vmatprep.subr.bf16.mxu1 %v6531_v40  ;;  %v6591_v40 = vld [vmem:[#allocation6 + $0xc4] ss:$8 sps:$4 sm:$0xff]  }
 0x6b5   : > { %5760 = vmatmul.mubr.msk.bf16.vlgmr.msra.gmra.mrb[12].mxu0 %vm3555_vm9, %v5759_v48  ;;  %v6552_v48 = vld [vmem:[#allocation6 + $0x4] ss:$8 sps:$4 sm:$0xff]  }
 0x6b6   : > { %3768 = vmatpush1.bf16.msra.mxu0 %v6482_v49 }
 0x6b7   : > { %3769 = vmatprep.subr.bf16.mxu0 %v6768_v0 }
 0x6ba   : > { %3770 = vmatpush1.bf16.msra.mxu0 %v6483_v50 }
 0x6bb   : > { %3771 = vmatprep.subr.bf16.mxu0 %v6768_v0 }
 0x6be   : > { %3772 = vmatpush1.bf16.msra.mxu0 %v6484_v51 }
 0x6bf   : > { %3773 = vmatprep.subr.bf16.mxu0 %v6768_v0 }
 0x6c2   : > { %3774 = vmatpush1.bf16.msra.mxu0 %v6485_v52 }
 0x6c3   : > { %3775 = vmatprep.subr.bf16.mxu0 %v6768_v0 }
 0x6c6   : > { %3776 = vmatpush1.bf16.msra.mxu0 %v6486_v53 }
 0x6c7   : > { %3777 = vmatprep.subr.bf16.mxu0 %v6768_v0 }
 0x6ca   : > { %3778 = vmatpush1.bf16.msra.mxu0 %v6487_v54 }
 0x6cb   : > { %3779 = vmatprep.subr.bf16.mxu0 %v6768_v0 }
 0x6ce   : > { %3780 = vmatpush1.bf16.msra.mxu0 %v6488_v55 }
 0x6cf   : > { %3781 = vmatprep.subr.bf16.mxu0 %v6768_v0 }
 0x6d2   : > { %3782 = vmatpush1.bf16.msra.mxu0 %v6489_v56 }
 0x6d3   : > { %3783 = vmatprep.subr.bf16.mxu0 %v6768_v0 }
 0x6d6   : > { %3784 = vmatpush1.bf16.msra.mxu0 %v6490_v57 }
 0x6d7   : > { %3785 = vmatprep.subr.bf16.mxu0 %v6768_v0 }
 0x6da   : > { %3786 = vmatpush1.bf16.msra.mxu0 %v6491_v58 }
 0x6db   : > { %3787 = vmatprep.subr.bf16.mxu0 %v6768_v0 }
 0x6de   : > { %3788 = vmatpush1.bf16.msra.mxu0 %v6492_v59 }
 0x6df   : > { %3789 = vmatprep.subr.bf16.mxu0 %v6768_v0 }
 0x6e2   : > { %3790 = vmatpush1.bf16.msra.mxu0 %v6493_v60 }
 0x6e3   : > { %3791 = vmatprep.subr.bf16.mxu0 %v6768_v0 }
 0x6e6   : > { %3792 = vmatpush1.bf16.msra.mxu0 %v6494_v61 }
 0x6e7   : > { %3912 = vmatprep.subr.bf16.mxu0 %v6768_v0 }
 0x780   : > { %v3602_v28 = vpop.f32.mrb[8].mxu0 }
 0x781   : > { %v3604_v62 = vpop.f32.mrb[9].mxu0 }
 0x782   : > { %v3606_v8 = vpop.f32.mrb[10].mxu0 }
 0x783   : > { %v3607_v63 = vpop.f32.mrb[11].mxu0  ;;  %v6537_v8 = vld [vmem:[#allocation6 + $0x1a4] ss:$8 sps:$4 sm:$0xff]  }
 0x788   : > { %v3648_v1 = vpop.f32.mrb[12].mxu0 }
 0x789   : > { %v3655_v2 = vmax.f32 %v3602_v28, %v3648_v1  ;;  %v3650_v3 = vpop.f32.mrb[13].mxu0  ;;  %v6535_v1 = vld [vmem:[#allocation6 + $0x1a0] ss:$8 sps:$4 sm:$0xff]  }
 0x78a   : > { %v3656_v27 = vmax.f32 %v3604_v62, %v3650_v3  ;;  %v3652_v4 = vpop.f32.mrb[14].mxu0  ;;  %v6529_v62 = vld [vmem:[#allocation6 + $0x190] ss:$8 sps:$4 sm:$0xff]  }
 0x78b   : > { %v3653_v5 = vpop.f32.mrb[15].mxu0  ;;  %v3657_v10 = vpack.c.bf16 %v3655_v2, %v3655_v2  ;;  %v6543_v2 = vld [vmem:[#allocation6 + $0x1b4] ss:$8 sps:$4 sm:$0xff]   ;;  %v6541_v3 = vld [vmem:[#allocation6 + $0x1b0] ss:$8 sps:$4 sm:$0xff]  }
 0x78c   : > { %v3658_v6 = vpack.c.bf16 %v3656_v27, %v3656_v27  ;;  %v6549_v27 = vld [vmem:[#allocation6 + $0x1c4] ss:$8 sps:$4 sm:$0xff]   ;;  %v6547_v4 = vld [vmem:[#allocation6 + $0x1c0] ss:$8 sps:$4 sm:$0xff]   ;;  %v6555_v5 = vld [vmem:[#allocation6 + $0x1d4] ss:$8 sps:$4 sm:$0xff]  }
 0x78e   : > { %5774 = vmatprep.mubr.msk.bf16.mxu0 %vm3763_vm10, %v3658_v6 }
 0x78f   : > { %3800 = vmatmul.mubr.bf16.vlgmr.msra.gmra.mrb[16].mxu0 %v3657_v10 }
 0x790   : > { %3913 = vmatpush1.bf16.msra.mxu0 %v6495_v9  ;;  %5814 = vmatprep.mubr.msk.bf16.mxu0 %vm3763_vm10, %v3658_v6  ;;  %v6553_v6 = vld [vmem:[#allocation6 + $0x1d0] ss:$8 sps:$4 sm:$0xff]   ;;  %v6561_v9 = vld [vmem:[#allocation6 + $0x234] ss:$8 sps:$4 sm:$0xff]  }
 0x791   : > { %3914 = vmatprep.subr.bf16.mxu0 %v6768_v0 }
 0x794   : > { %3915 = vmatpush1.bf16.msra.mxu0 %v6496_v7  ;;  %v6558_v7 = vld [vmem:[#allocation6 + $0x14] ss:$8 sps:$4 sm:$0xff]  }
 0x795   : > { %3916 = vmatprep.subr.bf16.mxu0 %v6768_v0 }
 0x798   : > { %3917 = vmatpush1.bf16.msra.mxu0 %v6497_v11 }
 0x799   : > { %3918 = vmatprep.subr.bf16.mxu0 %v6768_v0 }
 0x79c   : > { %3919 = vmatpush1.bf16.msra.mxu0 %v6498_v12 }
 0x79d   : > { %3920 = vmatprep.subr.bf16.mxu0 %v6768_v0 }
 0x7a0   : > { %3921 = vmatpush1.bf16.msra.mxu0 %v6499_v13  ;;  %v6556_v13 = vld [vmem:[#allocation6 + $0x10] ss:$8 sps:$4 sm:$0xff]  }
 0x7a1   : > { %3922 = vmatprep.subr.bf16.mxu0 %v6768_v0 }
 0x7a4   : > { %3923 = vmatpush1.bf16.msra.mxu0 %v6500_v14  ;;  %v6564_v14 = vld [vmem:[#allocation6 + $0x24] ss:$8 sps:$4 sm:$0xff]  }
 0x7a5   : > { %3924 = vmatprep.subr.bf16.mxu0 %v6768_v0 }
 0x7a8   : > { %3925 = vmatpush1.bf16.msra.mxu0 %v6501_v17  ;;  %v6559_v17 = vld [vmem:[#allocation6 + $0x230] ss:$8 sps:$4 sm:$0xff]  }
 0x7a9   : > { %3926 = vmatprep.subr.bf16.mxu0 %v6768_v0 }
 0x7ac   : > { %3927 = vmatpush1.bf16.msra.mxu0 %v6502_v18  ;;  %v6567_v18 = vld [vmem:[#allocation6 + $0x244] ss:$8 sps:$4 sm:$0xff]  }
 0x7ad   : > { %3928 = vmatprep.subr.bf16.mxu0 %v6768_v0 }
 0x7b0   : > { %3929 = vmatpush1.bf16.msra.mxu0 %v6503_v16 }
 0x7b1   : > { %3930 = vmatprep.subr.bf16.mxu0 %v6768_v0 }
 0x7b4   : > { %3931 = vmatpush1.bf16.msra.mxu0 %v6504_v19  ;;  %v6562_v19 = vld [vmem:[#allocation6 + $0x20] ss:$8 sps:$4 sm:$0xff]  }
 0x7b5   : > { %3932 = vmatprep.subr.bf16.mxu0 %v6768_v0 }
 0x7b8   : > { %3933 = vmatpush1.bf16.msra.mxu0 %v6505_v20  ;;  %v6570_v20 = vld [vmem:[#allocation6 + $0x34] ss:$8 sps:$4 sm:$0xff]  }
 0x7b9   : > { %3934 = vmatprep.subr.bf16.mxu0 %v6768_v0 }
 0x7bc   : > { %3935 = vmatpush1.bf16.msra.mxu0 %v6506_v22  ;;  %v6565_v22 = vld [vmem:[#allocation6 + $0x240] ss:$8 sps:$4 sm:$0xff]  }
 0x7bd   : > { %3936 = vmatprep.subr.bf16.mxu0 %v6768_v0 }
 0x7c0   : > { %3937 = vmatpush1.bf16.msra.mxu0 %v6507_v15  ;;  %v6573_v15 = vld [vmem:[#allocation6 + $0x254] ss:$8 sps:$4 sm:$0xff]  }
 0x7c1   : > { %4031 = vmatprep.subr.bf16.mxu0 %v6525_v38  ;;  %v6583_v38 = vld [vmem:[#allocation6 + $0x270] ss:$8 sps:$4 sm:$0xff]  }
 0x7c3   : > { %3945 = vmatmul.mubr.bf16.vlgmr.msra.gmra.mrb[20].mxu0 %v3657_v10  ;;  %v6550_v10 = vld [vmem:[#allocation6] ss:$8 sps:$4 sm:$0xff]  }
 0x7c4   : > { %4063 = vmatprep.mubr.bf16.mxu0 %v6768_v0  ;;  %4032 = vmatpush1.bf16.msra.mxu0 %v6523_v37 }
 0x7c5   : > { %4033 = vmatprep.subr.bf16.mxu0 %v6528_v39  ;;  %v6586_v39 = vld [vmem:[#allocation6 + $0xb0] ss:$8 sps:$4 sm:$0xff]  }
 0x7c8   : > { %4034 = vmatpush1.bf16.msra.mxu0 %v6526_v41 }
 0x7c9   : > { %4035 = vmatprep.subr.bf16.mxu0 %v6534_v42  ;;  %v6589_v42 = vld [vmem:[#allocation6 + $0xc0] ss:$8 sps:$4 sm:$0xff]  }
 0x7cc   : > { %4036 = vmatpush1.bf16.msra.mxu0 %v6532_v43  ;;  %v6594_v43 = vld [vmem:[#allocation6 + $0xd4] ss:$8 sps:$4 sm:$0xff]  }
 0x7cd   : > { %4037 = vmatprep.subr.bf16.mxu0 %v6540_v44  ;;  %v6592_v44 = vld [vmem:[#allocation6 + $0xd0] ss:$8 sps:$4 sm:$0xff]  }
 0x7d0   : > { %4038 = vmatpush1.bf16.msra.mxu0 %v6538_v45  ;;  %v6597_v45 = vld [vmem:[#allocation6 + $0xe4] ss:$8 sps:$4 sm:$0xff]  }
 0x7d1   : > { %4039 = vmatprep.subr.bf16.mxu0 %v6546_v46  ;;  %v6595_v46 = vld [vmem:[#allocation6 + $0xe0] ss:$8 sps:$4 sm:$0xff]  }
 0x7d4   : > { %4040 = vmatpush1.bf16.msra.mxu0 %v6544_v47  ;;  %v6600_v47 = vld [vmem:[#allocation6 + $0x144] ss:$8 sps:$4 sm:$0xff]  }
 0x7d5   : > { %4125 = vmatprep.subr.bf16.mxu0 %v6552_v48  ;;  %v6598_v48 = vld [vmem:[#allocation6 + $0x140] ss:$8 sps:$4 sm:$0xff]  }
 0x862   : > { %v3801_v49 = vpop.f32.mrb[16].mxu0 }
 0x863   : > { %v3803_v50 = vpop.f32.mrb[17].mxu0 }
 0x864   : > { %v3804_v51 = vpop.f32.mrb[18].mxu0  ;;  %v6601_v50 = vld [vmem:[#allocation6 + $0x150] ss:$8 sps:$4 sm:$0xff]  }
 0x865   : > { %v3805_v52 = vpop.f32.mrb[19].mxu0  ;;  %v6606_v51 = vld [vmem:[#allocation6 + $0x164] ss:$8 sps:$4 sm:$0xff]  }
 0x866   : > { %v6604_v52 = vld [vmem:[#allocation6 + $0x160] ss:$8 sps:$4 sm:$0xff]  }
 0x896   : > { %v3946_v53 = vpop.f32.mrb[20].mxu0 }
 0x897   : > { %v3952_v54 = vmax.f32 %v3801_v49, %v3946_v53  ;;  %v3948_v55 = vpop.f32.mrb[21].mxu0  ;;  %v6603_v49 = vld [vmem:[#allocation6 + $0x154] ss:$8 sps:$4 sm:$0xff]  }
 0x898   : > { %v3949_v56 = vpop.f32.mrb[22].mxu0  ;;  %v6609_v53 = vld [vmem:[#allocation6 + $0x174] ss:$8 sps:$4 sm:$0xff]   ;;  %v6612_v55 = vld [vmem:[#allocation6 + $0x184] ss:$8 sps:$4 sm:$0xff]  }
 0x899   : > { %v7385_v57 = vpack.c.bf16 %v3952_v54, %v3952_v54  ;;  %v3950_v58 = vpop.f32.mrb[23].mxu0  ;;  %v6607_v54 = vld [vmem:[#allocation6 + $0x170] ss:$8 sps:$4 sm:$0xff]   ;;  %v6610_v56 = vld [vmem:[#allocation6 + $0x180] ss:$8 sps:$4 sm:$0xff]  }
 0x89a   : > { %v6613_v58 = vld [vmem:[#allocation6 + $0x1e0] ss:$8 sps:$4 sm:$0xff]  }
 0x89b   : > { %4177 = vrot.lane.b32.xlu1 %v7385_v57, %s6774_s13  ;;  %3976 = vrot.lane.b32.xlu0 %v7385_v57, %s6771_s16  ;;  %v4288_v59 = vshll.u32 %v7385_v57, 16  ;;  %v4286_v60 = vshrl.u32 %v7385_v57, 16  ;;  %v7395_v63 = vrot.slane %v7385_v57, 1 }
 0x89d   : > { %v4290_v61 = vrot.slane %v4288_v59, 1  ;;  %v6618_v59 = vld [vmem:[#allocation6 + $0x1f4] ss:$8 sps:$4 sm:$0xff]  }
 0x89f   : > { %v4291_v28 = vor.u32 %v4290_v61, %v4286_v60  ;;  %v6616_v60 = vld [vmem:[#allocation6 + $0x1f0] ss:$8 sps:$4 sm:$0xff]   ;;  %v6621_v61 = vld [vmem:[#allocation6 + $0x204] ss:$8 sps:$4 sm:$0xff]  }
 0x8a1   : > { %4508 = vrot.lane.b32.xlu1 %v4291_v28, %s6774_s13  ;;  %4399 = vrot.lane.b32.xlu0 %v4291_v28, %s6771_s16 }
 0x8a2   : > { %5858 = vmatmul.mubr.msk.bf16.vlgmr.msra.gmra.mrb[20].mxu1 %vm3763_vm10, %v4291_v28  ;;  %v6619_v28 = vld [vmem:[#allocation6 + $0x200] ss:$8 sps:$4 sm:$0xff]  }
 0x8a3   : > { %4564 = vmatpush1.bf16.msra.mxu1 %v6529_v62  ;;  %4595 = vmatprep.mubr.bf16.mxu1 %v6768_v0  ;;  %v6624_v62 = vld [vmem:[#allocation6 + $0x214] ss:$8 sps:$4 sm:$0xff]  }
 0x8a4   : > { %4565 = vmatprep.subr.bf16.mxu1 %v6537_v8  ;;  %v6622_v8 = vld [vmem:[#allocation6 + $0x210] ss:$8 sps:$4 sm:$0xff]  }
 0x8a5   : > { %4834 = vrot.lane.b32.xlu1 %v7395_v63, %s6774_s13  ;;  %4725 = vrot.lane.b32.xlu0 %v7395_v63, %s6771_s16  ;;  %s482_s13 = scalar_lea.vmem %s7548_s29, %s5406_s28 }
 0x8a7   : > { %4566 = vmatpush1.bf16.msra.mxu1 %v6535_v1  ;;  %v6627_v1 = vld [vmem:[#allocation6 + $0x224] ss:$8 sps:$4 sm:$0xff]  }
 0x8a8   : > { %4567 = vmatprep.subr.bf16.mxu1 %v6543_v2  ;;  %v6625_v2 = vld [vmem:[#allocation6 + $0x220] ss:$8 sps:$4 sm:$0xff]  }
 0x8ab   : > { %4568 = vmatpush1.bf16.msra.mxu1 %v6541_v3  ;;  %v6630_v3 = vld [vmem:[#allocation6 + $0x284] ss:$8 sps:$4 sm:$0xff]  }
 0x8ac   : > { %4569 = vmatprep.subr.bf16.mxu1 %v6549_v27  ;;  %v6628_v27 = vld [vmem:[#allocation6 + $0x280] ss:$8 sps:$4 sm:$0xff]  }
 0x8af   : > { %4570 = vmatpush1.bf16.msra.mxu1 %v6547_v4  ;;  %v6633_v4 = vld [vmem:[#allocation6 + $0x294] ss:$8 sps:$4 sm:$0xff]  }
 0x8b0   : > { %4571 = vmatprep.subr.bf16.mxu1 %v6555_v5  ;;  %v6631_v5 = vld [vmem:[#allocation6 + $0x290] ss:$8 sps:$4 sm:$0xff]  }
 0x8b3   : > { %4572 = vmatpush1.bf16.msra.mxu1 %v6553_v6  ;;  %v6636_v6 = vld [vmem:[#allocation6 + $0x2a4] ss:$8 sps:$4 sm:$0xff]  }
 0x8b4   : > { %4780 = vmatprep.subr.bf16.mxu1 %v6561_v9  ;;  %v6634_v9 = vld [vmem:[#allocation6 + $0x2a0] ss:$8 sps:$4 sm:$0xff]  }
 0x90d   : > { %v3977_v11 = vpop.permute.xlu0 %3976  ;;  %v7402_v12 = vpop.permute.xlu1 %4177 }
 0x90e   : > { %5825 = vmatmul.mubr.msk.bf16.vlgmr.msra.gmra.mrb[24].mxu0 %vm3763_vm10, %v3977_v11  ;;  %v6642_v11 = vld [vmem:[#allocation6 + $0x2c4] ss:$8 sps:$4 sm:$0xff]  }
 0x90f   : > { %4126 = vmatpush1.bf16.msra.mxu0 %v6550_v10  ;;  %4157 = vmatprep.mubr.bf16.mxu0 %v6768_v0  ;;  %v6639_v10 = vld [vmem:[#allocation6 + $0x2b4] ss:$8 sps:$4 sm:$0xff]  }
 0x910   : > { %4127 = vmatprep.subr.bf16.mxu0 %v6558_v7  ;;  %v6637_v7 = vld [vmem:[#allocation6 + $0x2b0] ss:$8 sps:$4 sm:$0xff]  }
 0x913   : > { %4128 = vmatpush1.bf16.msra.mxu0 %v6556_v13  ;;  %v4509_v16 = vpop.permute.xlu1 %4508  ;;  %v4400_v37 = vpop.permute.xlu0 %4399 }
 0x914   : > { %5880 = vmatmul.mubr.msk.bf16.vlgmr.msra.gmra.mrb[24].mxu1 %vm3763_vm10, %v4509_v16  ;;  %4129 = vmatprep.subr.bf16.mxu0 %v6564_v14  ;;  %v6643_v16 = vld [vmem:[%s7533_s12] sm:$0xff]  }
 0x915   : > { %4781 = vmatpush1.bf16.msra.mxu1 %v6559_v17  ;;  %4812 = vmatprep.mubr.bf16.mxu1 %v6768_v0 }
 0x916   : > { %4782 = vmatprep.subr.bf16.mxu1 %v6567_v18 }
 0x917   : > { %4130 = vmatpush1.bf16.msra.mxu0 %v6562_v19  ;;  %v4726_v41 = vpop.permute.xlu0 %4725  ;;  %v6645_v19 = vld [vmem:[%s7533_s12 + $0x8] sm:$0xff]  }
 0x918   : > { %4131 = vmatprep.subr.bf16.mxu0 %v6570_v20 }
 0x919   : > { %4783 = vmatpush1.bf16.msra.mxu1 %v6565_v22 }
 0x91a   : > { %4784 = vmatprep.subr.bf16.mxu1 %v6573_v15 }
 0x91b   : > { %4132 = vmatpush1.bf16.msra.mxu0 %v6568_v24  ;;  %v6647_v24 = vld [vmem:[%s7533_s12 + $0x10] sm:$0xff]  }
 0x91c   : > { %4133 = vmatprep.subr.bf16.mxu0 %v6576_v25 }
 0x91d   : > { %4785 = vmatpush1.bf16.msra.mxu1 %v6571_v26 }
 0x91e   : > { %4786 = vmatprep.subr.bf16.mxu1 %v6579_v29  ;;  %v6649_v29 = vld [vmem:[%s7533_s12 + $0x18] sm:$0xff]  }
 0x91f   : > { %4134 = vmatpush1.bf16.msra.mxu0 %v6574_v30 }
 0x920   : > { %4232 = vmatprep.subr.bf16.mxu0 %v6582_v31 }
 0x921   : > { %4787 = vmatpush1.bf16.msra.mxu1 %v6577_v32 }
 0x922   : > { %5836 = vmatmul.mubr.msk.bf16.vlgmr.msra.gmra.mrb[28].mxu0 %vm3763_vm10, %v7385_v57  ;;  %4788 = vmatprep.subr.bf16.mxu1 %v6585_v33  ;;  %v6615_v57 = vld [vmem:[#allocation6 + $0x1e4] ss:$8 sps:$4 sm:$0xff]   ;;  %v6651_v33 = vld [vmem:[%s7533_s12 + $0x20] sm:$0xff]  }
 0x923   : > { %4233 = vmatpush1.bf16.msra.mxu0 %v6580_v34  ;;  %4264 = vmatprep.mubr.bf16.mxu0 %v6768_v0  ;;  %v6653_v34 = vld [vmem:[%s7533_s12 + $0x28] sm:$0xff]  }
 0x924   : > { %4234 = vmatprep.subr.bf16.mxu0 %v6588_v36  ;;  %v6655_v36 = vld [vmem:[%s7533_s12 + $0x30] sm:$0xff]  }
 0x925   : > { %4789 = vmatpush1.bf16.msra.mxu1 %v6583_v38 }
 0x927   : > { %4235 = vmatpush1.bf16.msra.mxu0 %v6586_v39 }
 0x928   : > { %5902 = vmatmul.mubr.msk.bf16.vlgmr.msra.gmra.mrb[28].mxu1 %vm3763_vm10, %v4726_v41  ;;  %4236 = vmatprep.subr.bf16.mxu0 %v6591_v40 }
 0x929   : > { %4997 = vmatprep.mubr.bf16.mxu1 %v6768_v0 }
 0x92b   : > { %4237 = vmatpush1.bf16.msra.mxu0 %v6589_v42 }
 0x92c   : > { %4238 = vmatprep.subr.bf16.mxu0 %v6594_v43 }
 0x92f   : > { %4239 = vmatpush1.bf16.msra.mxu0 %v6592_v44 }
 0x930   : > { %4240 = vmatprep.subr.bf16.mxu0 %v6597_v45 }
 0x933   : > { %4241 = vmatpush1.bf16.msra.mxu0 %v6595_v46 }
 0x934   : > { %4454 = vmatprep.subr.bf16.mxu0 %v6600_v47 }
 0x936   : > { %5847 = vmatmul.mubr.msk.bf16.vlgmr.msra.gmra.mrb[32].mxu0 %vm3763_vm10, %v7402_v12  ;;  %v6640_v12 = vld [vmem:[#allocation6 + $0x2c0] ss:$8 sps:$4 sm:$0xff]  }
 0x937   : > { %4455 = vmatpush1.bf16.msra.mxu0 %v6598_v48  ;;  %4486 = vmatprep.mubr.bf16.mxu0 %v6768_v0 }
 0x938   : > { %4456 = vmatprep.subr.bf16.mxu0 %v6603_v49 }
 0x93b   : > { %4457 = vmatpush1.bf16.msra.mxu0 %v6601_v50 }
 0x93c   : > { %4458 = vmatprep.subr.bf16.mxu0 %v6606_v51 }
 0x93f   : > { %4459 = vmatpush1.bf16.msra.mxu0 %v6604_v52 }
 0x940   : > { %4460 = vmatprep.subr.bf16.mxu0 %v6609_v53 }
 0x943   : > { %4461 = vmatpush1.bf16.msra.mxu0 %v6607_v54 }
 0x944   : > { %4462 = vmatprep.subr.bf16.mxu0 %v6612_v55 }
 0x947   : > { %4463 = vmatpush1.bf16.msra.mxu0 %v6610_v56 }
 0x948   : > { %4671 = vmatprep.subr.bf16.mxu0 %v6615_v57 }
 0x94a   : > { %5869 = vmatmul.mubr.msk.bf16.vlgmr.msra.gmra.mrb[36].mxu0 %vm3763_vm10, %v4400_v37 }
 0x94b   : > { %4672 = vmatpush1.bf16.msra.mxu0 %v6613_v58  ;;  %4703 = vmatprep.mubr.bf16.mxu0 %v6768_v0 }
 0x94c   : > { %4673 = vmatprep.subr.bf16.mxu0 %v6618_v59 }
 0x94f   : > { %4674 = vmatpush1.bf16.msra.mxu0 %v6616_v60 }
 0x950   : > { %4675 = vmatprep.subr.bf16.mxu0 %v6621_v61 }
 0x953   : > { %4676 = vmatpush1.bf16.msra.mxu0 %v6619_v28 }
 0x954   : > { %4677 = vmatprep.subr.bf16.mxu0 %v6624_v62 }
 0x957   : > { %4678 = vmatpush1.bf16.msra.mxu0 %v6622_v8 }
 0x958   : > { %4679 = vmatprep.subr.bf16.mxu0 %v6627_v1 }
 0x95b   : > { %4680 = vmatpush1.bf16.msra.mxu0 %v6625_v2 }
 0x95c   : > { %4889 = vmatprep.subr.bf16.mxu0 %v6630_v3 }
 0x95e   : > { %5891 = vmatmul.mubr.msk.bf16.vlgmr.msra.gmra.mrb[40].mxu0 %vm3763_vm10, %v7395_v63  ;;  %v4835_v63 = vpop.permute.xlu1 %4834 }
 0x95f   : > { %4890 = vmatpush1.bf16.msra.mxu0 %v6628_v27  ;;  %4921 = vmatprep.mubr.bf16.mxu0 %v6768_v0 }
 0x960   : > { %4891 = vmatprep.subr.bf16.mxu0 %v6633_v4 }
 0x963   : > { %4892 = vmatpush1.bf16.msra.mxu0 %v6631_v5 }
 0x964   : > { %4893 = vmatprep.subr.bf16.mxu0 %v6636_v6  ;;  %v4932_v6 = vld [vmem:[%s7531_s10] sm:$0x3] }
 0x967   : > { %4894 = vmatpush1.bf16.msra.mxu0 %v6634_v9  ;;  %v4937_v9 = vrot.slane %v4932_v6, %v7075_v21 }
 0x968   : > { %4895 = vmatprep.subr.bf16.mxu0 %v6639_v10 }
 0x96b   : > { %4896 = vmatpush1.bf16.msra.mxu0 %v6637_v7  ;;  %v4941_v7 = vrot.slane %v4932_v6, %v7080_v23  ;;  %v4950_v23 = vld [vmem:[%s7532_s11] sm:$0x3] }
 0x96c   : > { %4897 = vmatprep.subr.bf16.mxu0 %v6642_v11 }
 0x96f   : > { %4898 = vmatpush1.bf16.msra.mxu0 %v6640_v12 }
 0x970   : > { %5140 = vmatprep.subr.bf16.mxu0 %v6768_v0 }
 0x972   : > { %5913 = vmatmul.mubr.msk.bf16.vlgmr.msra.gmra.mrb[44].mxu0 %vm3763_vm10, %v4835_v63 }
 0x973   : > { %5141 = vmatpush1.bf16.msra.mxu0 %v6643_v16  ;;  %v4957_v16 = vsel %vm4955_vm11, 4294967295, %v6773_v35  ;;  %v5915_v35 = vld [vmem:[%s7532_s11 + $0x2] sm:$0x3] }
 0x974   : > { %5142 = vmatprep.subr.bf16.mxu0 %v6768_v0 }
 0x975   : > { %v4379_v13 = vpop.f32.mrb[20].mxu1 }
 0x976   : > { %v4381_v14 = vpop.f32.mrb[21].mxu1 }
 0x977   : > { %v4383_v17 = vpop.f32.mrb[22].mxu1  ;;  %5143 = vmatpush1.bf16.msra.mxu0 %v6645_v19 }
 0x978   : > { %v4384_v18 = vpop.f32.mrb[23].mxu1  ;;  %5144 = vmatprep.subr.bf16.mxu0 %v6768_v0 }
 0x97b   : > { %5145 = vmatpush1.bf16.msra.mxu0 %v6647_v24 }
 0x97c   : > { %5146 = vmatprep.subr.bf16.mxu0 %v6768_v0 }
 0x97f   : > { %5147 = vmatpush1.bf16.msra.mxu0 %v6649_v29  ;;  %v6646_v29 = vld [vmem:[%s7533_s12 + $0x58] sm:$0xff]  }
 0x980   : > { %5148 = vmatprep.subr.bf16.mxu0 %v6768_v0 }
 0x983   : > { %5149 = vmatpush1.bf16.msra.mxu0 %v6651_v33  ;;  %v6654_v33 = vld [vmem:[%s7533_s12 + $0x78] sm:$0xff]  }
 0x984   : > { %5150 = vmatprep.subr.bf16.mxu0 %v6768_v0 }
 0x987   : > { %5151 = vmatpush1.bf16.msra.mxu0 %v6653_v34  ;;  %v6656_v34 = vld [vmem:[%s7533_s12 + $0x80] sm:$0xff]  }
 0x988   : > { %5152 = vmatprep.subr.bf16.mxu0 %v6768_v0 }
 0x98b   : > { %5153 = vmatpush1.bf16.msra.mxu0 %v6655_v36  ;;  %v6657_v36 = vld [vmem:[%s7533_s12 + $0x38] sm:$0xff]  }
 0x98c   : > { %5154 = vmatprep.subr.bf16.mxu0 %v6768_v0 }
 0x98f   : > { %5155 = vmatpush1.bf16.msra.mxu0 %v6657_v36 }
 0x990   : > { %5156 = vmatprep.subr.bf16.mxu0 %v6768_v0 }
 0x9e1   : > { %v4065_v20 = vpop.f32.mrb[24].mxu0 }
 0x9e2   : > { %v4067_v22 = vpop.f32.mrb[25].mxu0 }
 0x9e3   : > { %v4069_v15 = vpop.f32.mrb[26].mxu0 }
 0x9e4   : > { %v4070_v25 = vpop.f32.mrb[27].mxu0  ;;  %v4958_v15 = vsel %vm4956_vm12, %v4957_v16, 0 }
 0x9e7   : > { %v4597_v26 = vpop.f32.mrb[24].mxu1 }
 0x9e8   : > { %v4599_v30 = vpop.f32.mrb[25].mxu1 }
 0x9e9   : > { %v4601_v31 = vpop.f32.mrb[26].mxu1 }
 0x9ea   : > { %v4602_v32 = vpop.f32.mrb[27].mxu1  ;;  %v6650_v31 = vld [vmem:[%s7533_s12 + $0x68] sm:$0xff]  }
 0x9eb   : > { %v6652_v32 = vld [vmem:[%s7533_s12 + $0x70] sm:$0xff]  }
 0x9f5   : > { %v4159_v37 = vpop.f32.mrb[28].mxu0 }
 0x9f6   : > { %v4160_v38 = vadd.f32 %v4159_v37, %v4065_v20  ;;  %v4161_v39 = vpop.f32.mrb[29].mxu0  ;;  %v6658_v37 = vld [vmem:[%s7533_s12 + $0x88] sm:$0xff]  }
 0x9f7   : > { %v4162_v40 = vadd.f32 %v4161_v39, %v4067_v22  ;;  %v4163_v41 = vpop.f32.mrb[30].mxu0  ;;  %v6660_v39 = vld [vmem:[%s7533_s12 + $0x90] sm:$0xff]  }
 0x9f8   : > { %v4164_v42 = vpop.f32.mrb[31].mxu0  ;;  %v6662_v41 = vld [vmem:[%s7533_s12 + $0x98] sm:$0xff]  }
 0x9fb   : > { %v4814_v43 = vpop.f32.mrb[28].mxu1 }
 0x9fc   : > { %v4816_v44 = vpop.f32.mrb[29].mxu1 }
 0x9fd   : > { %v4818_v45 = vpop.f32.mrb[30].mxu1 }
 0x9fe   : > { %v4819_v46 = vpop.f32.mrb[31].mxu1 }
 0xa09   : > { %v4266_v47 = vpop.f32.mrb[32].mxu0 }
 0xa0a   : > { %v4273_v48 = vadd.f32 %v4266_v47, %v4160_v38  ;;  %v4268_v49 = vpop.f32.mrb[33].mxu0  ;;  %v6659_v38 = vld [vmem:[%s7533_s12 + $0x40] sm:$0xff]  }
 0xa0b   : > { %v4274_v50 = vadd.f32 %v4268_v49, %v4162_v40  ;;  %v4270_v51 = vpop.f32.mrb[34].mxu0  ;;  %5157 = vmatpush1.bf16.msra.mxu0 %v6659_v38  ;;  %v6661_v40 = vld [vmem:[%s7533_s12 + $0x48] sm:$0xff]  }
 0xa0c   : > { %v4271_v52 = vpop.f32.mrb[35].mxu0  ;;  %v4386_v53 = vadd.f32 %v4379_v13, %v4273_v48  ;;  %5158 = vmatprep.subr.bf16.mxu0 %v6768_v0 }
 0xa0d   : > { %v4387_v54 = vadd.f32 %v4381_v14, %v4274_v50 }
 0xa0f   : > { %5159 = vmatpush1.bf16.msra.mxu0 %v6661_v40 }
 0xa1d   : > { %v4488_v55 = vpop.f32.mrb[36].mxu0 }
 0xa1e   : > { %v4495_v56 = vadd.f32 %v4488_v55, %v4386_v53  ;;  %v4490_v57 = vpop.f32.mrb[37].mxu0 }
 0xa1f   : > { %v4496_v58 = vadd.f32 %v4490_v57, %v4387_v54  ;;  %v4492_v59 = vpop.f32.mrb[38].mxu0 }
 0xa20   : > { %v4493_v60 = vpop.f32.mrb[39].mxu0  ;;  %v4604_v61 = vadd.f32 %v4597_v26, %v4495_v56  ;;  %v6644_v26 = vld [vmem:[%s7533_s12 + $0x50] sm:$0xff]  }
 0xa21   : > { %v4605_v28 = vadd.f32 %v4599_v30, %v4496_v58  ;;  %v6648_v30 = vld [vmem:[%s7533_s12 + $0x60] sm:$0xff]  }
 0xa22   : > { %v5306_v58 = vld [vmem:[%s482_s13] sm:$0x3] }
 0xa31   : > { %v4705_v62 = vpop.f32.mrb[40].mxu0 }
 0xa32   : > { %v4712_v8 = vadd.f32 %v4705_v62, %v4604_v61  ;;  %v4707_v1 = vpop.f32.mrb[41].mxu0 }
 0xa33   : > { %v4713_v2 = vadd.f32 %v4707_v1, %v4605_v28  ;;  %v4709_v3 = vpop.f32.mrb[42].mxu0 }
 0xa34   : > { %v4710_v27 = vpop.f32.mrb[43].mxu0  ;;  %v4821_v4 = vadd.f32 %v4814_v43, %v4712_v8 }
 0xa35   : > { %v4822_v5 = vadd.f32 %v4816_v44, %v4713_v2 }
 0xa45   : > { %v4923_v10 = vpop.f32.mrb[44].mxu0 }
 0xa46   : > { %v4930_v11 = vadd.f32 %v4923_v10, %v4821_v4  ;;  %v4925_v12 = vpop.f32.mrb[45].mxu0 }
 0xa47   : > { %v4931_v63 = vadd.f32 %v4925_v12, %v4822_v5  ;;  %v4927_v13 = vpop.f32.mrb[46].mxu0 }
 0xa48   : > { %v4944_v14 = vadd.f32 %v4937_v9, %v4930_v11  ;;  %v4928_v17 = vpop.f32.mrb[47].mxu0 }
 0xa49   : > { %v4945_v18 = vadd.f32 %v4941_v7, %v4931_v63 }
 0xa4a   : > { %v4946_v19 = vmax.f32 %v4944_v14, 0.0 }
 0xa4b   : > { %v4947_v20 = vmax.f32 %v4945_v18, 0.0 }
 0xa4c   : > { %v4948_v22 = vpack.c.bf16 %v4946_v19, %v4946_v19 }
 0xa4d   : > { %v4949_v24 = vpack.c.bf16 %v4947_v20, %v4947_v20 }
 0xa4e   : > { %v4960_v25 = vand.u32 %v4958_v15, %v4948_v22 }
 0xa4f   : > { %v4963_v21 = vand.u32 %v4958_v15, %v4949_v24 }
 0xa51   : > { %4965 = vmatprep.subr.bf16.mxu1 %v4963_v21 }
 0xa52   : > { %4966 = vmatpush1.bf16.msra.mxu1 %v4960_v25 }
 0xa53   : > { %5011 = vmatprep.subr.bf16.mxu1 %v4963_v21 }
 0xa55   : > { %5914 = vmatmul.mubr.msk.bf16.vlgmr.msra.gmra.mrb[32].mxu1 %vm4951_vm13, %v4950_v23 }
 0xa56   : > { %5012 = vmatpush1.bf16.msra.mxu1 %v4960_v25  ;;  %5043 = vmatprep.mubr.bf16.mxu1 %v6768_v0 }
 0xa57   : > { %5261 = vmatprep.subr.bf16.mxu1 %v6768_v0 }
 0xa5d   : > { %5916 = vmatmul.mubr.msk.bf16.vlgmr.msra.gmra.mrb[36].mxu1 %vm4951_vm13, %v5915_v35 }
 0xa5e   : > { %5262 = vmatpush1.bf16.msra.mxu1 %v6644_v26 }
 0xa5f   : > { %5263 = vmatprep.subr.bf16.mxu1 %v6768_v0 }
 0xa62   : > { %5264 = vmatpush1.bf16.msra.mxu1 %v6646_v29 }
 0xa63   : > { %5265 = vmatprep.subr.bf16.mxu1 %v6768_v0 }
 0xa66   : > { %5266 = vmatpush1.bf16.msra.mxu1 %v6648_v30 }
 0xa67   : > { %5267 = vmatprep.subr.bf16.mxu1 %v6768_v0 }
 0xa6a   : > { %5268 = vmatpush1.bf16.msra.mxu1 %v6650_v31 }
 0xa6b   : > { %5269 = vmatprep.subr.bf16.mxu1 %v6768_v0 }
 0xa6e   : > { %5270 = vmatpush1.bf16.msra.mxu1 %v6652_v32 }
 0xa6f   : > { %5271 = vmatprep.subr.bf16.mxu1 %v6768_v0 }
 0xa72   : > { %5272 = vmatpush1.bf16.msra.mxu1 %v6654_v33 }
 0xa73   : > { %5273 = vmatprep.subr.bf16.mxu1 %v6768_v0 }
 0xa76   : > { %5274 = vmatpush1.bf16.msra.mxu1 %v6656_v34 }
 0xa77   : > { %5275 = vmatprep.subr.bf16.mxu1 %v6768_v0 }
 0xa7a   : > { %5276 = vmatpush1.bf16.msra.mxu1 %v6658_v37 }
 0xa7b   : > { %5277 = vmatprep.subr.bf16.mxu1 %v6768_v0 }
 0xa7e   : > { %5278 = vmatpush1.bf16.msra.mxu1 %v6660_v39 }
 0xa7f   : > { %5279 = vmatprep.subr.bf16.mxu1 %v6768_v0 }
 0xa82   : > { %5280 = vmatpush1.bf16.msra.mxu1 %v6662_v41 }
 0xb28   : > { %v4999_v42 = vpop.f32.mrb[32].mxu1 }
 0xb29   : > { %v5001_v43 = vpop.f32.mrb[33].mxu1 }
 0xb2a   : > { %v5003_v44 = vpop.f32.mrb[34].mxu1 }
 0xb2b   : > { %v5004_v45 = vpop.f32.mrb[35].mxu1 }
 0xb30   : > { %v5045_v46 = vpop.f32.mrb[36].mxu1 }
 0xb31   : > { %v5052_v47 = vmax.f32 %v4999_v42, %v5045_v46  ;;  %v5047_v48 = vpop.f32.mrb[37].mxu1 }
 0xb32   : > { %v5053_v49 = vmax.f32 %v5001_v43, %v5047_v48  ;;  %v5049_v0 = vpop.f32.mrb[38].mxu1 }
 0xb33   : > { %v5050_v50 = vpop.f32.mrb[39].mxu1  ;;  %v5054_v52 = vpack.c.bf16 %v5052_v47, %v5052_v47 }
 0xb34   : > { %v5055_v51 = vpack.c.bf16 %v5053_v49, %v5053_v49 }
 0xb36   : > { %5927 = vmatprep.mubr.msk.bf16.mxu0 %vm5136_vm14, %v5055_v51  ;;  %5958 = vmatprep.mubr.msk.bf16.mxu1 %vm5136_vm14, %v5055_v51 }
 0xb37   : > { %5173 = vmatmul.mubr.bf16.vlgmr.msra.gmra.mrb[48].mxu0 %v5054_v52  ;;  %5294 = vmatmul.mubr.bf16.vlgmr.msra.gmra.mrb[40].mxu1 %v5054_v52 }
 0xc0a   : > { %v5174_v53 = vpop.f32.mrb[48].mxu0  ;;  %v5295_v54 = vpop.f32.mrb[40].mxu1 }
 0xc0b   : > { %v5301_v55 = vmax.f32 %v5174_v53, %v5295_v54  ;;  %v5176_v56 = vpop.f32.mrb[49].mxu0  ;;  %v5297_v57 = vpop.f32.mrb[41].mxu1 }
 0xc0c   : > { %v5177_v59 = vpop.f32.mrb[50].mxu0  ;;  %v5298_v60 = vpop.f32.mrb[42].mxu1 }
 0xc0d   : > { %v5302_v61 = vpack.c.bf16 %v5301_v55, %v5301_v55  ;;  %v5178_v28 = vpop.f32.mrb[51].mxu0  ;;  %v5299_v62 = vpop.f32.mrb[43].mxu1 }
 0xc0f   : > { %v5307_v8 = vsel %vm5305_vm1, %v5302_v61, %v5306_v58 }
 0xc10   : > { %5308 = vst [vmem:[%s482_s13] sm:$0x3] %v5307_v8 }
 0xc11 PF: > { %s7549_s26 = sld [smem:[#allocation9_spill]] }
 0xc17   : > { %s25_s25 = sadd.s32 1, %s7549_s26  }
 0xc18   : > { %p22_p5 = scmp.ge.s32.totalorder %s25_s25, 4  }
 0xc1a   :  { %24 = sbr.rel (!%p22_p5) target bundleno = 4 (0x4), region = 145 }
 0xc21   :  { %5328 = vsyncpa [#allocation3], 1 }
 0xc22   :  { %5330 = vsyncpa [#allocation3 + $0x1], 1 }
 0xc23   :  { %5331 = vsyncpa [#allocation5], 1 }

</bundles_post_ra>
